<compile_context>
chip_gen: v5e
topology: v5e:2x2
jax: 0.10.0
libtpu: 0.0.40
codegen_flags: <defaults>
</compile_context>

<pallas_src>
import functools

import jax
import jax.numpy as jnp
from jax import lax
from jax.experimental import pallas as pl
from jax.experimental.pallas import tpu as pltpu


def _stand_gatx_kernel(*refs, heads, layer_cfgs, negative_slope=0.2):
    """Fused forward over all GATConv layers.

    refs = [x, mask_bias, (w_all, adst_mat, asrc_mat, head_mask, bias) * L, out]
    """
    x_ref, mask_ref = refs[0], refs[1]
    out_ref = refs[-1]
    p_refs = refs[2:-1]

    mask_bias = mask_ref[...]                      # (N, N): 0 on edges j->i, -1e30 elsewhere
    h = x_ref[...]                                 # (N, F_in) current activations (f32)
    dn_bt = (((1,), (1,)), ((), ()))               # contract last dims of both operands

    # Layers/heads are small & static; the head fusion below keeps live temporaries
    # to one (N, N) logits slab at a time, so the unrolled Python loops don't spill.
    for li, (out_ch, apply_relu) in enumerate(layer_cfgs):
        w_ref, adst_ref, asrc_ref, hmask_ref, bias_ref = p_refs[5 * li:5 * li + 5]

        # Fused per-head projection: (N, F) @ (F, H*C) -> lane-concatenated (N, H*C).
        h_all = jnp.dot(h, w_ref[...], preferred_element_type=jnp.float32)

        # Attention scores for ALL heads via two tiny MXU matmuls on the dense slab.
        # alpha_dst[i, hd] = <att_dst_hd, h_all[i, hd-block]>
        alpha_dst = jnp.dot(h_all, adst_ref[...],
                            preferred_element_type=jnp.float32)          # (N, H)
        # s_rows[hd, j]   = <att_src_hd, h_all[j, hd-block]>  (already lane-major rows)
        s_rows = lax.dot_general(asrc_ref[...], h_all, dn_bt,
                                 preferred_element_type=jnp.float32)     # (H, N)

        h_all_bf = h_all.astype(jnp.bfloat16)
        head_mask = hmask_ref[...].astype(jnp.bfloat16)                   # (H, H*C) 0/1

        h_new = None
        for hd in range(heads):
            # e[i, j] = LeakyReLU(alpha_src[j] + alpha_dst[i]); masked softmax per row.
            logits = alpha_dst[:, hd:hd + 1] + s_rows[hd:hd + 1, :]       # (N, N)
            logits = jnp.where(logits >= 0.0, logits, negative_slope * logits)
            logits = logits + mask_bias                                   # additive mask
            logits = logits - jnp.max(logits, axis=-1, keepdims=True)
            p = jnp.exp(logits)                                           # f32 softmax math
            inv_den = pl.reciprocal(jnp.sum(p, axis=-1, keepdims=True),
                                    approx=True)                          # (N, 1)

            # Aggregate with unnormalized weights straight into the (N, H*C) layout:
            # other heads' lanes of the RHS are zeroed (VPU mask-mul, no placement matmul).
            rhs = h_all_bf * head_mask[hd:hd + 1, :]                       # (N, H*C) bf16
            agg = jnp.dot(p.astype(jnp.bfloat16), rhs,
                          preferred_element_type=jnp.float32)              # (N, H*C)
            contrib = agg * inv_den                                        # rescale post-agg
            h_new = contrib if h_new is None else h_new + contrib

        h_new = h_new + bias_ref[...]              # (N, H*C), PyG bias after concat
        if apply_relu:                             # fuse the F.relu following the layer
            h_new = jnp.maximum(h_new, 0.0)
        h = h_new

    out_ref[...] = h                               # (N, H*C_last)
    # TODO(synk): output width H*C=16 (<128) is a masked partial store; pad to a
    # multiple of 128 wrapper-side if the model is ever scaled up.


def _im2(i):
    return (0, 0)


def stand_gatx_forward(x, mask_bias, layers, layer_cfgs, heads):
    """Run the fused StandGATX forward pass as one pallas_call."""
    n, f_in = x.shape
    out_width = heads * layer_cfgs[-1][0]

    inputs = [x, mask_bias]
    in_specs = [
        pl.BlockSpec((n, f_in), _im2),
        pl.BlockSpec((n, n), _im2),
    ]
    for lp in layers:
        for name in ("w_all", "adst_mat", "asrc_mat", "head_mask", "bias"):
            arr = lp[name]
            inputs.append(arr)
            in_specs.append(pl.BlockSpec(arr.shape, _im2))

    # Advisory cost estimate so XLA schedules around this call sensibly.
    flops = 0
    f_cur = f_in
    for (c, _relu) in layer_cfgs:
        hc = heads * c
        flops += (2 * n * f_cur * hc                 # fused projection
                  + 2 * n * hc * heads               # alpha_dst (all heads)
                  + 2 * heads * hc * n               # s_rows (all heads)
                  + heads * (6 * n * n               # logits / softmax elementwise
                             + 2 * n * n * hc))      # aggregation
        f_cur = hc
    transcendentals = len(layer_cfgs) * heads * n * n
    bytes_accessed = int(4 * (x.size + mask_bias.size + n * out_width
                              + sum(lp[k].size for lp in layers
                                    for k in ("w_all", "adst_mat", "asrc_mat",
                                              "head_mask", "bias"))))

    kernel = functools.partial(_stand_gatx_kernel, heads=heads,
                               layer_cfgs=tuple(layer_cfgs))
    return pl.pallas_call(
        kernel,
        out_shape=jax.ShapeDtypeStruct((n, out_width), jnp.float32),
        grid=(1,),
        in_specs=in_specs,
        out_specs=pl.BlockSpec((n, out_width), _im2),
        compiler_params=pltpu.CompilerParams(dimension_semantics=("arbitrary",)),
        cost_estimate=pl.CostEstimate(flops=int(flops),
                                      transcendentals=int(transcendentals),
                                      bytes_accessed=bytes_accessed),
    )(*inputs)


def _glorot(key, shape, fan_in, fan_out):
    limit = (6.0 / (fan_in + fan_out)) ** 0.5
    return jax.random.uniform(key, shape, jnp.float32, -limit, limit)


def init_gat_layer(key, in_ch, out_ch, heads):
    k_w, k_s, k_d = jax.random.split(key, 3)
    hc = heads * out_ch
    # Fused projection weight already in lane-concatenated (F_in, H*C) layout.
    w_all = _glorot(k_w, (in_ch, hc), in_ch, hc)
    att_src = _glorot(k_s, (heads, out_ch), out_ch, 1)                     # (H, C)
    att_dst = _glorot(k_d, (heads, out_ch), out_ch, 1)                     # (H, C)

    # Block structure: row/lane r of the H*C axis belongs to head r // C.
    head_of = jnp.repeat(jnp.arange(heads), out_ch)                        # (H*C,)
    blockmask = (head_of[:, None] == jnp.arange(heads)[None, :]            # (H*C, H)
                 ).astype(jnp.float32)
    adst_mat = att_dst.reshape(-1)[:, None] * blockmask                    # (H*C, H)
    asrc_mat = blockmask.T * att_src.reshape(-1)[None, :]                  # (H, H*C)
    head_mask = blockmask.T                                                # (H, H*C) 0/1

    return {
        "w_all": w_all,
        "adst_mat": adst_mat,
        "asrc_mat": asrc_mat,
        "head_mask": head_mask,
        "bias": jnp.zeros((1, hc), jnp.float32),   # PyG bias init = zeros
    }


def edge_index_to_mask_bias(edge_index, num_nodes):
    """edge_index (2, E) [src; dst] -> additive mask: 0 if edge j->i (with self loops), else -1e30.

    Assumes a simple graph (no duplicate edges), matching typical GATConv inputs.
    TODO(synk): for large N ship this as int8 adjacency and form the bias in-kernel.
    """
    src, dst = edge_index[0], edge_index[1]
    adj = jnp.zeros((num_nodes, num_nodes), jnp.bool_)
    adj = adj.at[dst, src].set(True)
    idx = jnp.arange(num_nodes)
    adj = adj.at[idx, idx].set(True)                        # add_self_loops=True (PyG default)
    return jnp.where(adj, 0.0, -1e30).astype(jnp.float32)


class StandGATX:
    """JAX/Pallas port of the PyTorch StandGATX (GATConv with heads=4, concat=True)."""

    def __init__(self, nfeat, nhid, nclass, dropout, nlayer=3, *, key):
        heads = 4
        self.heads = heads
        self.dropout_p = dropout
        keys = jax.random.split(key, nlayer)

        self.layers = []
        self.layer_cfgs = []
        # conv1 = GATConv(nfeat, nclass, heads=4), followed by F.relu (fused in kernel)
        self.layers.append(init_gat_layer(keys[0], nfeat, nclass, heads))
        self.layer_cfgs.append((nclass, True))
        # TODO(synk): the reference module declares GATConv(nhid, nhid)/GATConv(nhid, nclass)
        # for convx/conv2, which is dimensionally inconsistent with concat=True, heads=4 and
        # nlayer>=3; each layer's input width here is sized from the actual incoming feature
        # width (declared output widths kept).
        cur = heads * nclass
        for li in range(nlayer - 2):
            self.layers.append(init_gat_layer(keys[1 + li], cur, nhid, heads))
            self.layer_cfgs.append((nhid, True))
            cur = heads * nhid
        # conv2 = GATConv(nhid, nclass, heads=4), no ReLU
        self.layers.append(init_gat_layer(keys[-1], cur, nclass, heads))
        self.layer_cfgs.append((nclass, False))

    def __call__(self, x, edge_index):
        n = x.shape[0]
        mask_bias = edge_index_to_mask_bias(edge_index, n)
        # TODO(synk): training-mode dropout (Bernoulli mask + 1/(1-p) scaling) not applied;
        # F.dropout(..., training=False) is the identity, matching inference semantics.
        return stand_gatx_forward(x, mask_bias, self.layers, self.layer_cfgs, self.heads)


if __name__ == "__main__":
    key = jax.random.PRNGKey(0)
    k_x, k_e, k_p = jax.random.split(key, 3)

    num_nodes, nfeat, nhid, nclass = 64, 16, 16, 4
    num_edges = 256

    x = jax.random.normal(k_x, (num_nodes, nfeat), jnp.float32)
    # Unique random directed edges (no duplicates) as edge_index = [src; dst], shape (2, E).
    flat = jax.random.choice(k_e, num_nodes * num_nodes, (num_edges,), replace=False)
    edge_index = jnp.stack([flat % num_nodes, flat // num_nodes]).astype(jnp.int32)

    model = StandGATX(nfeat, nhid, nclass, dropout=0.5, nlayer=3, key=k_p)
    out = model(x, edge_index)
    out = jax.block_until_ready(out)

    assert out.shape == (num_nodes, 4 * nclass), out.shape
    assert bool(jnp.all(jnp.isfinite(out)))
    print("KERNEL_OK")
</pallas_src>

<mosaic_0001>
module attributes {stable_mosaic.version = 11 : i64} {
  func.func @_stand_gatx_kernel(%arg0: i32, %arg1: memref<64x16xf32, #tpu.memory_space<vmem>>, %arg2: memref<64x64xf32, #tpu.memory_space<vmem>>, %arg3: memref<16x16xf32, #tpu.memory_space<vmem>>, %arg4: memref<16x4xf32, #tpu.memory_space<vmem>>, %arg5: memref<4x16xf32, #tpu.memory_space<vmem>>, %arg6: memref<4x16xf32, #tpu.memory_space<vmem>>, %arg7: memref<1x16xf32, #tpu.memory_space<vmem>>, %arg8: memref<16x64xf32, #tpu.memory_space<vmem>>, %arg9: memref<64x4xf32, #tpu.memory_space<vmem>>, %arg10: memref<4x64xf32, #tpu.memory_space<vmem>>, %arg11: memref<4x64xf32, #tpu.memory_space<vmem>>, %arg12: memref<1x64xf32, #tpu.memory_space<vmem>>, %arg13: memref<64x16xf32, #tpu.memory_space<vmem>>, %arg14: memref<16x4xf32, #tpu.memory_space<vmem>>, %arg15: memref<4x16xf32, #tpu.memory_space<vmem>>, %arg16: memref<4x16xf32, #tpu.memory_space<vmem>>, %arg17: memref<1x16xf32, #tpu.memory_space<vmem>>, %arg18: memref<64x16xf32, #tpu.memory_space<vmem>>) attributes {dimension_semantics = [#tpu.dimension_semantics<arbitrary>], iteration_bounds = array<i64: 1>, scalar_prefetch = 0 : i64, scratch_operands = 0 : i64, tpu.core_type = #tpu.core_type<tc>, window_params = [{pipeline_mode = #tpu.pipeline_mode<synchronous>, transform_indices = @transform_0, window_bounds = array<i64: 64, 16>}, {pipeline_mode = #tpu.pipeline_mode<synchronous>, transform_indices = @transform_1, window_bounds = array<i64: 64, 64>}, {pipeline_mode = #tpu.pipeline_mode<synchronous>, transform_indices = @transform_2, window_bounds = array<i64: 16, 16>}, {pipeline_mode = #tpu.pipeline_mode<synchronous>, transform_indices = @transform_3, window_bounds = array<i64: 16, 4>}, {pipeline_mode = #tpu.pipeline_mode<synchronous>, transform_indices = @transform_4, window_bounds = array<i64: 4, 16>}, {pipeline_mode = #tpu.pipeline_mode<synchronous>, transform_indices = @transform_5, window_bounds = array<i64: 4, 16>}, {pipeline_mode = #tpu.pipeline_mode<synchronous>, transform_indices = @transform_6, window_bounds = array<i64: 1, 16>}, {pipeline_mode = #tpu.pipeline_mode<synchronous>, transform_indices = @transform_7, window_bounds = array<i64: 16, 64>}, {pipeline_mode = #tpu.pipeline_mode<synchronous>, transform_indices = @transform_8, window_bounds = array<i64: 64, 4>}, {pipeline_mode = #tpu.pipeline_mode<synchronous>, transform_indices = @transform_9, window_bounds = array<i64: 4, 64>}, {pipeline_mode = #tpu.pipeline_mode<synchronous>, transform_indices = @transform_10, window_bounds = array<i64: 4, 64>}, {pipeline_mode = #tpu.pipeline_mode<synchronous>, transform_indices = @transform_11, window_bounds = array<i64: 1, 64>}, {pipeline_mode = #tpu.pipeline_mode<synchronous>, transform_indices = @transform_12, window_bounds = array<i64: 64, 16>}, {pipeline_mode = #tpu.pipeline_mode<synchronous>, transform_indices = @transform_13, window_bounds = array<i64: 16, 4>}, {pipeline_mode = #tpu.pipeline_mode<synchronous>, transform_indices = @transform_14, window_bounds = array<i64: 4, 16>}, {pipeline_mode = #tpu.pipeline_mode<synchronous>, transform_indices = @transform_15, window_bounds = array<i64: 4, 16>}, {pipeline_mode = #tpu.pipeline_mode<synchronous>, transform_indices = @transform_16, window_bounds = array<i64: 1, 16>}, {pipeline_mode = #tpu.pipeline_mode<synchronous>, transform_indices = @transform_17, window_bounds = array<i64: 64, 16>}]} {
    %c0 = arith.constant 0 : index
    %c0_0 = arith.constant 0 : index
    %0 = vector.load %arg2[%c0, %c0_0] : memref<64x64xf32, #tpu.memory_space<vmem>>, vector<64x64xf32>
    %c0_1 = arith.constant 0 : index
    %c0_2 = arith.constant 0 : index
    %1 = vector.load %arg1[%c0_1, %c0_2] : memref<64x16xf32, #tpu.memory_space<vmem>>, vector<64x16xf32>
    %c0_3 = arith.constant 0 : index
    %c0_4 = arith.constant 0 : index
    %2 = vector.load %arg3[%c0_3, %c0_4] : memref<16x16xf32, #tpu.memory_space<vmem>>, vector<16x16xf32>
    %cst = arith.constant dense<0.000000e+00> : vector<64x16xf32>
    %3 = tpu.matmul %1, %2, %cst {dimension_numbers = #tpu.dot_dimension_numbers<[1], [0], [0], [1], [0, 0, 1, 1], [], []>} : vector<64x16xf32>, vector<16x16xf32>, vector<64x16xf32> -> vector<64x16xf32>
    %c0_5 = arith.constant 0 : index
    %c0_6 = arith.constant 0 : index
    %4 = vector.load %arg4[%c0_5, %c0_6] : memref<16x4xf32, #tpu.memory_space<vmem>>, vector<16x4xf32>
    %cst_7 = arith.constant dense<0.000000e+00> : vector<64x4xf32>
    %5 = tpu.matmul %3, %4, %cst_7 {dimension_numbers = #tpu.dot_dimension_numbers<[1], [0], [0], [1], [0, 0, 1, 1], [], []>} : vector<64x16xf32>, vector<16x4xf32>, vector<64x4xf32> -> vector<64x4xf32>
    %c0_8 = arith.constant 0 : index
    %c0_9 = arith.constant 0 : index
    %6 = vector.load %arg5[%c0_8, %c0_9] : memref<4x16xf32, #tpu.memory_space<vmem>>, vector<4x16xf32>
    %cst_10 = arith.constant dense<0.000000e+00> : vector<4x64xf32>
    %7 = tpu.matmul %6, %3, %cst_10 {dimension_numbers = #tpu.dot_dimension_numbers<[1], [1], [0], [0], [0, 0, 1, 0], [], []>} : vector<4x16xf32>, vector<64x16xf32>, vector<4x64xf32> -> vector<4x64xf32>
    %8 = arith.truncf %3 : vector<64x16xf32> to vector<64x16xbf16>
    %c0_11 = arith.constant 0 : index
    %c0_12 = arith.constant 0 : index
    %9 = vector.load %arg6[%c0_11, %c0_12] : memref<4x16xf32, #tpu.memory_space<vmem>>, vector<4x16xf32>
    %10 = arith.truncf %9 : vector<4x16xf32> to vector<4x16xbf16>
    %11 = vector.extract_strided_slice %5 {offsets = [0, 0], sizes = [64, 1], strides = [1, 1]} : vector<64x4xf32> to vector<64x1xf32>
    %12 = vector.extract_strided_slice %7 {offsets = [0, 0], sizes = [1, 64], strides = [1, 1]} : vector<4x64xf32> to vector<1x64xf32>
    %13 = vector.broadcast %11 : vector<64x1xf32> to vector<64x64xf32>
    %14 = vector.broadcast %12 : vector<1x64xf32> to vector<64x64xf32>
    %15 = arith.addf %13, %14 : vector<64x64xf32>
    %cst_13 = arith.constant 0.000000e+00 : f32
    %16 = vector.broadcast %cst_13 : f32 to vector<64x64xf32>
    %17 = arith.cmpf oge, %15, %16 : vector<64x64xf32>
    %cst_14 = arith.constant 2.000000e-01 : f32
    %18 = vector.broadcast %cst_14 : f32 to vector<64x64xf32>
    %19 = arith.mulf %18, %15 : vector<64x64xf32>
    %20 = arith.select %17, %15, %19 : vector<64x64xi1>, vector<64x64xf32>
    %21 = arith.addf %20, %0 : vector<64x64xf32>
    %cst_15 = arith.constant dense<0xFF800000> : vector<64xf32>
    %22 = vector.multi_reduction <maximumf>, %21, %cst_15 [1] : vector<64x64xf32> to vector<64xf32>
    %23 = vector.shape_cast %22 : vector<64xf32> to vector<64x1xf32>
    %24 = vector.broadcast %23 : vector<64x1xf32> to vector<64x64xf32>
    %25 = arith.subf %21, %24 : vector<64x64xf32>
    %26 = math.exp %25 : vector<64x64xf32>
    %cst_16 = arith.constant dense<0.000000e+00> : vector<64xf32>
    %27 = vector.multi_reduction <add>, %26, %cst_16 [1] : vector<64x64xf32> to vector<64xf32>
    %28 = vector.shape_cast %27 : vector<64xf32> to vector<64x1xf32>
    %29 = tpu.reciprocal %28 {approx = true} : vector<64x1xf32> -> vector<64x1xf32>
    %30 = vector.extract_strided_slice %10 {offsets = [0, 0], sizes = [1, 16], strides = [1, 1]} : vector<4x16xbf16> to vector<1x16xbf16>
    %31 = vector.broadcast %30 : vector<1x16xbf16> to vector<64x16xbf16>
    %32 = arith.mulf %8, %31 : vector<64x16xbf16>
    %33 = arith.truncf %26 : vector<64x64xf32> to vector<64x64xbf16>
    %cst_17 = arith.constant dense<0.000000e+00> : vector<64x16xf32>
    %34 = tpu.matmul %33, %32, %cst_17 {dimension_numbers = #tpu.dot_dimension_numbers<[1], [0], [0], [1], [0, 0, 1, 1], [], []>} : vector<64x64xbf16>, vector<64x16xbf16>, vector<64x16xf32> -> vector<64x16xf32>
    %35 = vector.broadcast %29 : vector<64x1xf32> to vector<64x16xf32>
    %36 = arith.mulf %34, %35 : vector<64x16xf32>
    %37 = vector.extract_strided_slice %5 {offsets = [0, 1], sizes = [64, 1], strides = [1, 1]} : vector<64x4xf32> to vector<64x1xf32>
    %38 = vector.extract_strided_slice %7 {offsets = [1, 0], sizes = [1, 64], strides = [1, 1]} : vector<4x64xf32> to vector<1x64xf32>
    %39 = vector.broadcast %37 : vector<64x1xf32> to vector<64x64xf32>
    %40 = vector.broadcast %38 : vector<1x64xf32> to vector<64x64xf32>
    %41 = arith.addf %39, %40 : vector<64x64xf32>
    %cst_18 = arith.constant 0.000000e+00 : f32
    %42 = vector.broadcast %cst_18 : f32 to vector<64x64xf32>
    %43 = arith.cmpf oge, %41, %42 : vector<64x64xf32>
    %cst_19 = arith.constant 2.000000e-01 : f32
    %44 = vector.broadcast %cst_19 : f32 to vector<64x64xf32>
    %45 = arith.mulf %44, %41 : vector<64x64xf32>
    %46 = arith.select %43, %41, %45 : vector<64x64xi1>, vector<64x64xf32>
    %47 = arith.addf %46, %0 : vector<64x64xf32>
    %cst_20 = arith.constant dense<0xFF800000> : vector<64xf32>
    %48 = vector.multi_reduction <maximumf>, %47, %cst_20 [1] : vector<64x64xf32> to vector<64xf32>
    %49 = vector.shape_cast %48 : vector<64xf32> to vector<64x1xf32>
    %50 = vector.broadcast %49 : vector<64x1xf32> to vector<64x64xf32>
    %51 = arith.subf %47, %50 : vector<64x64xf32>
    %52 = math.exp %51 : vector<64x64xf32>
    %cst_21 = arith.constant dense<0.000000e+00> : vector<64xf32>
    %53 = vector.multi_reduction <add>, %52, %cst_21 [1] : vector<64x64xf32> to vector<64xf32>
    %54 = vector.shape_cast %53 : vector<64xf32> to vector<64x1xf32>
    %55 = tpu.reciprocal %54 {approx = true} : vector<64x1xf32> -> vector<64x1xf32>
    %56 = vector.extract_strided_slice %10 {offsets = [1, 0], sizes = [1, 16], strides = [1, 1]} : vector<4x16xbf16> to vector<1x16xbf16>
    %57 = vector.broadcast %56 : vector<1x16xbf16> to vector<64x16xbf16>
    %58 = arith.mulf %8, %57 : vector<64x16xbf16>
    %59 = arith.truncf %52 : vector<64x64xf32> to vector<64x64xbf16>
    %cst_22 = arith.constant dense<0.000000e+00> : vector<64x16xf32>
    %60 = tpu.matmul %59, %58, %cst_22 {dimension_numbers = #tpu.dot_dimension_numbers<[1], [0], [0], [1], [0, 0, 1, 1], [], []>} : vector<64x64xbf16>, vector<64x16xbf16>, vector<64x16xf32> -> vector<64x16xf32>
    %61 = vector.broadcast %55 : vector<64x1xf32> to vector<64x16xf32>
    %62 = arith.mulf %60, %61 : vector<64x16xf32>
    %63 = arith.addf %36, %62 : vector<64x16xf32>
    %64 = vector.extract_strided_slice %5 {offsets = [0, 2], sizes = [64, 1], strides = [1, 1]} : vector<64x4xf32> to vector<64x1xf32>
    %65 = vector.extract_strided_slice %7 {offsets = [2, 0], sizes = [1, 64], strides = [1, 1]} : vector<4x64xf32> to vector<1x64xf32>
    %66 = vector.broadcast %64 : vector<64x1xf32> to vector<64x64xf32>
    %67 = vector.broadcast %65 : vector<1x64xf32> to vector<64x64xf32>
    %68 = arith.addf %66, %67 : vector<64x64xf32>
    %cst_23 = arith.constant 0.000000e+00 : f32
    %69 = vector.broadcast %cst_23 : f32 to vector<64x64xf32>
    %70 = arith.cmpf oge, %68, %69 : vector<64x64xf32>
    %cst_24 = arith.constant 2.000000e-01 : f32
    %71 = vector.broadcast %cst_24 : f32 to vector<64x64xf32>
    %72 = arith.mulf %71, %68 : vector<64x64xf32>
    %73 = arith.select %70, %68, %72 : vector<64x64xi1>, vector<64x64xf32>
    %74 = arith.addf %73, %0 : vector<64x64xf32>
    %cst_25 = arith.constant dense<0xFF800000> : vector<64xf32>
    %75 = vector.multi_reduction <maximumf>, %74, %cst_25 [1] : vector<64x64xf32> to vector<64xf32>
    %76 = vector.shape_cast %75 : vector<64xf32> to vector<64x1xf32>
    %77 = vector.broadcast %76 : vector<64x1xf32> to vector<64x64xf32>
    %78 = arith.subf %74, %77 : vector<64x64xf32>
    %79 = math.exp %78 : vector<64x64xf32>
    %cst_26 = arith.constant dense<0.000000e+00> : vector<64xf32>
    %80 = vector.multi_reduction <add>, %79, %cst_26 [1] : vector<64x64xf32> to vector<64xf32>
    %81 = vector.shape_cast %80 : vector<64xf32> to vector<64x1xf32>
    %82 = tpu.reciprocal %81 {approx = true} : vector<64x1xf32> -> vector<64x1xf32>
    %83 = vector.extract_strided_slice %10 {offsets = [2, 0], sizes = [1, 16], strides = [1, 1]} : vector<4x16xbf16> to vector<1x16xbf16>
    %84 = vector.broadcast %83 : vector<1x16xbf16> to vector<64x16xbf16>
    %85 = arith.mulf %8, %84 : vector<64x16xbf16>
    %86 = arith.truncf %79 : vector<64x64xf32> to vector<64x64xbf16>
    %cst_27 = arith.constant dense<0.000000e+00> : vector<64x16xf32>
    %87 = tpu.matmul %86, %85, %cst_27 {dimension_numbers = #tpu.dot_dimension_numbers<[1], [0], [0], [1], [0, 0, 1, 1], [], []>} : vector<64x64xbf16>, vector<64x16xbf16>, vector<64x16xf32> -> vector<64x16xf32>
    %88 = vector.broadcast %82 : vector<64x1xf32> to vector<64x16xf32>
    %89 = arith.mulf %87, %88 : vector<64x16xf32>
    %90 = arith.addf %63, %89 : vector<64x16xf32>
    %91 = vector.extract_strided_slice %5 {offsets = [0, 3], sizes = [64, 1], strides = [1, 1]} : vector<64x4xf32> to vector<64x1xf32>
    %92 = vector.extract_strided_slice %7 {offsets = [3, 0], sizes = [1, 64], strides = [1, 1]} : vector<4x64xf32> to vector<1x64xf32>
    %93 = vector.broadcast %91 : vector<64x1xf32> to vector<64x64xf32>
    %94 = vector.broadcast %92 : vector<1x64xf32> to vector<64x64xf32>
    %95 = arith.addf %93, %94 : vector<64x64xf32>
    %cst_28 = arith.constant 0.000000e+00 : f32
    %96 = vector.broadcast %cst_28 : f32 to vector<64x64xf32>
    %97 = arith.cmpf oge, %95, %96 : vector<64x64xf32>
    %cst_29 = arith.constant 2.000000e-01 : f32
    %98 = vector.broadcast %cst_29 : f32 to vector<64x64xf32>
    %99 = arith.mulf %98, %95 : vector<64x64xf32>
    %100 = arith.select %97, %95, %99 : vector<64x64xi1>, vector<64x64xf32>
    %101 = arith.addf %100, %0 : vector<64x64xf32>
    %cst_30 = arith.constant dense<0xFF800000> : vector<64xf32>
    %102 = vector.multi_reduction <maximumf>, %101, %cst_30 [1] : vector<64x64xf32> to vector<64xf32>
    %103 = vector.shape_cast %102 : vector<64xf32> to vector<64x1xf32>
    %104 = vector.broadcast %103 : vector<64x1xf32> to vector<64x64xf32>
    %105 = arith.subf %101, %104 : vector<64x64xf32>
    %106 = math.exp %105 : vector<64x64xf32>
    %cst_31 = arith.constant dense<0.000000e+00> : vector<64xf32>
    %107 = vector.multi_reduction <add>, %106, %cst_31 [1] : vector<64x64xf32> to vector<64xf32>
    %108 = vector.shape_cast %107 : vector<64xf32> to vector<64x1xf32>
    %109 = tpu.reciprocal %108 {approx = true} : vector<64x1xf32> -> vector<64x1xf32>
    %110 = vector.extract_strided_slice %10 {offsets = [3, 0], sizes = [1, 16], strides = [1, 1]} : vector<4x16xbf16> to vector<1x16xbf16>
    %111 = vector.broadcast %110 : vector<1x16xbf16> to vector<64x16xbf16>
    %112 = arith.mulf %8, %111 : vector<64x16xbf16>
    %113 = arith.truncf %106 : vector<64x64xf32> to vector<64x64xbf16>
    %cst_32 = arith.constant dense<0.000000e+00> : vector<64x16xf32>
    %114 = tpu.matmul %113, %112, %cst_32 {dimension_numbers = #tpu.dot_dimension_numbers<[1], [0], [0], [1], [0, 0, 1, 1], [], []>} : vector<64x64xbf16>, vector<64x16xbf16>, vector<64x16xf32> -> vector<64x16xf32>
    %115 = vector.broadcast %109 : vector<64x1xf32> to vector<64x16xf32>
    %116 = arith.mulf %114, %115 : vector<64x16xf32>
    %117 = arith.addf %90, %116 : vector<64x16xf32>
    %c0_33 = arith.constant 0 : index
    %c0_34 = arith.constant 0 : index
    %118 = vector.load %arg7[%c0_33, %c0_34] : memref<1x16xf32, #tpu.memory_space<vmem>>, vector<1x16xf32>
    %119 = vector.broadcast %118 : vector<1x16xf32> to vector<64x16xf32>
    %120 = arith.addf %117, %119 : vector<64x16xf32>
    %cst_35 = arith.constant 0.000000e+00 : f32
    %121 = vector.broadcast %cst_35 : f32 to vector<64x16xf32>
    %122 = arith.maximumf %120, %121 : vector<64x16xf32>
    %c0_36 = arith.constant 0 : index
    %c0_37 = arith.constant 0 : index
    %123 = vector.load %arg8[%c0_36, %c0_37] : memref<16x64xf32, #tpu.memory_space<vmem>>, vector<16x64xf32>
    %cst_38 = arith.constant dense<0.000000e+00> : vector<64x64xf32>
    %124 = tpu.matmul %122, %123, %cst_38 {dimension_numbers = #tpu.dot_dimension_numbers<[1], [0], [0], [1], [0, 0, 1, 1], [], []>} : vector<64x16xf32>, vector<16x64xf32>, vector<64x64xf32> -> vector<64x64xf32>
    %c0_39 = arith.constant 0 : index
    %c0_40 = arith.constant 0 : index
    %125 = vector.load %arg9[%c0_39, %c0_40] : memref<64x4xf32, #tpu.memory_space<vmem>>, vector<64x4xf32>
    %cst_41 = arith.constant dense<0.000000e+00> : vector<64x4xf32>
    %126 = tpu.matmul %124, %125, %cst_41 {dimension_numbers = #tpu.dot_dimension_numbers<[1], [0], [0], [1], [0, 0, 1, 1], [], []>} : vector<64x64xf32>, vector<64x4xf32>, vector<64x4xf32> -> vector<64x4xf32>
    %c0_42 = arith.constant 0 : index
    %c0_43 = arith.constant 0 : index
    %127 = vector.load %arg10[%c0_42, %c0_43] : memref<4x64xf32, #tpu.memory_space<vmem>>, vector<4x64xf32>
    %cst_44 = arith.constant dense<0.000000e+00> : vector<4x64xf32>
    %128 = tpu.matmul %127, %124, %cst_44 {dimension_numbers = #tpu.dot_dimension_numbers<[1], [1], [0], [0], [0, 0, 1, 0], [], []>} : vector<4x64xf32>, vector<64x64xf32>, vector<4x64xf32> -> vector<4x64xf32>
    %129 = arith.truncf %124 : vector<64x64xf32> to vector<64x64xbf16>
    %c0_45 = arith.constant 0 : index
    %c0_46 = arith.constant 0 : index
    %130 = vector.load %arg11[%c0_45, %c0_46] : memref<4x64xf32, #tpu.memory_space<vmem>>, vector<4x64xf32>
    %131 = arith.truncf %130 : vector<4x64xf32> to vector<4x64xbf16>
    %132 = vector.extract_strided_slice %126 {offsets = [0, 0], sizes = [64, 1], strides = [1, 1]} : vector<64x4xf32> to vector<64x1xf32>
    %133 = vector.extract_strided_slice %128 {offsets = [0, 0], sizes = [1, 64], strides = [1, 1]} : vector<4x64xf32> to vector<1x64xf32>
    %134 = vector.broadcast %132 : vector<64x1xf32> to vector<64x64xf32>
    %135 = vector.broadcast %133 : vector<1x64xf32> to vector<64x64xf32>
    %136 = arith.addf %134, %135 : vector<64x64xf32>
    %cst_47 = arith.constant 0.000000e+00 : f32
    %137 = vector.broadcast %cst_47 : f32 to vector<64x64xf32>
    %138 = arith.cmpf oge, %136, %137 : vector<64x64xf32>
    %cst_48 = arith.constant 2.000000e-01 : f32
    %139 = vector.broadcast %cst_48 : f32 to vector<64x64xf32>
    %140 = arith.mulf %139, %136 : vector<64x64xf32>
    %141 = arith.select %138, %136, %140 : vector<64x64xi1>, vector<64x64xf32>
    %142 = arith.addf %141, %0 : vector<64x64xf32>
    %cst_49 = arith.constant dense<0xFF800000> : vector<64xf32>
    %143 = vector.multi_reduction <maximumf>, %142, %cst_49 [1] : vector<64x64xf32> to vector<64xf32>
    %144 = vector.shape_cast %143 : vector<64xf32> to vector<64x1xf32>
    %145 = vector.broadcast %144 : vector<64x1xf32> to vector<64x64xf32>
    %146 = arith.subf %142, %145 : vector<64x64xf32>
    %147 = math.exp %146 : vector<64x64xf32>
    %cst_50 = arith.constant dense<0.000000e+00> : vector<64xf32>
    %148 = vector.multi_reduction <add>, %147, %cst_50 [1] : vector<64x64xf32> to vector<64xf32>
    %149 = vector.shape_cast %148 : vector<64xf32> to vector<64x1xf32>
    %150 = tpu.reciprocal %149 {approx = true} : vector<64x1xf32> -> vector<64x1xf32>
    %151 = vector.extract_strided_slice %131 {offsets = [0, 0], sizes = [1, 64], strides = [1, 1]} : vector<4x64xbf16> to vector<1x64xbf16>
    %152 = vector.broadcast %151 : vector<1x64xbf16> to vector<64x64xbf16>
    %153 = arith.mulf %129, %152 : vector<64x64xbf16>
    %154 = arith.truncf %147 : vector<64x64xf32> to vector<64x64xbf16>
    %cst_51 = arith.constant dense<0.000000e+00> : vector<64x64xf32>
    %155 = tpu.matmul %154, %153, %cst_51 {dimension_numbers = #tpu.dot_dimension_numbers<[1], [0], [0], [1], [0, 0, 1, 1], [], []>} : vector<64x64xbf16>, vector<64x64xbf16>, vector<64x64xf32> -> vector<64x64xf32>
    %156 = vector.broadcast %150 : vector<64x1xf32> to vector<64x64xf32>
    %157 = arith.mulf %155, %156 : vector<64x64xf32>
    %158 = vector.extract_strided_slice %126 {offsets = [0, 1], sizes = [64, 1], strides = [1, 1]} : vector<64x4xf32> to vector<64x1xf32>
    %159 = vector.extract_strided_slice %128 {offsets = [1, 0], sizes = [1, 64], strides = [1, 1]} : vector<4x64xf32> to vector<1x64xf32>
    %160 = vector.broadcast %158 : vector<64x1xf32> to vector<64x64xf32>
    %161 = vector.broadcast %159 : vector<1x64xf32> to vector<64x64xf32>
    %162 = arith.addf %160, %161 : vector<64x64xf32>
    %cst_52 = arith.constant 0.000000e+00 : f32
    %163 = vector.broadcast %cst_52 : f32 to vector<64x64xf32>
    %164 = arith.cmpf oge, %162, %163 : vector<64x64xf32>
    %cst_53 = arith.constant 2.000000e-01 : f32
    %165 = vector.broadcast %cst_53 : f32 to vector<64x64xf32>
    %166 = arith.mulf %165, %162 : vector<64x64xf32>
    %167 = arith.select %164, %162, %166 : vector<64x64xi1>, vector<64x64xf32>
    %168 = arith.addf %167, %0 : vector<64x64xf32>
    %cst_54 = arith.constant dense<0xFF800000> : vector<64xf32>
    %169 = vector.multi_reduction <maximumf>, %168, %cst_54 [1] : vector<64x64xf32> to vector<64xf32>
    %170 = vector.shape_cast %169 : vector<64xf32> to vector<64x1xf32>
    %171 = vector.broadcast %170 : vector<64x1xf32> to vector<64x64xf32>
    %172 = arith.subf %168, %171 : vector<64x64xf32>
    %173 = math.exp %172 : vector<64x64xf32>
    %cst_55 = arith.constant dense<0.000000e+00> : vector<64xf32>
    %174 = vector.multi_reduction <add>, %173, %cst_55 [1] : vector<64x64xf32> to vector<64xf32>
    %175 = vector.shape_cast %174 : vector<64xf32> to vector<64x1xf32>
    %176 = tpu.reciprocal %175 {approx = true} : vector<64x1xf32> -> vector<64x1xf32>
    %177 = vector.extract_strided_slice %131 {offsets = [1, 0], sizes = [1, 64], strides = [1, 1]} : vector<4x64xbf16> to vector<1x64xbf16>
    %178 = vector.broadcast %177 : vector<1x64xbf16> to vector<64x64xbf16>
    %179 = arith.mulf %129, %178 : vector<64x64xbf16>
    %180 = arith.truncf %173 : vector<64x64xf32> to vector<64x64xbf16>
    %cst_56 = arith.constant dense<0.000000e+00> : vector<64x64xf32>
    %181 = tpu.matmul %180, %179, %cst_56 {dimension_numbers = #tpu.dot_dimension_numbers<[1], [0], [0], [1], [0, 0, 1, 1], [], []>} : vector<64x64xbf16>, vector<64x64xbf16>, vector<64x64xf32> -> vector<64x64xf32>
    %182 = vector.broadcast %176 : vector<64x1xf32> to vector<64x64xf32>
    %183 = arith.mulf %181, %182 : vector<64x64xf32>
    %184 = arith.addf %157, %183 : vector<64x64xf32>
    %185 = vector.extract_strided_slice %126 {offsets = [0, 2], sizes = [64, 1], strides = [1, 1]} : vector<64x4xf32> to vector<64x1xf32>
    %186 = vector.extract_strided_slice %128 {offsets = [2, 0], sizes = [1, 64], strides = [1, 1]} : vector<4x64xf32> to vector<1x64xf32>
    %187 = vector.broadcast %185 : vector<64x1xf32> to vector<64x64xf32>
    %188 = vector.broadcast %186 : vector<1x64xf32> to vector<64x64xf32>
    %189 = arith.addf %187, %188 : vector<64x64xf32>
    %cst_57 = arith.constant 0.000000e+00 : f32
    %190 = vector.broadcast %cst_57 : f32 to vector<64x64xf32>
    %191 = arith.cmpf oge, %189, %190 : vector<64x64xf32>
    %cst_58 = arith.constant 2.000000e-01 : f32
    %192 = vector.broadcast %cst_58 : f32 to vector<64x64xf32>
    %193 = arith.mulf %192, %189 : vector<64x64xf32>
    %194 = arith.select %191, %189, %193 : vector<64x64xi1>, vector<64x64xf32>
    %195 = arith.addf %194, %0 : vector<64x64xf32>
    %cst_59 = arith.constant dense<0xFF800000> : vector<64xf32>
    %196 = vector.multi_reduction <maximumf>, %195, %cst_59 [1] : vector<64x64xf32> to vector<64xf32>
    %197 = vector.shape_cast %196 : vector<64xf32> to vector<64x1xf32>
    %198 = vector.broadcast %197 : vector<64x1xf32> to vector<64x64xf32>
    %199 = arith.subf %195, %198 : vector<64x64xf32>
    %200 = math.exp %199 : vector<64x64xf32>
    %cst_60 = arith.constant dense<0.000000e+00> : vector<64xf32>
    %201 = vector.multi_reduction <add>, %200, %cst_60 [1] : vector<64x64xf32> to vector<64xf32>
    %202 = vector.shape_cast %201 : vector<64xf32> to vector<64x1xf32>
    %203 = tpu.reciprocal %202 {approx = true} : vector<64x1xf32> -> vector<64x1xf32>
    %204 = vector.extract_strided_slice %131 {offsets = [2, 0], sizes = [1, 64], strides = [1, 1]} : vector<4x64xbf16> to vector<1x64xbf16>
    %205 = vector.broadcast %204 : vector<1x64xbf16> to vector<64x64xbf16>
    %206 = arith.mulf %129, %205 : vector<64x64xbf16>
    %207 = arith.truncf %200 : vector<64x64xf32> to vector<64x64xbf16>
    %cst_61 = arith.constant dense<0.000000e+00> : vector<64x64xf32>
    %208 = tpu.matmul %207, %206, %cst_61 {dimension_numbers = #tpu.dot_dimension_numbers<[1], [0], [0], [1], [0, 0, 1, 1], [], []>} : vector<64x64xbf16>, vector<64x64xbf16>, vector<64x64xf32> -> vector<64x64xf32>
    %209 = vector.broadcast %203 : vector<64x1xf32> to vector<64x64xf32>
    %210 = arith.mulf %208, %209 : vector<64x64xf32>
    %211 = arith.addf %184, %210 : vector<64x64xf32>
    %212 = vector.extract_strided_slice %126 {offsets = [0, 3], sizes = [64, 1], strides = [1, 1]} : vector<64x4xf32> to vector<64x1xf32>
    %213 = vector.extract_strided_slice %128 {offsets = [3, 0], sizes = [1, 64], strides = [1, 1]} : vector<4x64xf32> to vector<1x64xf32>
    %214 = vector.broadcast %212 : vector<64x1xf32> to vector<64x64xf32>
    %215 = vector.broadcast %213 : vector<1x64xf32> to vector<64x64xf32>
    %216 = arith.addf %214, %215 : vector<64x64xf32>
    %cst_62 = arith.constant 0.000000e+00 : f32
    %217 = vector.broadcast %cst_62 : f32 to vector<64x64xf32>
    %218 = arith.cmpf oge, %216, %217 : vector<64x64xf32>
    %cst_63 = arith.constant 2.000000e-01 : f32
    %219 = vector.broadcast %cst_63 : f32 to vector<64x64xf32>
    %220 = arith.mulf %219, %216 : vector<64x64xf32>
    %221 = arith.select %218, %216, %220 : vector<64x64xi1>, vector<64x64xf32>
    %222 = arith.addf %221, %0 : vector<64x64xf32>
    %cst_64 = arith.constant dense<0xFF800000> : vector<64xf32>
    %223 = vector.multi_reduction <maximumf>, %222, %cst_64 [1] : vector<64x64xf32> to vector<64xf32>
    %224 = vector.shape_cast %223 : vector<64xf32> to vector<64x1xf32>
    %225 = vector.broadcast %224 : vector<64x1xf32> to vector<64x64xf32>
    %226 = arith.subf %222, %225 : vector<64x64xf32>
    %227 = math.exp %226 : vector<64x64xf32>
    %cst_65 = arith.constant dense<0.000000e+00> : vector<64xf32>
    %228 = vector.multi_reduction <add>, %227, %cst_65 [1] : vector<64x64xf32> to vector<64xf32>
    %229 = vector.shape_cast %228 : vector<64xf32> to vector<64x1xf32>
    %230 = tpu.reciprocal %229 {approx = true} : vector<64x1xf32> -> vector<64x1xf32>
    %231 = vector.extract_strided_slice %131 {offsets = [3, 0], sizes = [1, 64], strides = [1, 1]} : vector<4x64xbf16> to vector<1x64xbf16>
    %232 = vector.broadcast %231 : vector<1x64xbf16> to vector<64x64xbf16>
    %233 = arith.mulf %129, %232 : vector<64x64xbf16>
    %234 = arith.truncf %227 : vector<64x64xf32> to vector<64x64xbf16>
    %cst_66 = arith.constant dense<0.000000e+00> : vector<64x64xf32>
    %235 = tpu.matmul %234, %233, %cst_66 {dimension_numbers = #tpu.dot_dimension_numbers<[1], [0], [0], [1], [0, 0, 1, 1], [], []>} : vector<64x64xbf16>, vector<64x64xbf16>, vector<64x64xf32> -> vector<64x64xf32>
    %236 = vector.broadcast %230 : vector<64x1xf32> to vector<64x64xf32>
    %237 = arith.mulf %235, %236 : vector<64x64xf32>
    %238 = arith.addf %211, %237 : vector<64x64xf32>
    %c0_67 = arith.constant 0 : index
    %c0_68 = arith.constant 0 : index
    %239 = vector.load %arg12[%c0_67, %c0_68] : memref<1x64xf32, #tpu.memory_space<vmem>>, vector<1x64xf32>
    %240 = vector.broadcast %239 : vector<1x64xf32> to vector<64x64xf32>
    %241 = arith.addf %238, %240 : vector<64x64xf32>
    %cst_69 = arith.constant 0.000000e+00 : f32
    %242 = vector.broadcast %cst_69 : f32 to vector<64x64xf32>
    %243 = arith.maximumf %241, %242 : vector<64x64xf32>
    %c0_70 = arith.constant 0 : index
    %c0_71 = arith.constant 0 : index
    %244 = vector.load %arg13[%c0_70, %c0_71] : memref<64x16xf32, #tpu.memory_space<vmem>>, vector<64x16xf32>
    %cst_72 = arith.constant dense<0.000000e+00> : vector<64x16xf32>
    %245 = tpu.matmul %243, %244, %cst_72 {dimension_numbers = #tpu.dot_dimension_numbers<[1], [0], [0], [1], [0, 0, 1, 1], [], []>} : vector<64x64xf32>, vector<64x16xf32>, vector<64x16xf32> -> vector<64x16xf32>
    %c0_73 = arith.constant 0 : index
    %c0_74 = arith.constant 0 : index
    %246 = vector.load %arg14[%c0_73, %c0_74] : memref<16x4xf32, #tpu.memory_space<vmem>>, vector<16x4xf32>
    %cst_75 = arith.constant dense<0.000000e+00> : vector<64x4xf32>
    %247 = tpu.matmul %245, %246, %cst_75 {dimension_numbers = #tpu.dot_dimension_numbers<[1], [0], [0], [1], [0, 0, 1, 1], [], []>} : vector<64x16xf32>, vector<16x4xf32>, vector<64x4xf32> -> vector<64x4xf32>
    %c0_76 = arith.constant 0 : index
    %c0_77 = arith.constant 0 : index
    %248 = vector.load %arg15[%c0_76, %c0_77] : memref<4x16xf32, #tpu.memory_space<vmem>>, vector<4x16xf32>
    %cst_78 = arith.constant dense<0.000000e+00> : vector<4x64xf32>
    %249 = tpu.matmul %248, %245, %cst_78 {dimension_numbers = #tpu.dot_dimension_numbers<[1], [1], [0], [0], [0, 0, 1, 0], [], []>} : vector<4x16xf32>, vector<64x16xf32>, vector<4x64xf32> -> vector<4x64xf32>
    %250 = arith.truncf %245 : vector<64x16xf32> to vector<64x16xbf16>
    %c0_79 = arith.constant 0 : index
    %c0_80 = arith.constant 0 : index
    %251 = vector.load %arg16[%c0_79, %c0_80] : memref<4x16xf32, #tpu.memory_space<vmem>>, vector<4x16xf32>
    %252 = arith.truncf %251 : vector<4x16xf32> to vector<4x16xbf16>
    %253 = vector.extract_strided_slice %247 {offsets = [0, 0], sizes = [64, 1], strides = [1, 1]} : vector<64x4xf32> to vector<64x1xf32>
    %254 = vector.extract_strided_slice %249 {offsets = [0, 0], sizes = [1, 64], strides = [1, 1]} : vector<4x64xf32> to vector<1x64xf32>
    %255 = vector.broadcast %253 : vector<64x1xf32> to vector<64x64xf32>
    %256 = vector.broadcast %254 : vector<1x64xf32> to vector<64x64xf32>
    %257 = arith.addf %255, %256 : vector<64x64xf32>
    %cst_81 = arith.constant 0.000000e+00 : f32
    %258 = vector.broadcast %cst_81 : f32 to vector<64x64xf32>
    %259 = arith.cmpf oge, %257, %258 : vector<64x64xf32>
    %cst_82 = arith.constant 2.000000e-01 : f32
    %260 = vector.broadcast %cst_82 : f32 to vector<64x64xf32>
    %261 = arith.mulf %260, %257 : vector<64x64xf32>
    %262 = arith.select %259, %257, %261 : vector<64x64xi1>, vector<64x64xf32>
    %263 = arith.addf %262, %0 : vector<64x64xf32>
    %cst_83 = arith.constant dense<0xFF800000> : vector<64xf32>
    %264 = vector.multi_reduction <maximumf>, %263, %cst_83 [1] : vector<64x64xf32> to vector<64xf32>
    %265 = vector.shape_cast %264 : vector<64xf32> to vector<64x1xf32>
    %266 = vector.broadcast %265 : vector<64x1xf32> to vector<64x64xf32>
    %267 = arith.subf %263, %266 : vector<64x64xf32>
    %268 = math.exp %267 : vector<64x64xf32>
    %cst_84 = arith.constant dense<0.000000e+00> : vector<64xf32>
    %269 = vector.multi_reduction <add>, %268, %cst_84 [1] : vector<64x64xf32> to vector<64xf32>
    %270 = vector.shape_cast %269 : vector<64xf32> to vector<64x1xf32>
    %271 = tpu.reciprocal %270 {approx = true} : vector<64x1xf32> -> vector<64x1xf32>
    %272 = vector.extract_strided_slice %252 {offsets = [0, 0], sizes = [1, 16], strides = [1, 1]} : vector<4x16xbf16> to vector<1x16xbf16>
    %273 = vector.broadcast %272 : vector<1x16xbf16> to vector<64x16xbf16>
    %274 = arith.mulf %250, %273 : vector<64x16xbf16>
    %275 = arith.truncf %268 : vector<64x64xf32> to vector<64x64xbf16>
    %cst_85 = arith.constant dense<0.000000e+00> : vector<64x16xf32>
    %276 = tpu.matmul %275, %274, %cst_85 {dimension_numbers = #tpu.dot_dimension_numbers<[1], [0], [0], [1], [0, 0, 1, 1], [], []>} : vector<64x64xbf16>, vector<64x16xbf16>, vector<64x16xf32> -> vector<64x16xf32>
    %277 = vector.broadcast %271 : vector<64x1xf32> to vector<64x16xf32>
    %278 = arith.mulf %276, %277 : vector<64x16xf32>
    %279 = vector.extract_strided_slice %247 {offsets = [0, 1], sizes = [64, 1], strides = [1, 1]} : vector<64x4xf32> to vector<64x1xf32>
    %280 = vector.extract_strided_slice %249 {offsets = [1, 0], sizes = [1, 64], strides = [1, 1]} : vector<4x64xf32> to vector<1x64xf32>
    %281 = vector.broadcast %279 : vector<64x1xf32> to vector<64x64xf32>
    %282 = vector.broadcast %280 : vector<1x64xf32> to vector<64x64xf32>
    %283 = arith.addf %281, %282 : vector<64x64xf32>
    %cst_86 = arith.constant 0.000000e+00 : f32
    %284 = vector.broadcast %cst_86 : f32 to vector<64x64xf32>
    %285 = arith.cmpf oge, %283, %284 : vector<64x64xf32>
    %cst_87 = arith.constant 2.000000e-01 : f32
    %286 = vector.broadcast %cst_87 : f32 to vector<64x64xf32>
    %287 = arith.mulf %286, %283 : vector<64x64xf32>
    %288 = arith.select %285, %283, %287 : vector<64x64xi1>, vector<64x64xf32>
    %289 = arith.addf %288, %0 : vector<64x64xf32>
    %cst_88 = arith.constant dense<0xFF800000> : vector<64xf32>
    %290 = vector.multi_reduction <maximumf>, %289, %cst_88 [1] : vector<64x64xf32> to vector<64xf32>
    %291 = vector.shape_cast %290 : vector<64xf32> to vector<64x1xf32>
    %292 = vector.broadcast %291 : vector<64x1xf32> to vector<64x64xf32>
    %293 = arith.subf %289, %292 : vector<64x64xf32>
    %294 = math.exp %293 : vector<64x64xf32>
    %cst_89 = arith.constant dense<0.000000e+00> : vector<64xf32>
    %295 = vector.multi_reduction <add>, %294, %cst_89 [1] : vector<64x64xf32> to vector<64xf32>
    %296 = vector.shape_cast %295 : vector<64xf32> to vector<64x1xf32>
    %297 = tpu.reciprocal %296 {approx = true} : vector<64x1xf32> -> vector<64x1xf32>
    %298 = vector.extract_strided_slice %252 {offsets = [1, 0], sizes = [1, 16], strides = [1, 1]} : vector<4x16xbf16> to vector<1x16xbf16>
    %299 = vector.broadcast %298 : vector<1x16xbf16> to vector<64x16xbf16>
    %300 = arith.mulf %250, %299 : vector<64x16xbf16>
    %301 = arith.truncf %294 : vector<64x64xf32> to vector<64x64xbf16>
    %cst_90 = arith.constant dense<0.000000e+00> : vector<64x16xf32>
    %302 = tpu.matmul %301, %300, %cst_90 {dimension_numbers = #tpu.dot_dimension_numbers<[1], [0], [0], [1], [0, 0, 1, 1], [], []>} : vector<64x64xbf16>, vector<64x16xbf16>, vector<64x16xf32> -> vector<64x16xf32>
    %303 = vector.broadcast %297 : vector<64x1xf32> to vector<64x16xf32>
    %304 = arith.mulf %302, %303 : vector<64x16xf32>
    %305 = arith.addf %278, %304 : vector<64x16xf32>
    %306 = vector.extract_strided_slice %247 {offsets = [0, 2], sizes = [64, 1], strides = [1, 1]} : vector<64x4xf32> to vector<64x1xf32>
    %307 = vector.extract_strided_slice %249 {offsets = [2, 0], sizes = [1, 64], strides = [1, 1]} : vector<4x64xf32> to vector<1x64xf32>
    %308 = vector.broadcast %306 : vector<64x1xf32> to vector<64x64xf32>
    %309 = vector.broadcast %307 : vector<1x64xf32> to vector<64x64xf32>
    %310 = arith.addf %308, %309 : vector<64x64xf32>
    %cst_91 = arith.constant 0.000000e+00 : f32
    %311 = vector.broadcast %cst_91 : f32 to vector<64x64xf32>
    %312 = arith.cmpf oge, %310, %311 : vector<64x64xf32>
    %cst_92 = arith.constant 2.000000e-01 : f32
    %313 = vector.broadcast %cst_92 : f32 to vector<64x64xf32>
    %314 = arith.mulf %313, %310 : vector<64x64xf32>
    %315 = arith.select %312, %310, %314 : vector<64x64xi1>, vector<64x64xf32>
    %316 = arith.addf %315, %0 : vector<64x64xf32>
    %cst_93 = arith.constant dense<0xFF800000> : vector<64xf32>
    %317 = vector.multi_reduction <maximumf>, %316, %cst_93 [1] : vector<64x64xf32> to vector<64xf32>
    %318 = vector.shape_cast %317 : vector<64xf32> to vector<64x1xf32>
    %319 = vector.broadcast %318 : vector<64x1xf32> to vector<64x64xf32>
    %320 = arith.subf %316, %319 : vector<64x64xf32>
    %321 = math.exp %320 : vector<64x64xf32>
    %cst_94 = arith.constant dense<0.000000e+00> : vector<64xf32>
    %322 = vector.multi_reduction <add>, %321, %cst_94 [1] : vector<64x64xf32> to vector<64xf32>
    %323 = vector.shape_cast %322 : vector<64xf32> to vector<64x1xf32>
    %324 = tpu.reciprocal %323 {approx = true} : vector<64x1xf32> -> vector<64x1xf32>
    %325 = vector.extract_strided_slice %252 {offsets = [2, 0], sizes = [1, 16], strides = [1, 1]} : vector<4x16xbf16> to vector<1x16xbf16>
    %326 = vector.broadcast %325 : vector<1x16xbf16> to vector<64x16xbf16>
    %327 = arith.mulf %250, %326 : vector<64x16xbf16>
    %328 = arith.truncf %321 : vector<64x64xf32> to vector<64x64xbf16>
    %cst_95 = arith.constant dense<0.000000e+00> : vector<64x16xf32>
    %329 = tpu.matmul %328, %327, %cst_95 {dimension_numbers = #tpu.dot_dimension_numbers<[1], [0], [0], [1], [0, 0, 1, 1], [], []>} : vector<64x64xbf16>, vector<64x16xbf16>, vector<64x16xf32> -> vector<64x16xf32>
    %330 = vector.broadcast %324 : vector<64x1xf32> to vector<64x16xf32>
    %331 = arith.mulf %329, %330 : vector<64x16xf32>
    %332 = arith.addf %305, %331 : vector<64x16xf32>
    %333 = vector.extract_strided_slice %247 {offsets = [0, 3], sizes = [64, 1], strides = [1, 1]} : vector<64x4xf32> to vector<64x1xf32>
    %334 = vector.extract_strided_slice %249 {offsets = [3, 0], sizes = [1, 64], strides = [1, 1]} : vector<4x64xf32> to vector<1x64xf32>
    %335 = vector.broadcast %333 : vector<64x1xf32> to vector<64x64xf32>
    %336 = vector.broadcast %334 : vector<1x64xf32> to vector<64x64xf32>
    %337 = arith.addf %335, %336 : vector<64x64xf32>
    %cst_96 = arith.constant 0.000000e+00 : f32
    %338 = vector.broadcast %cst_96 : f32 to vector<64x64xf32>
    %339 = arith.cmpf oge, %337, %338 : vector<64x64xf32>
    %cst_97 = arith.constant 2.000000e-01 : f32
    %340 = vector.broadcast %cst_97 : f32 to vector<64x64xf32>
    %341 = arith.mulf %340, %337 : vector<64x64xf32>
    %342 = arith.select %339, %337, %341 : vector<64x64xi1>, vector<64x64xf32>
    %343 = arith.addf %342, %0 : vector<64x64xf32>
    %cst_98 = arith.constant dense<0xFF800000> : vector<64xf32>
    %344 = vector.multi_reduction <maximumf>, %343, %cst_98 [1] : vector<64x64xf32> to vector<64xf32>
    %345 = vector.shape_cast %344 : vector<64xf32> to vector<64x1xf32>
    %346 = vector.broadcast %345 : vector<64x1xf32> to vector<64x64xf32>
    %347 = arith.subf %343, %346 : vector<64x64xf32>
    %348 = math.exp %347 : vector<64x64xf32>
    %cst_99 = arith.constant dense<0.000000e+00> : vector<64xf32>
    %349 = vector.multi_reduction <add>, %348, %cst_99 [1] : vector<64x64xf32> to vector<64xf32>
    %350 = vector.shape_cast %349 : vector<64xf32> to vector<64x1xf32>
    %351 = tpu.reciprocal %350 {approx = true} : vector<64x1xf32> -> vector<64x1xf32>
    %352 = vector.extract_strided_slice %252 {offsets = [3, 0], sizes = [1, 16], strides = [1, 1]} : vector<4x16xbf16> to vector<1x16xbf16>
    %353 = vector.broadcast %352 : vector<1x16xbf16> to vector<64x16xbf16>
    %354 = arith.mulf %250, %353 : vector<64x16xbf16>
    %355 = arith.truncf %348 : vector<64x64xf32> to vector<64x64xbf16>
    %cst_100 = arith.constant dense<0.000000e+00> : vector<64x16xf32>
    %356 = tpu.matmul %355, %354, %cst_100 {dimension_numbers = #tpu.dot_dimension_numbers<[1], [0], [0], [1], [0, 0, 1, 1], [], []>} : vector<64x64xbf16>, vector<64x16xbf16>, vector<64x16xf32> -> vector<64x16xf32>
    %357 = vector.broadcast %351 : vector<64x1xf32> to vector<64x16xf32>
    %358 = arith.mulf %356, %357 : vector<64x16xf32>
    %359 = arith.addf %332, %358 : vector<64x16xf32>
    %c0_101 = arith.constant 0 : index
    %c0_102 = arith.constant 0 : index
    %360 = vector.load %arg17[%c0_101, %c0_102] : memref<1x16xf32, #tpu.memory_space<vmem>>, vector<1x16xf32>
    %361 = vector.broadcast %360 : vector<1x16xf32> to vector<64x16xf32>
    %362 = arith.addf %359, %361 : vector<64x16xf32>
    %c0_103 = arith.constant 0 : index
    %c0_104 = arith.constant 0 : index
    %363 = vector.load %arg18[%c0_103, %c0_104] : memref<64x16xf32, #tpu.memory_space<vmem>>, vector<64x16xf32>
    tpu.vector_store %arg18[%c0_103, %c0_104], %362 {strides = array<i32>} : memref<64x16xf32, #tpu.memory_space<vmem>>, vector<64x16xf32>,
    return
  }
  func.func @transform_0(%arg0: i32) -> (i32, i32) {
    %c0_i32 = arith.constant 0 : i32
    %c0_i32_0 = arith.constant 0 : i32
    %c0_i32_1 = arith.constant 0 : i32
    return %c0_i32, %c0_i32_0 : i32, i32
  }
  func.func @transform_1(%arg0: i32) -> (i32, i32) {
    %c0_i32 = arith.constant 0 : i32
    %c0_i32_0 = arith.constant 0 : i32
    %c0_i32_1 = arith.constant 0 : i32
    return %c0_i32, %c0_i32_0 : i32, i32
  }
  func.func @transform_2(%arg0: i32) -> (i32, i32) {
    %c0_i32 = arith.constant 0 : i32
    %c0_i32_0 = arith.constant 0 : i32
    %c0_i32_1 = arith.constant 0 : i32
    return %c0_i32, %c0_i32_0 : i32, i32
  }
  func.func @transform_3(%arg0: i32) -> (i32, i32) {
    %c0_i32 = arith.constant 0 : i32
    %c0_i32_0 = arith.constant 0 : i32
    %c0_i32_1 = arith.constant 0 : i32
    return %c0_i32, %c0_i32_0 : i32, i32
  }
  func.func @transform_4(%arg0: i32) -> (i32, i32) {
    %c0_i32 = arith.constant 0 : i32
    %c0_i32_0 = arith.constant 0 : i32
    %c0_i32_1 = arith.constant 0 : i32
    return %c0_i32, %c0_i32_0 : i32, i32
  }
  func.func @transform_5(%arg0: i32) -> (i32, i32) {
    %c0_i32 = arith.constant 0 : i32
    %c0_i32_0 = arith.constant 0 : i32
    %c0_i32_1 = arith.constant 0 : i32
    return %c0_i32, %c0_i32_0 : i32, i32
  }
  func.func @transform_6(%arg0: i32) -> (i32, i32) {
    %c0_i32 = arith.constant 0 : i32
    %c0_i32_0 = arith.constant 0 : i32
    %c0_i32_1 = arith.constant 0 : i32
    return %c0_i32, %c0_i32_0 : i32, i32
  }
  func.func @transform_7(%arg0: i32) -> (i32, i32) {
    %c0_i32 = arith.constant 0 : i32
    %c0_i32_0 = arith.constant 0 : i32
    %c0_i32_1 = arith.constant 0 : i32
    return %c0_i32, %c0_i32_0 : i32, i32
  }
  func.func @transform_8(%arg0: i32) -> (i32, i32) {
    %c0_i32 = arith.constant 0 : i32
    %c0_i32_0 = arith.constant 0 : i32
    %c0_i32_1 = arith.constant 0 : i32
    return %c0_i32, %c0_i32_0 : i32, i32
  }
  func.func @transform_9(%arg0: i32) -> (i32, i32) {
    %c0_i32 = arith.constant 0 : i32
    %c0_i32_0 = arith.constant 0 : i32
    %c0_i32_1 = arith.constant 0 : i32
    return %c0_i32, %c0_i32_0 : i32, i32
  }
  func.func @transform_10(%arg0: i32) -> (i32, i32) {
    %c0_i32 = arith.constant 0 : i32
    %c0_i32_0 = arith.constant 0 : i32
    %c0_i32_1 = arith.constant 0 : i32
    return %c0_i32, %c0_i32_0 : i32, i32
  }
  func.func @transform_11(%arg0: i32) -> (i32, i32) {
    %c0_i32 = arith.constant 0 : i32
    %c0_i32_0 = arith.constant 0 : i32
    %c0_i32_1 = arith.constant 0 : i32
    return %c0_i32, %c0_i32_0 : i32, i32
  }
  func.func @transform_12(%arg0: i32) -> (i32, i32) {
    %c0_i32 = arith.constant 0 : i32
    %c0_i32_0 = arith.constant 0 : i32
    %c0_i32_1 = arith.constant 0 : i32
    return %c0_i32, %c0_i32_0 : i32, i32
  }
  func.func @transform_13(%arg0: i32) -> (i32, i32) {
    %c0_i32 = arith.constant 0 : i32
    %c0_i32_0 = arith.constant 0 : i32
    %c0_i32_1 = arith.constant 0 : i32
    return %c0_i32, %c0_i32_0 : i32, i32
  }
  func.func @transform_14(%arg0: i32) -> (i32, i32) {
    %c0_i32 = arith.constant 0 : i32
    %c0_i32_0 = arith.constant 0 : i32
    %c0_i32_1 = arith.constant 0 : i32
    return %c0_i32, %c0_i32_0 : i32, i32
  }
  func.func @transform_15(%arg0: i32) -> (i32, i32) {
    %c0_i32 = arith.constant 0 : i32
    %c0_i32_0 = arith.constant 0 : i32
    %c0_i32_1 = arith.constant 0 : i32
    return %c0_i32, %c0_i32_0 : i32, i32
  }
  func.func @transform_16(%arg0: i32) -> (i32, i32) {
    %c0_i32 = arith.constant 0 : i32
    %c0_i32_0 = arith.constant 0 : i32
    %c0_i32_1 = arith.constant 0 : i32
    return %c0_i32, %c0_i32_0 : i32, i32
  }
  func.func @transform_17(%arg0: i32) -> (i32, i32) {
    %c0_i32 = arith.constant 0 : i32
    %c0_i32_0 = arith.constant 0 : i32
    %c0_i32_1 = arith.constant 0 : i32
    return %c0_i32, %c0_i32_0 : i32, i32
  }
}

</mosaic_0001>

<bundles_post_ra>
// kernel: tpu_custom_call.1
= control target key start
LH: loop header
LB: loop body
LE: loop exit
PB: predicated region body
PF: predicated region fallthrough
CT: control target
= control target key end

     0   :  { %vm75_vm0 = vcmask 130048   ;;  %v4061_v58 = vmov 2   ;;  %v4062_v59 = vmov 1   ;;  %v4063_v63 = vmov 0   ;;  %s5739_s2 = inlined_call_operand.vmem [shape: f32[16,16], index: 2, kind: input, shape index: {}]   ;;  %s5740_s0 = inlined_call_operand.vmem [shape: f32[64,16], index: 0, kind: input, shape index: {}]   ;;  %s5741_s3 = inlined_call_operand.vmem [shape: f32[16,4], index: 3, kind: input, shape index: {}]   ;;  %s5742_s5 = inlined_call_operand.vmem [shape: f32[4,16], index: 5, kind: input, shape index: {}]   ;;  %s5743_s4 = inlined_call_operand.vmem [shape: f32[4,16], index: 4, kind: input, shape index: {}]   ;;  %s5744_s1 = inlined_call_operand.vmem [shape: f32[64,64], index: 1, kind: input, shape index: {}]   ;;  %s5745_s6 = inlined_call_operand.vmem [shape: f32[1,16], index: 6, kind: input, shape index: {}]   ;;  %s5746_s7 = inlined_call_operand.vmem [shape: f32[16,64], index: 7, kind: input, shape index: {}]   ;;  %s5747_s8 = inlined_call_operand.vmem [shape: f32[64,4], index: 8, kind: input, shape index: {}]   ;;  %s5748_s10 = inlined_call_operand.vmem [shape: f32[4,64], index: 10, kind: input, shape index: {}]   ;;  %s5749_s9 = inlined_call_operand.vmem [shape: f32[4,64], index: 9, kind: input, shape index: {}]   ;;  %s5750_s11 = inlined_call_operand.vmem [shape: f32[1,64], index: 11, kind: input, shape index: {}]   ;;  %s5751_s12 = inlined_call_operand.vmem [shape: f32[64,16], index: 12, kind: input, shape index: {}]   ;;  %s5752_s13 = inlined_call_operand.vmem [shape: f32[16,4], index: 13, kind: input, shape index: {}]   ;;  %s5753_s15 = inlined_call_operand.vmem [shape: f32[4,16], index: 15, kind: input, shape index: {}]   ;;  %s5754_s14 = inlined_call_operand.vmem [shape: f32[4,16], index: 14, kind: input, shape index: {}]   ;;  %s5755_s16 = inlined_call_operand.vmem [shape: f32[1,16], index: 16, kind: input, shape index: {}]   ;;  %s5756_s17 = inlined_call_operand.vmem [shape: f32[64,16], index: 17, kind: output, shape index: {}]  }
   0x1   :  { %5759 = sst [smem:[#allocation2_spill]] %s5739_s2  ;;  %v142_v6 = vld [vmem:[%s5741_s3 + $0x8] sm:$0xff]  ;;  %v141_v11 = vld [vmem:[%s5741_s3] sm:$0xff]  ;;  %3566 = vset.pattern.permute.xlu2 %v4061_v58  ;;  %3565 = vset.pattern.permute.xlu1 %v4062_v59  ;;  %vm323_vm3 = vcmask 523264  }
   0x2   :  { %5760 = sst [smem:[#allocation3_spill]] %s5740_s0  ;;  %181 = vmatpush.msra.mxu1 %v142_v6  ;;  %v240_v17 = vld [vmem:[%s5742_s5] sm:$0xf]  ;;  %3564 = vset.pattern.permute.xlu0 %v4063_v63 }
   0x3   :  { %s5761_s26 = sld [smem:[#allocation2_spill]]  ;;  %v241_v19 = vpack.c.bf16 %v240_v17, %v240_v17 }
   0x4   :  { %s5762_s30 = sld [smem:[#allocation3_spill]]  ;;  %182 = vmatpush.msra.mxu1 %v141_v11 }
   0x5   :  { %v635_v20 = vshrl.u32 %v241_v19, 16  ;;  %v405_v22 = vpack.i.b16 %v241_v19, %v241_v19 }
   0x7   :  { %v4224_v23 = vpack.i.b16 %v635_v20, %v635_v20  ;;  %v407_v25 = vperm.slane %v405_v22, 0  ;;  %v866_v53 = vperm.slane %v405_v22, 1 }
   0x9   :  { %v74_v0 = vld [vmem:[%s5761_s26 + $0x8] sm:$0xff]  ;;  %v73_v1 = vld [vmem:[%s5761_s26] sm:$0xff]  ;;  %v1094_v26 = vperm.slane %v4224_v23, 1  ;;  %v416_v32 = vunpack.c.l.bf16 %v407_v25 }
   0xa   :  { %114 = vmatpush.msra.mxu0 %v74_v0  ;;  %v65_v2 = vld [vmem:[%s5762_s30] sm:$0xff]  ;;  %v66_v3 = vld [vmem:[%s5762_s30 + $0x8] sm:$0xff]  ;;  %v67_v4 = vld [vmem:[%s5762_s30 + $0x10] sm:$0xff] }
   0xb   :  { %v68_v5 = vld [vmem:[%s5762_s30 + $0x18] sm:$0xff]  ;;  %v69_v7 = vld [vmem:[%s5762_s30 + $0x20] sm:$0xff]  ;;  %v70_v8 = vld [vmem:[%s5762_s30 + $0x28] sm:$0xff]  ;;  %v1095_v33 = vunpack.c.l.bf16 %v1094_v26 }
   0xc   :  { %115 = vmatpush.msra.mxu0 %v73_v1  ;;  %v71_v9 = vld [vmem:[%s5762_s30 + $0x30] sm:$0xff]  ;;  %v72_v10 = vld [vmem:[%s5762_s30 + $0x38] sm:$0xff]  ;;  %v867_v1 = vunpack.c.l.bf16 %v866_v53 }
   0xd   :  { %3433 = vmatmul.msk.f32.vlgmr.msra.gmra.mxu0 %vm75_vm0, %v65_v2 }
  0x15   :  { %3434 = vmatmul.msk.f32.gmra.mxu0 %vm75_vm0, %v66_v3 }
  0x1d   :  { %3435 = vmatmul.msk.f32.gmra.mxu0 %vm75_vm0, %v67_v4 }
  0x25   :  { %3436 = vmatmul.msk.f32.gmra.mxu0 %vm75_vm0, %v68_v5 }
  0x2d   :  { %3437 = vmatmul.msk.f32.gmra.mxu0 %vm75_vm0, %v69_v7 }
  0x35   :  { %3438 = vmatmul.msk.f32.gmra.mxu0 %vm75_vm0, %v70_v8 }
  0x3d   :  { %3439 = vmatmul.msk.f32.gmra.mxu0 %vm75_vm0, %v71_v9 }
  0x45   :  { %3440 = vmatmul.msk.f32.gmra.mxu0 %vm75_vm0, %v72_v10  ;;  %v638_v10 = vperm.slane %v4224_v23, 0 }
  0x8a   :  { %v4199_v12 = vpop.f32.mrf.mxu0 }
  0x8b   :  { %3441 = vmatmul.msk.f32.vlgmr.msra.gmra.mxu1 %vm75_vm0, %v4199_v12  ;;  %v232_v52 = vpack.c.bf16 %v4199_v12, %v4199_v12 }
  0x8d   :  { %v408_v0 = vunpack.c.l.bf16 %v232_v52 }
  0x8f   :  { %v417_v8 = vmul.f32 %v416_v32, %v408_v0  ;;  %v1096_v9 = vmul.f32 %v1095_v33, %v408_v0 }
  0x92   :  { %v4203_v13 = vpop.f32.mrf.mxu0 }
  0x93   :  { %3442 = vmatmul.msk.f32.gmra.mxu1 %vm75_vm0, %v4203_v13  ;;  %v233_v43 = vpack.c.bf16 %v4203_v13, %v4203_v13 }
  0x95   :  { %v4261_v54 = vunpack.c.l.bf16 %v233_v43 }
  0x97   :  { %v418_v3 = vmul.f32 %v416_v32, %v4261_v54  ;;  %v1097_v7 = vmul.f32 %v1095_v33, %v4261_v54 }
  0x99   :  { %v425_v11 = vpack.c.bf16 %v418_v3, %v417_v8  ;;  %v1104_v17 = vpack.c.bf16 %v1097_v7, %v1096_v9 }
  0x9a   :  { %v4207_v14 = vpop.f32.mrf.mxu0 }
  0x9b   :  { %3443 = vmatmul.msk.f32.gmra.mxu1 %vm75_vm0, %v4207_v14  ;;  %v234_v34 = vpack.c.bf16 %v4207_v14, %v4207_v14 }
  0x9d   :  { %v4250_v44 = vunpack.c.l.bf16 %v234_v34 }
  0x9f   :  { %v419_v56 = vmul.f32 %v416_v32, %v4250_v44  ;;  %v1098_v61 = vmul.f32 %v1095_v33, %v4250_v44  ;;  %v870_v23 = vmul.f32 %v867_v1, %v4250_v44 }
  0xa2   :  { %v4211_v15 = vpop.f32.mrf.mxu0 }
  0xa3   :  { %3444 = vmatmul.msk.f32.gmra.mxu1 %vm75_vm0, %v4211_v15  ;;  %v235_v35 = vpack.c.bf16 %v4211_v15, %v4211_v15 }
  0xa5   :  { %v4252_v45 = vunpack.c.l.bf16 %v235_v35 }
  0xa7   :  { %v420_v57 = vmul.f32 %v416_v32, %v4252_v45  ;;  %v1099_v62 = vmul.f32 %v1095_v33, %v4252_v45 }
  0xa9   :  { %v426_v2 = vpack.c.bf16 %v420_v57, %v419_v56  ;;  %v1105_v6 = vpack.c.bf16 %v1099_v62, %v1098_v61  ;;  %v57_v57 = vld [vmem:[%s5744_s1] sm:$0xff] }
  0xaa   :  { %v4215_v16 = vpop.f32.mrf.mxu0 }
  0xab   :  { %3445 = vmatmul.msk.f32.gmra.mxu1 %vm75_vm0, %v4215_v16  ;;  %v236_v27 = vpack.c.bf16 %v4215_v16, %v4215_v16 }
  0xad   :  { %v4237_v36 = vunpack.c.l.bf16 %v236_v27 }
  0xaf   :  { %v421_v48 = vmul.f32 %v416_v32, %v4237_v36  ;;  %v1100_v50 = vmul.f32 %v1095_v33, %v4237_v36 }
  0xb2   :  { %v132_v18 = vpop.f32.mrf.mxu0 }
  0xb3   :  { %3446 = vmatmul.msk.f32.gmra.mxu1 %vm75_vm0, %v132_v18  ;;  %v237_v28 = vpack.c.bf16 %v132_v18, %v132_v18 }
  0xb5   :  { %v4239_v37 = vunpack.c.l.bf16 %v237_v28  ;;  %v208_v28 = vld [vmem:[%s5743_s4] sm:$0xf] }
  0xb7   :  { %v422_v49 = vmul.f32 %v416_v32, %v4239_v37  ;;  %v1101_v51 = vmul.f32 %v1095_v33, %v4239_v37  ;;  %v873_v19 = vmul.f32 %v867_v1, %v4239_v37 }
  0xb9   :  { %v427_v55 = vpack.c.bf16 %v422_v49, %v421_v48  ;;  %v1106_v60 = vpack.c.bf16 %v1101_v51, %v1100_v50 }
  0xba   :  { %v135_v21 = vpop.f32.mrf.mxu0 }
  0xbb   :  { %3447 = vmatmul.msk.f32.gmra.mxu1 %vm75_vm0, %v135_v21  ;;  %v238_v24 = vpack.c.bf16 %v135_v21, %v135_v21 }
  0xbd   :  { %v4229_v29 = vunpack.c.l.bf16 %v238_v24 }
  0xbf   :  { %v423_v39 = vmul.f32 %v416_v32, %v4229_v29  ;;  %v1102_v40 = vmul.f32 %v1095_v33, %v4229_v29  ;;  %v874_v4 = vmul.f32 %v867_v1, %v4229_v29 }
  0xc2   :  { %v138_v30 = vpop.f32.mrf.mxu0 }
  0xc3   :  { %v239_v31 = vpack.c.bf16 %v138_v30, %v138_v30  ;;  %3449 = vmatpush.xpose.msk.msra.mxu2 %vm75_vm0, %v138_v30  ;;  %3448 = vmatmul.msk.f32.gmra.mxu1 %vm75_vm0, %v138_v30 }
  0xc5   :  { %v4241_v38 = vunpack.c.l.bf16 %v239_v31 }
  0xc7   :  { %3450 = vmatpush.xpose.msk.msra.mxu2 %vm75_vm0, %v135_v21  ;;  %v424_v41 = vmul.f32 %v416_v32, %v4241_v38  ;;  %v1103_v42 = vmul.f32 %v1095_v33, %v4241_v38  ;;  %v875_v5 = vmul.f32 %v867_v1, %v4241_v38 }
  0xc9   :  { %v428_v46 = vpack.c.bf16 %v424_v41, %v423_v39  ;;  %v1107_v47 = vpack.c.bf16 %v1103_v42, %v1102_v40  ;;  %v4064_v39 = vmov 3  }
  0xcb   :  { %3451 = vmatpush.xpose.msk.msra.mxu2 %vm75_vm0, %v132_v18  ;;  %449 = vmatpush.bf16.msrb.mxu0 %v428_v46  ;;  %v872_v18 = vmul.f32 %v867_v1, %v4237_v36 }
  0xcc   :  { %3556 = vmatpush.bf16.msra.mxu3 %v428_v46  ;;  %1128 = vmatpush.bf16.msrb.mxu1 %v1107_v47 }
  0xcd   :  { %v878_v22 = vpack.c.bf16 %v873_v19, %v872_v18 }
  0xcf   :  { %3452 = vmatpush.xpose.msk.msra.mxu2 %vm75_vm0, %v4215_v16  ;;  %450 = vmatpush.bf16.msrb.mxu0 %v427_v55  ;;  %v879_v16 = vpack.c.bf16 %v875_v5, %v874_v4 }
  0xd0   :  { %3557 = vmatpush.bf16.msra.mxu3 %v427_v55  ;;  %1129 = vmatpush.bf16.msrb.mxu1 %v1106_v60 }
  0xd3   :  { %3453 = vmatpush.xpose.msk.msra.mxu2 %vm75_vm0, %v4211_v15  ;;  %451 = vmatpush.bf16.msrb.mxu0 %v426_v2  ;;  %v639_v15 = vunpack.c.l.bf16 %v638_v10 }
  0xd4   :  { %3558 = vmatpush.bf16.msra.mxu3 %v426_v2  ;;  %1130 = vmatpush.bf16.msrb.mxu1 %v1105_v6 }
  0xd5   :  { %v646_v20 = vmul.f32 %v639_v15, %v4229_v29  ;;  %v647_v21 = vmul.f32 %v639_v15, %v4241_v38  ;;  %v644_v25 = vmul.f32 %v639_v15, %v4237_v36  ;;  %v645_v26 = vmul.f32 %v639_v15, %v4239_v37 }
  0xd6   :  { %v868_v29 = vmul.f32 %v867_v1, %v408_v0  ;;  %v642_v31 = vmul.f32 %v639_v15, %v4250_v44  ;;  %v643_v32 = vmul.f32 %v639_v15, %v4252_v45  ;;  %v641_v34 = vmul.f32 %v639_v15, %v4261_v54 }
  0xd7   :  { %3454 = vmatpush.xpose.msk.msra.mxu2 %vm75_vm0, %v4207_v14  ;;  %452 = vmatpush.bf16.msrb.mxu0 %v425_v11  ;;  %v871_v14 = vmul.f32 %v867_v1, %v4252_v45  ;;  %v651_v24 = vpack.c.bf16 %v647_v21, %v646_v20  ;;  %v650_v30 = vpack.c.bf16 %v645_v26, %v644_v25 }
  0xd8   :  { %3559 = vmatpush.bf16.msra.mxu3 %v425_v11  ;;  %1131 = vmatpush.bf16.msrb.mxu1 %v1104_v17  ;;  %v640_v35 = vmul.f32 %v639_v15, %v408_v0 }
  0xd9   :  { %v877_v27 = vpack.c.bf16 %v871_v14, %v870_v23 }
  0xda   :  { %v648_v36 = vpack.c.bf16 %v641_v34, %v640_v35 }
  0xdb   :  { %900 = vmatpush.bf16.msra.mxu0 %v879_v16  ;;  %3455 = vmatpush.xpose.msk.msra.mxu2 %vm75_vm0, %v4203_v13  ;;  %v869_v13 = vmul.f32 %v867_v1, %v4261_v54 }
  0xdd   :  { %v876_v33 = vpack.c.bf16 %v869_v13, %v868_v29 }
  0xdf   :  { %901 = vmatpush.bf16.msra.mxu0 %v878_v22  ;;  %3456 = vmatpush.xpose.msk.msra.mxu2 %vm75_vm0, %v4199_v12  ;;  %v649_v12 = vpack.c.bf16 %v643_v32, %v642_v31 }
  0xe2   :  { %3457 = vmatmul.msk.f32.vlgmr.msra.gmra.mxu2 %vm75_vm0, %v208_v28 }
  0xe3   :  { %672 = vmatpush.bf16.msrb.mxu2 %v651_v24  ;;  %902 = vmatpush.bf16.msra.mxu0 %v877_v27  ;;  %v58_v24 = vld [vmem:[%s5744_s1 + $0x8] sm:$0xff] }
  0xe7   :  { %673 = vmatpush.bf16.msrb.mxu2 %v650_v30  ;;  %903 = vmatpush.bf16.msra.mxu0 %v876_v33  ;;  %v4383_v33 = vld [vmem:[%s5744_s1 + $0x10] sm:$0xff] }
  0xeb   :  { %674 = vmatpush.bf16.msrb.mxu2 %v649_v12 }
  0xef   :  { %675 = vmatpush.bf16.msrb.mxu2 %v648_v36 }
 0x108   :  { %v184_v37 = vpop.f32.mrf.mxu1 }
 0x109   :  { %714 = vperm.xlu2 %3566, %v184_v37   ;;  %483 = vperm.xlu1 %3565, %v184_v37  }
 0x10a   :  { %244 = vperm.xlu0 %3564, %v184_v37  }
 0x110   :  { %v187_v38 = vpop.f32.mrf.mxu1 }
 0x111   :  { %718 = vperm.xlu2 %3566, %v187_v38   ;;  %487 = vperm.xlu1 %3565, %v187_v38  }
 0x112   :  { %3567 = vset.pattern.permute.xlu0 %v4064_v39 }
 0x113   :  { %942 = vperm.xlu0 %3567, %v184_v37  }
 0x118   :  { %v190_v40 = vpop.f32.mrf.mxu1 }
 0x119   :  { %3570 = vset.pattern.permute.xlu2 %v4063_v63  ;;  %3569 = vset.pattern.permute.xlu1 %v4064_v39 }
 0x11a   :  { %946 = vperm.xlu1 %3569, %v187_v38   ;;  %254 = vperm.xlu2 %3570, %v190_v40  }
 0x11b   :  { %3568 = vset.pattern.permute.xlu0 %v4063_v63 }
 0x11c   :  { %249 = vperm.xlu0 %3568, %v187_v38  }
 0x120   :  { %v193_v41 = vpop.f32.mrf.mxu1 }
 0x122   :  { %3572 = vset.pattern.permute.xlu1 %v4061_v58  ;;  %3571 = vset.pattern.permute.xlu2 %v4062_v59 }
 0x123   :  { %722 = vperm.xlu1 %3572, %v190_v40   ;;  %491 = vperm.xlu2 %3571, %v190_v40  }
 0x124   :  { %3575 = vset.pattern.permute.xlu0 %v4062_v59 }
 0x125   :  { %495 = vperm.xlu0 %3575, %v193_v41  }
 0x128   :  { %v196_v42 = vpop.f32.mrf.mxu1 }
 0x12b   :  { %3573 = vset.pattern.permute.xlu1 %v4064_v39  ;;  %3576 = vset.pattern.permute.xlu2 %v4061_v58 }
 0x12c   :  { %950 = vperm.xlu1 %3573, %v190_v40   ;;  %726 = vperm.xlu2 %3576, %v193_v41  }
 0x12d   :  { %3578 = vset.pattern.permute.xlu0 %v4063_v63 }
 0x12e   :  { %264 = vperm.xlu0 %3578, %v196_v42  }
 0x130   :  { %v199_v43 = vpop.f32.mrf.mxu1 }
 0x134   :  { %3574 = vset.pattern.permute.xlu1 %v4063_v63  ;;  %3577 = vset.pattern.permute.xlu2 %v4064_v39 }
 0x135   :  { %954 = vperm.xlu2 %3577, %v193_v41   ;;  %259 = vperm.xlu1 %3574, %v193_v41  }
 0x136   :  { %3587 = vset.pattern.permute.xlu0 %v4062_v59 }
 0x138   :  { %v202_v44 = vpop.f32.mrf.mxu1 }
 0x139   :  { %507 = vperm.xlu0 %3587, %v202_v44  }
 0x13d   :  { %3579 = vset.pattern.permute.xlu2 %v4062_v59  ;;  %3580 = vset.pattern.permute.xlu1 %v4061_v58 }
 0x13e   :  { %730 = vperm.xlu1 %3580, %v196_v42   ;;  %499 = vperm.xlu2 %3579, %v196_v42  }
 0x140   :  { %v4319_v45 = vpop.f32.mrf.mxu1 }
 0x141   :  { %3588 = vset.pattern.permute.xlu0 %v4061_v58 }
 0x142   :  { %738 = vperm.xlu0 %3588, %v202_v44  }
 0x146   :  { %3581 = vset.pattern.permute.xlu1 %v4064_v39  ;;  %3586 = vset.pattern.permute.xlu2 %v4063_v63 }
 0x147   :  { %958 = vperm.xlu1 %3581, %v196_v42   ;;  %274 = vperm.xlu2 %3586, %v202_v44  }
 0x14a   :  { %3590 = vset.pattern.permute.xlu0 %v4063_v63 }
 0x14b   :  { %279 = vperm.xlu0 %3590, %v4319_v45  }
 0x14f   :  { %3582 = vset.pattern.permute.xlu1 %v4063_v63  ;;  %3589 = vset.pattern.permute.xlu2 %v4064_v39 }
 0x150   :  { %269 = vperm.xlu1 %3582, %v199_v43   ;;  %966 = vperm.xlu2 %3589, %v202_v44  }
 0x153   :  { %3593 = vset.pattern.permute.xlu0 %v4064_v39 }
 0x158   :  { %3583 = vset.pattern.permute.xlu1 %v4062_v59  ;;  %3591 = vset.pattern.permute.xlu2 %v4062_v59 }
 0x159   :  { %503 = vperm.xlu1 %3583, %v199_v43   ;;  %511 = vperm.xlu2 %3591, %v4319_v45  }
 0x161   :  { %3584 = vset.pattern.permute.xlu1 %v4061_v58  ;;  %3594 = vset.pattern.permute.xlu2 %v4063_v63 }
 0x162   :  { %734 = vperm.xlu1 %3584, %v199_v43  }
 0x163   :  { %v715_v46 = vpop.permute.xlu2 %714 }
 0x165   :  { %v229_v48 = vpop.f32.mrf.mxu2 }
 0x166   :  { %v4336_v49 = vperm.slane %v229_v48, 0  ;;  %v4338_v50 = vperm.slane %v229_v48, 2  ;;  %v4346_v62 = vperm.slane %v229_v48, 3  ;;  %v4350_v1 = vperm.slane %v229_v48, 1 }
 0x168   :  { %v746_v55 = vadd.f32 %v4338_v50, %v715_v46 }
 0x16a   :  { %3585 = vset.pattern.permute.xlu1 %v4064_v39  ;;  %v762_v61 = vmul.f32 0.2, %v746_v55  ;;  %vm754_vm2 = vcmp.ge.f32.partialorder %v746_v55, 0.0 }
 0x16b   :  { %962 = vperm.xlu1 %3585, %v199_v43   ;;  %v4333_v47 = vpop.permute.xlu2 %718 }
 0x16c   :  { %v770_v6 = vsel %vm754_vm2, %v746_v55, %v762_v61  ;;  %v747_v34 = vadd.f32 %v4338_v50, %v4333_v47 }
 0x16d   :  { %v4358_v10 = vadd.f32 %v770_v6, %v57_v57 }
 0x16e   :  { %v763_v41 = vmul.f32 0.2, %v747_v34  ;;  %vm755_vm9 = vcmp.ge.f32.partialorder %v747_v34, 0.0 }
 0x16f   :  { %v786_v19 = vsel %vm323_vm3, %v4358_v10, -inf }
 0x170   :  { %v771_v48 = vsel %vm755_vm9, %v747_v34, %v763_v41 }
 0x171   :  { %v4405_v55 = vadd.f32 %v771_v48, %v58_v24 }
 0x173   :  { %3592 = vset.pattern.permute.xlu1 %v4061_v58 }
 0x174   :  { %742 = vperm.xlu1 %3592, %v4319_v45   ;;  %v255_v52 = vpop.permute.xlu2 %254 }
 0x175   :  { %v285_v15 = vadd.f32 %v4336_v49, %v255_v52 }
 0x177   :  { %v301_v27 = vmul.f32 0.2, %v285_v15  ;;  %vm293_vm7 = vcmp.ge.f32.partialorder %v285_v15, 0.0 }
 0x179   :  { %v309_v12 = vsel %vm293_vm7, %v285_v15, %v301_v27 }
 0x17a   :  { %v4392_v38 = vadd.f32 %v309_v12, %v4383_v33 }
 0x17b   :  { %v484_v51 = vpop.permute.xlu1 %483 }
 0x17c   :  { %v245_v53 = vpop.permute.xlu0 %244  ;;  %3598 = vset.pattern.permute.xlu1 %v4063_v63  ;;  %v515_v22 = vadd.f32 %v4350_v1, %v484_v51  ;;  %v330_v43 = vsel %vm323_vm3, %v4392_v38, -inf }
 0x17d   :  { %v283_v54 = vadd.f32 %v4336_v49, %v245_v53  ;;  %v4355_v7 = vpop.permute.xlu2 %491 }
 0x17e   :  { %v531_v13 = vmul.f32 0.2, %v515_v22  ;;  %vm523_vm8 = vcmp.ge.f32.partialorder %v515_v22, 0.0 }
 0x17f   :  { %v299_v56 = vmul.f32 0.2, %v283_v54  ;;  %vm291_vm1 = vcmp.ge.f32.partialorder %v283_v54, 0.0 }
 0x180   :  { %v539_v36 = vsel %vm523_vm8, %v515_v22, %v531_v13 }
 0x181   :  { %v307_v60 = vsel %vm291_vm1, %v283_v54, %v299_v56  ;;  %v4394_v40 = vadd.f32 %v539_v36, %v57_v57 }
 0x182   :  { %v4348_v0 = vadd.f32 %v307_v60, %v57_v57 }
 0x183   :  { %v488_v2 = vpop.permute.xlu1 %487  ;;  %v555_v44 = vsel %vm323_vm3, %v4394_v40, -inf }
 0x184   :  { %v324_v3 = vsel %vm323_vm3, %v4348_v0, -inf  ;;  %v516_v4 = vadd.f32 %v4350_v1, %v488_v2 }
 0x185   :  { %v943_v5 = vpop.permute.xlu0 %942  ;;  %325 = vmax.xlane.f32.xlu2 %v324_v3  ;;  %v789_v3 = vsel %vm323_vm3, %v4405_v55, -inf }
 0x186   :  { %v974_v8 = vadd.f32 %v4346_v62, %v943_v5  ;;  %v532_v11 = vmul.f32 0.2, %v516_v4  ;;  %vm524_vm5 = vcmp.ge.f32.partialorder %v516_v4, 0.0  ;;  %v4372_v25 = vpop.permute.xlu2 %726 }
 0x188   :  { %v990_v9 = vmul.f32 0.2, %v974_v8  ;;  %vm982_vm4 = vcmp.ge.f32.partialorder %v974_v8, 0.0  ;;  %v540_v21 = vsel %vm524_vm5, %v516_v4, %v532_v11  ;;  %v517_v4 = vadd.f32 %v4350_v1, %v4355_v7 }
 0x189   :  { %v4374_v26 = vadd.f32 %v540_v21, %v58_v24 }
 0x18a   :  { %v998_v16 = vsel %vm982_vm4, %v974_v8, %v990_v9  ;;  %vm525_vm13 = vcmp.ge.f32.partialorder %v517_v4, 0.0 }
 0x18b   :  { %v4360_v17 = vadd.f32 %v998_v16, %v57_v57  ;;  %v558_v30 = vsel %vm323_vm3, %v4374_v26, -inf }
 0x18c   :  { %v947_v18 = vpop.permute.xlu1 %946 }
 0x18d   :  { %787 = vmax.xlane.f32.xlu2 %v786_v19  ;;  %v1014_v20 = vsel %vm323_vm3, %v4360_v17, -inf  ;;  %v975_v46 = vadd.f32 %v4346_v62, %v947_v18  ;;  %v61_v18 = vld [vmem:[%s5744_s1 + $0x20] sm:$0xff]  ;;  %v533_v19 = vmul.f32 0.2, %v517_v4 }
 0x18e   :  { %v250_v23 = vpop.permute.xlu0 %249  ;;  %1015 = vmax.xlane.f32.xlu0 %v1014_v20 }
 0x18f   :  { %v284_v14 = vadd.f32 %v4336_v49, %v250_v23  ;;  %v4396_v42 = vpop.permute.xlu2 %954  ;;  %v991_v56 = vmul.f32 0.2, %v975_v46  ;;  %vm983_vm11 = vcmp.ge.f32.partialorder %v975_v46, 0.0 }
 0x191   :  { %v300_v28 = vmul.f32 0.2, %v284_v14  ;;  %vm292_vm6 = vcmp.ge.f32.partialorder %v284_v14, 0.0  ;;  %v999_v6 = vsel %vm983_vm11, %v975_v46, %v991_v56 }
 0x192   :  { %v4417_v16 = vadd.f32 %v999_v6, %v58_v24 }
 0x193   :  { %v308_v29 = vsel %vm292_vm6, %v284_v14, %v300_v28  ;;  %v541_v14 = vsel %vm525_vm13, %v517_v4, %v533_v19  ;;  %v977_v19 = vadd.f32 %v4346_v62, %v4396_v42 }
 0x194   :  { %v4378_v31 = vadd.f32 %v308_v29, %v58_v24  ;;  %v1017_v21 = vsel %vm323_vm3, %v4417_v16, -inf }
 0x195   :  { %559 = vmax.xlane.f32.xlu2 %v558_v30  ;;  %v723_v32 = vpop.permute.xlu1 %722  ;;  %vm985_vm8 = vcmp.ge.f32.partialorder %v977_v19, 0.0 }
 0x196   :  { %v327_v35 = vsel %vm323_vm3, %v4378_v31, -inf  ;;  %v748_v22 = vadd.f32 %v4338_v50, %v723_v32 }
 0x197   :  { %v4389_v37 = vpop.permute.xlu0 %495  ;;  %328 = vmax.xlane.f32.xlu0 %v327_v35 }
 0x198   :  { %v500_v61 = vpop.permute.xlu2 %499  ;;  %v764_v13 = vmul.f32 0.2, %v748_v22  ;;  %vm756_vm15 = vcmp.ge.f32.partialorder %v748_v22, 0.0 }
 0x199   :  { %v519_v8 = vadd.f32 %v4350_v1, %v500_v61 }
 0x19a   :  { %v772_v36 = vsel %vm756_vm15, %v748_v22, %v764_v13 }
 0x19b   :  { %v535_v7 = vmul.f32 0.2, %v519_v8  ;;  %vm527_vm14 = vcmp.ge.f32.partialorder %v519_v8, 0.0 }
 0x19d   :  { %331 = vmax.xlane.f32.xlu2 %v330_v43  ;;  %v543_v24 = vsel %vm527_vm14, %v519_v8, %v535_v7  ;;  %v749_v8 = vadd.f32 %v4338_v50, %v4372_v25  ;;  %v4478_v25 = vld [vmem:[%s5744_s1 + $0x38] sm:$0xff] }
 0x19e   :  { %v951_v47 = vpop.permute.xlu1 %950  ;;  %556 = vmax.xlane.f32.xlu1 %v555_v44  ;;  %v4436_v29 = vadd.f32 %v543_v24, %v61_v18  ;;  %v4445_v44 = vadd.f32 %v772_v36, %v4383_v33 }
 0x19f   :  { %v976_v51 = vadd.f32 %v4346_v62, %v951_v47  ;;  %vm757_vm7 = vcmp.ge.f32.partialorder %v749_v8, 0.0 }
 0x1a0   :  { %v265_v52 = vpop.permute.xlu0 %264  ;;  %v567_v35 = vsel %vm323_vm3, %v4436_v29, -inf }
 0x1a1   :  { %v992_v53 = vmul.f32 0.2, %v976_v51  ;;  %v287_v54 = vadd.f32 %v4336_v49, %v265_v52  ;;  %vm984_vm10 = vcmp.ge.f32.partialorder %v976_v51, 0.0  ;;  %v275_v56 = vpop.permute.xlu2 %274 }
 0x1a2   :  { %v289_v13 = vadd.f32 %v4336_v49, %v275_v56 }
 0x1a3   :  { %v303_v57 = vmul.f32 0.2, %v287_v54  ;;  %v1000_v60 = vsel %vm984_vm10, %v976_v51, %v992_v53  ;;  %vm295_vm12 = vcmp.ge.f32.partialorder %v287_v54, 0.0  ;;  %v792_v53 = vsel %vm323_vm3, %v4445_v44, -inf }
 0x1a4   :  { %v4408_v2 = vadd.f32 %v1000_v60, %v4383_v33  ;;  %vm297_vm10 = vcmp.ge.f32.partialorder %v289_v13, 0.0 }
 0x1a5   :  { %v311_v11 = vsel %vm295_vm12, %v287_v54, %v303_v57  ;;  %v518_v54 = vadd.f32 %v4350_v1, %v4389_v37 }
 0x1a6   :  { %790 = vmax.xlane.f32.xlu1 %v789_v3  ;;  %v1020_v5 = vsel %vm323_vm3, %v4408_v2, -inf  ;;  %v4422_v15 = vadd.f32 %v311_v11, %v61_v18  ;;  %v60_v3 = vld [vmem:[%s5744_s1 + $0x18] sm:$0xff] }
 0x1a7   :  { %v260_v9 = vpop.permute.xlu1 %259  ;;  %1021 = vmax.xlane.f32.xlu2 %v1020_v5  ;;  %v534_v5 = vmul.f32 0.2, %v518_v54  ;;  %vm526_vm5 = vcmp.ge.f32.partialorder %v518_v54, 0.0 }
 0x1a8   :  { %v336_v23 = vsel %vm323_vm3, %v4422_v15, -inf  ;;  %v286_v34 = vadd.f32 %v4336_v49, %v260_v9 }
 0x1aa   :  { %v302_v46 = vmul.f32 0.2, %v286_v34  ;;  %vm294_vm2 = vcmp.ge.f32.partialorder %v286_v34, 0.0 }
 0x1ab   :  { %970 = vperm.xlu0 %3593, %v4319_v45   ;;  %v4425_v20 = vpop.permute.xlu0 %507  ;;  %v4434_v45 = vadd.f32 %v541_v14, %v4383_v33  ;;  %v765_v14 = vmul.f32 0.2, %v749_v8 }
 0x1ac   :  { %v310_v57 = vsel %vm294_vm2, %v286_v34, %v302_v46  ;;  %v305_v46 = vmul.f32 0.2, %v289_v13 }
 0x1ad   :  { %v561_v12 = vsel %vm323_vm3, %v4434_v45, -inf  ;;  %v4460_v4 = vadd.f32 %v310_v57, %v60_v3 }
 0x1ae   :  { %1018 = vmax.xlane.f32.xlu1 %v1017_v21  ;;  %v542_v21 = vsel %vm526_vm5, %v518_v54, %v534_v5  ;;  %v313_v57 = vsel %vm297_vm10, %v289_v13, %v305_v46 }
 0x1af   :  { %337 = vmax.xlane.f32.xlu2 %v336_v23  ;;  %v333_v11 = vsel %vm323_vm3, %v4460_v4, -inf  ;;  %v967_v23 = vpop.permute.xlu2 %966  ;;  %v4473_v24 = vadd.f32 %v542_v21, %v60_v3 }
 0x1b0   :  { %v731_v27 = vpop.permute.xlu1 %730  ;;  %v980_v21 = vadd.f32 %v4346_v62, %v967_v23 }
 0x1b1   :  { %v750_v28 = vadd.f32 %v4338_v50, %v731_v27  ;;  %v993_v27 = vmul.f32 0.2, %v977_v19 }
 0x1b2   :  { %v996_v13 = vmul.f32 0.2, %v980_v21  ;;  %vm988_vm14 = vcmp.ge.f32.partialorder %v980_v21, 0.0 }
 0x1b3   :  { %v766_v30 = vmul.f32 0.2, %v750_v28  ;;  %3595 = vset.pattern.permute.xlu0 %v4062_v59  ;;  %vm758_vm1 = vcmp.ge.f32.partialorder %v750_v28, 0.0 }
 0x1b4   :  { %v739_v32 = vpop.permute.xlu0 %738 }
 0x1b5   :  { %v774_v41 = vsel %vm758_vm1, %v750_v28, %v766_v30  ;;  %v564_v30 = vsel %vm323_vm3, %v4473_v24, -inf }
 0x1b6   :  { %562 = vmax.xlane.f32.xlu1 %v561_v12  ;;  %v4448_v48 = vadd.f32 %v774_v41, %v61_v18 }
 0x1b7   :  { %568 = vmax.xlane.f32.xlu2 %v567_v35  ;;  %v1001_v35 = vsel %vm985_vm8, %v977_v19, %v993_v27 }
 0x1b8   :  { %v798_v33 = vsel %vm323_vm3, %v4448_v48, -inf }
 0x1b9   :  { %v959_v43 = vpop.permute.xlu1 %958 }
 0x1ba   :  { %v978_v47 = vadd.f32 %v4346_v62, %v959_v43 }
 0x1bc   :  { %v994_v51 = vmul.f32 0.2, %v978_v47  ;;  %vm986_vm4 = vcmp.ge.f32.partialorder %v978_v47, 0.0 }
 0x1bd   :  { %v280_v52 = vpop.permute.xlu0 %279 }
 0x1be   :  { %793 = vmax.xlane.f32.xlu1 %v792_v53  ;;  %v290_v60 = vadd.f32 %v4336_v49, %v280_v52  ;;  %v1002_v61 = vsel %vm986_vm4, %v978_v47, %v994_v51  ;;  %v4491_v47 = vadd.f32 %v1001_v35, %v60_v3  ;;  %v4496_v51 = vld [vmem:[%s5744_s1 + $0x30] sm:$0xff]  ;;  %v512_v52 = vpop.permute.xlu2 %511  ;;  %v1004_v35 = vsel %vm988_vm14, %v980_v21, %v996_v13 }
 0x1bf   :  { %799 = vmax.xlane.f32.xlu2 %v798_v33  ;;  %v4462_v6 = vadd.f32 %v1002_v61, %v61_v18  ;;  %v752_v18 = vadd.f32 %v4338_v50, %v739_v32  ;;  %v773_v32 = vsel %vm757_vm7, %v749_v8, %v765_v14  ;;  %v522_v56 = vadd.f32 %v4350_v1, %v512_v52 }
 0x1c0   :  { %v306_v37 = vmul.f32 0.2, %v290_v60  ;;  %vm298_vm6 = vcmp.ge.f32.partialorder %v290_v60, 0.0  ;;  %v4489_v43 = vadd.f32 %v773_v32, %v60_v3  ;;  %v1023_v33 = vsel %vm323_vm3, %v4491_v47, -inf  ;;  %v62_v3 = vld [vmem:[%s5744_s1 + $0x28] sm:$0xff] }
 0x1c1   :  { %v1026_v7 = vsel %vm323_vm3, %v4462_v6, -inf  ;;  %v768_v28 = vmul.f32 0.2, %v752_v18  ;;  %vm760_vm9 = vcmp.ge.f32.partialorder %v752_v18, 0.0  ;;  %v538_v8 = vmul.f32 0.2, %v522_v56 }
 0x1c2   :  { %v270_v9 = vpop.permute.xlu1 %269  ;;  %v314_v22 = vsel %vm298_vm6, %v290_v60, %v306_v37  ;;  %v795_v54 = vsel %vm323_vm3, %v4489_v43, -inf  ;;  %v4513_v37 = vadd.f32 %v313_v57, %v4496_v51  ;;  %vm530_vm12 = vcmp.ge.f32.partialorder %v522_v56, 0.0 }
 0x1c3   :  { %v4481_v42 = vadd.f32 %v314_v22, %v4478_v25  ;;  %v288_v12 = vadd.f32 %v4336_v49, %v270_v9  ;;  %v776_v41 = vsel %vm760_vm9, %v752_v18, %v768_v28  ;;  %v546_v22 = vsel %vm530_vm12, %v522_v56, %v538_v8 }
 0x1c4   :  { %v4499_v53 = vadd.f32 %v776_v41, %v4496_v51  ;;  %v4524_v28 = vadd.f32 %v546_v22, %v4478_v25  ;;  %v4534_v46 = vadd.f32 %v1004_v35, %v4496_v51 }
 0x1c5   :  { %v345_v34 = vsel %vm323_vm3, %v4481_v42, -inf  ;;  %v304_v49 = vmul.f32 0.2, %v288_v12  ;;  %vm296_vm11 = vcmp.ge.f32.partialorder %v288_v12, 0.0 }
 0x1c6   :  { %334 = vmax.xlane.f32.xlu1 %v333_v11  ;;  %v804_v61 = vsel %vm323_vm3, %v4499_v53, -inf  ;;  %v576_v23 = vsel %vm323_vm3, %v4524_v28, -inf }
 0x1c7   :  { %1027 = vmax.xlane.f32.xlu2 %v1026_v7  ;;  %v312_v5 = vsel %vm296_vm11, %v288_v12, %v304_v49  ;;  %v342_v7 = vsel %vm323_vm3, %v4513_v37, -inf }
 0x1c8   :  { %v4515_v11 = vadd.f32 %v312_v5, %v62_v3 }
 0x1ca   :  { %v339_v18 = vsel %vm323_vm3, %v4515_v11, -inf }
 0x1cb   :  { %v504_v36 = vpop.permute.xlu1 %503 }
 0x1cc   :  { %v520_v60 = vadd.f32 %v4350_v1, %v504_v36 }
 0x1ce   :  { %565 = vmax.xlane.f32.xlu1 %v564_v30  ;;  %v536_v19 = vmul.f32 0.2, %v520_v60  ;;  %vm528_vm13 = vcmp.ge.f32.partialorder %v520_v60, 0.0 }
 0x1cf   :  { %346 = vmax.xlane.f32.xlu2 %v345_v34 }
 0x1d0   :  { %v544_v27 = vsel %vm528_vm13, %v520_v60, %v536_v19 }
 0x1d1   :  { %v4526_v30 = vadd.f32 %v544_v27, %v62_v3 }
 0x1d3   :  { %v570_v34 = vsel %vm323_vm3, %v4526_v30, -inf }
 0x1d4   :  { %v735_v9 = vpop.permute.xlu1 %734 }
 0x1d5   :  { %796 = vmax.xlane.f32.xlu0 %v795_v54  ;;  %v751_v14 = vadd.f32 %v4338_v50, %v735_v9  ;;  %v1032_v54 = vsel %vm323_vm3, %v4534_v46, -inf }
 0x1d6   :  { %1024 = vmax.xlane.f32.xlu1 %v1023_v33  ;;  %v521_v33 = vadd.f32 %v4350_v1, %v4425_v20 }
 0x1d7   :  { %805 = vmax.xlane.f32.xlu2 %v804_v61  ;;  %v767_v32 = vmul.f32 0.2, %v751_v14  ;;  %vm759_vm15 = vcmp.ge.f32.partialorder %v751_v14, 0.0 }
 0x1d8   :  { %v537_v61 = vmul.f32 0.2, %v521_v33  ;;  %vm529_vm2 = vcmp.ge.f32.partialorder %v521_v33, 0.0 }
 0x1d9   :  { %v775_v41 = vsel %vm759_vm15, %v751_v14, %v767_v32 }
 0x1da   :  { %v4536_v52 = vadd.f32 %v775_v41, %v62_v3  ;;  %v545_v19 = vsel %vm529_vm2, %v521_v33, %v537_v61 }
 0x1db   :  { %v4550_v21 = vadd.f32 %v545_v19, %v4496_v51 }
 0x1dc   :  { %v801_v56 = vsel %vm323_vm3, %v4536_v52, -inf }
 0x1dd   :  { %343 = vmax.xlane.f32.xlu0 %v342_v7  ;;  %v963_v12 = vpop.permute.xlu1 %962  ;;  %v573_v20 = vsel %vm323_vm3, %v4550_v21, -inf }
 0x1de   :  { %340 = vmax.xlane.f32.xlu1 %v339_v18  ;;  %v979_v36 = vadd.f32 %v4346_v62, %v963_v12 }
 0x1e0   :  { %v995_v49 = vmul.f32 0.2, %v979_v36  ;;  %vm987_vm1 = vcmp.ge.f32.partialorder %v979_v36, 0.0 }
 0x1e2   :  { %v1003_v57 = vsel %vm987_vm1, %v979_v36, %v995_v49 }
 0x1e3   :  { %v4544_v60 = vadd.f32 %v1003_v57, %v62_v3 }
 0x1e5   :  { %577 = vmax.xlane.f32.xlu0 %v576_v23  ;;  %v1029_v8 = vsel %vm323_vm3, %v4544_v60, -inf }
 0x1e6   :  { %571 = vmax.xlane.f32.xlu1 %v570_v34  ;;  %v743_v5 = vpop.permute.xlu1 %742 }
 0x1e7   :  { %v753_v9 = vadd.f32 %v4338_v50, %v743_v5 }
 0x1e9   :  { %v769_v18 = vmul.f32 0.2, %v753_v9  ;;  %vm761_vm4 = vcmp.ge.f32.partialorder %v753_v9, 0.0 }
 0x1eb   :  { %v777_v3 = vsel %vm761_vm4, %v753_v9, %v769_v18 }
 0x1ec   :  { %v4556_v50 = vadd.f32 %v777_v3, %v4478_v25 }
 0x1ed   :  { %1033 = vmax.xlane.f32.xlu0 %v1032_v54 }
 0x1ee   :  { %802 = vmax.xlane.f32.xlu1 %v801_v56  ;;  %v807_v51 = vsel %vm323_vm3, %v4556_v50, -inf }
 0x1f6   :  { %1030 = vmax.xlane.f32.xlu1 %v1029_v8 }
 0x1f8   :  { %v326_v7 = vpop.xlane.xlu2 %325 }
 0x1f9   :  { %v348_v1 = vsub.f32 %v4348_v0, %v326_v7 }
 0x1fb   :  { %v356_v22 = vmul.f32 1.442695, %v348_v1 }
 0x1fd   :  { %3661 = vpow2.f32 %v356_v22 }
 0x1fe   :  { %574 = vmax.xlane.f32.xlu1 %v573_v20 }
 0x200   :  { %v788_v14 = vpop.xlane.xlu2 %787 }
 0x201   :  { %v1016_v27 = vpop.xlane.xlu0 %1015  ;;  %v810_v61 = vsub.f32 %v4358_v10, %v788_v14 }
 0x202   :  { %v1038_v13 = vsub.f32 %v4360_v17, %v1016_v27 }
 0x203   :  { %v3662_v0 = vpop.eup %3661  ;;  %v818_v5 = vmul.f32 1.442695, %v810_v61 }
 0x204   :  { %v1046_v32 = vmul.f32 1.442695, %v1038_v13  ;;  %v372_v41 = vsel %vm323_vm3, %v3662_v0, 0.0 }
 0x206   :  { %808 = vmax.xlane.f32.xlu1 %v807_v51  ;;  %3663 = vpow2.f32 %v1046_v32 }
 0x208   :  { %v560_v12 = vpop.xlane.xlu2 %559 }
 0x209   :  { %v580_v35 = vsub.f32 %v4374_v26, %v560_v12 }
 0x20a   :  { %v329_v23 = vpop.xlane.xlu0 %328 }
 0x20b   :  { %v349_v34 = vsub.f32 %v4378_v31, %v329_v23  ;;  %v589_v49 = vmul.f32 1.442695, %v580_v35 }
 0x20c   :  { %v3664_v54 = vpop.eup %3663 }
 0x20d   :  { %v358_v36 = vmul.f32 1.442695, %v349_v34  ;;  %v1062_v31 = vsel %vm323_vm3, %v3664_v54, 0.0 }
 0x20e   :  { %373 = vadd.xlane.f32.xlu1 %v372_v41 }
 0x20f   :  { %3665 = vpow2.f32 %v358_v36 }
 0x210   :  { %3667 = vpow2.f32 %v589_v49  ;;  %v332_v9 = vpop.xlane.xlu2 %331 }
 0x211   :  { %v557_v17 = vpop.xlane.xlu1 %556  ;;  %v350_v41 = vsub.f32 %v4392_v38, %v332_v9 }
 0x212   :  { %v579_v56 = vsub.f32 %v4394_v40, %v557_v17 }
 0x214   :  { %v587_v33 = vmul.f32 1.442695, %v579_v56 }
 0x215   :  { %v3666_v57 = vpop.eup %3665 }
 0x216   :  { %3669 = vpow2.f32 %v587_v33  ;;  %1063 = vadd.xlane.f32.xlu1 %v1062_v31  ;;  %v429_v26 = vpack.c.bf16 %v3666_v57, %v3662_v0  ;;  %v3668_v7 = vpop.eup %3667  ;;  %v375_v35 = vsel %vm323_vm3, %v3666_v57, 0.0  ;;  %v360_v57 = vmul.f32 1.442695, %v350_v41 }
 0x217   :  { %3671 = vpow2.f32 %v818_v5 }
 0x218   :  { %3458 = vmatmul.msk.bf16.vlgmr.msrb.gmra.mxu0 %vm323_vm3, %v429_v26 }
 0x219   :  { %v791_v8 = vpop.xlane.xlu1 %790 }
 0x21a   :  { %v811_v19 = vsub.f32 %v4405_v55, %v791_v8  ;;  %v1022_v27 = vpop.xlane.xlu2 %1021  ;;  %v606_v8 = vsel %vm323_vm3, %v3668_v7, 0.0 }
 0x21b   :  { %v1040_v38 = vsub.f32 %v4408_v2, %v1022_v27 }
 0x21c   :  { %v3670_v18 = vpop.eup %3669  ;;  %v820_v40 = vmul.f32 1.442695, %v811_v19 }
 0x21d   :  { %v971_v1 = vpop.permute.xlu0 %970  ;;  %v603_v10 = vsel %vm323_vm3, %v3670_v18, 0.0  ;;  %v652_v20 = vpack.c.bf16 %v3668_v7, %v3670_v18  ;;  %v3672_v51 = vpop.eup %3671 }
 0x21e   :  { %3673 = vpow2.f32 %v820_v40  ;;  %v981_v3 = vadd.f32 %v4346_v62, %v971_v1  ;;  %604 = vadd.xlane.f32.xlu0 %v603_v10  ;;  %v834_v56 = vsel %vm323_vm3, %v3672_v51, 0.0 }
 0x21f   :  { %3462 = vmatmul.msk.bf16.vlgmr.msrb.gmra.mxu2 %vm323_vm3, %v652_v20 }
 0x220   :  { %v997_v22 = vmul.f32 0.2, %v981_v3  ;;  %vm989_vm5 = vcmp.ge.f32.partialorder %v981_v3, 0.0 }
 0x221   :  { %v1019_v14 = vpop.xlane.xlu1 %1018 }
 0x222   :  { %v1039_v55 = vsub.f32 %v4417_v16, %v1019_v14  ;;  %v1005_v13 = vsel %vm989_vm5, %v981_v3, %v997_v22  ;;  %v338_v49 = vpop.xlane.xlu2 %337 }
 0x223   :  { %v4574_v32 = vadd.f32 %v1005_v13, %v4478_v25 }
 0x224   :  { %v3674_v0 = vpop.eup %3673  ;;  %v1048_v12 = vmul.f32 1.442695, %v1039_v55  ;;  %v352_v55 = vsub.f32 %v4422_v15, %v338_v49 }
 0x225   :  { %v880_v23 = vpack.c.bf16 %v3674_v0, %v3672_v51  ;;  %v1035_v62 = vsel %vm323_vm3, %v4574_v32, -inf  ;;  %v837_v34 = vsel %vm323_vm3, %v3674_v0, 0.0 }
 0x226   :  { %3675 = vpow2.f32 %v1048_v12  ;;  %1036 = vmax.xlane.f32.xlu2 %v1035_v62  ;;  %838 = vadd.xlane.f32.xlu1 %v837_v34  ;;  %v364_v12 = vmul.f32 1.442695, %v352_v55 }
 0x227   :  { %376 = vadd.xlane.f32.xlu0 %v375_v35 }
 0x228   :  { %3466 = vmatmul.msk.bf16.vlgmr.msra.gmra.mxu0 %vm323_vm3, %v880_v23 }
 0x229   :  { %v563_v16 = vpop.xlane.xlu1 %562 }
 0x22a   :  { %v581_v25 = vsub.f32 %v4434_v45, %v563_v16  ;;  %v569_v19 = vpop.xlane.xlu2 %568 }
 0x22b   :  { %v583_v15 = vsub.f32 %v4436_v29, %v569_v19 }
 0x22c   :  { %v3676_v36 = vpop.eup %3675  ;;  %v591_v17 = vmul.f32 1.442695, %v581_v25 }
 0x22d   :  { %v1065_v33 = vsel %vm323_vm3, %v3676_v36, 0.0  ;;  %v1108_v61 = vpack.c.bf16 %v3676_v36, %v3664_v54  ;;  %v1050_v54 = vmul.f32 1.442695, %v1040_v38 }
 0x22e   :  { %3677 = vpow2.f32 %v591_v17  ;;  %835 = vadd.xlane.f32.xlu2 %v834_v56 }
 0x22f   :  { %1066 = vadd.xlane.f32.xlu0 %v1065_v33  ;;  %3470 = vmatmul.msk.bf16.vlgmr.msrb.gmra.mxu1 %vm323_vm3, %v1108_v61  ;;  %3679 = vpow2.f32 %v360_v57 }
 0x231   :  { %v794_v31 = vpop.xlane.xlu1 %793 }
 0x232   :  { %v812_v26 = vsub.f32 %v4445_v44, %v794_v31  ;;  %v800_v7 = vpop.xlane.xlu2 %799 }
 0x233   :  { %v814_v36 = vsub.f32 %v4448_v48, %v800_v7 }
 0x234   :  { %v3678_v45 = vpop.eup %3677  ;;  %v822_v5 = vmul.f32 1.442695, %v812_v26 }
 0x235   :  { %v609_v9 = vsel %vm323_vm3, %v3678_v45, 0.0  ;;  %v3680_v40 = vpop.eup %3679 }
 0x236   :  { %3681 = vpow2.f32 %v822_v5  ;;  %607 = vadd.xlane.f32.xlu2 %v606_v8  ;;  %610 = vadd.xlane.f32.xlu1 %v609_v9  ;;  %v378_v20 = vsel %vm323_vm3, %v3680_v40, 0.0 }
 0x237   :  { %3683 = vpow2.f32 %v1050_v54 }
 0x239   :  { %v335_v18 = vpop.xlane.xlu1 %334 }
 0x23a   :  { %v351_v1 = vsub.f32 %v4460_v4, %v335_v18 }
 0x23c   :  { %v3682_v10 = vpop.eup %3681  ;;  %v362_v44 = vmul.f32 1.442695, %v351_v1 }
 0x23d   :  { %v840_v2 = vsel %vm323_vm3, %v3682_v10, 0.0  ;;  %v3684_v22 = vpop.eup %3683 }
 0x23e   :  { %3685 = vpow2.f32 %v362_v44  ;;  %379 = vadd.xlane.f32.xlu2 %v378_v20  ;;  %841 = vadd.xlane.f32.xlu0 %v840_v2  ;;  %v1068_v4 = vsel %vm323_vm3, %v3684_v22, 0.0 }
 0x241   :  { %v566_v3 = vpop.xlane.xlu1 %565 }
 0x242   :  { %v582_v14 = vsub.f32 %v4473_v24, %v566_v3  ;;  %v1028_v24 = vpop.xlane.xlu2 %1027 }
 0x243   :  { %v1042_v49 = vsub.f32 %v4462_v6, %v1028_v24 }
 0x244   :  { %v3686_v27 = vpop.eup %3685  ;;  %v593_v13 = vmul.f32 1.442695, %v582_v14 }
 0x245   :  { %v381_v51 = vsel %vm323_vm3, %v3686_v27, 0.0  ;;  %v430_v0 = vpack.c.bf16 %v3686_v27, %v3680_v40  ;;  %v1054_v29 = vmul.f32 1.442695, %v1042_v49 }
 0x246   :  { %3687 = vpow2.f32 %v593_v13  ;;  %1069 = vadd.xlane.f32.xlu2 %v1068_v4  ;;  %382 = vadd.xlane.f32.xlu1 %v381_v51 }
 0x247   :  { %3459 = vmatmul.msk.bf16.vlgmr.msra.gmra.mxu3 %vm323_vm3, %v430_v0  ;;  %3689 = vpow2.f32 %v364_v12 }
 0x248   :  { %v797_v23 = vpop.xlane.xlu0 %796 }
 0x249   :  { %v813_v62 = vsub.f32 %v4489_v43, %v797_v23  ;;  %v1025_v34 = vpop.xlane.xlu1 %1024  ;;  %v595_v43 = vmul.f32 1.442695, %v583_v15 }
 0x24a   :  { %v1041_v35 = vsub.f32 %v4491_v47, %v1025_v34  ;;  %v826_v47 = vmul.f32 1.442695, %v814_v36  ;;  %v347_v40 = vpop.xlane.xlu2 %346 }
 0x24b   :  { %v824_v16 = vmul.f32 1.442695, %v813_v62  ;;  %v355_v3 = vsub.f32 %v4481_v42, %v347_v40 }
 0x24c   :  { %v3688_v25 = vpop.eup %3687  ;;  %v1052_v41 = vmul.f32 1.442695, %v1041_v35 }
 0x24d   :  { %3691 = vpow2.f32 %v824_v16  ;;  %v612_v17 = vsel %vm323_vm3, %v3688_v25, 0.0  ;;  %v653_v56 = vpack.c.bf16 %v3688_v25, %v3678_v45  ;;  %v3690_v57 = vpop.eup %3689  ;;  %v370_v55 = vmul.f32 1.442695, %v355_v3 }
 0x24e   :  { %3693 = vpow2.f32 %v1052_v41  ;;  %613 = vadd.xlane.f32.xlu0 %v612_v17  ;;  %v384_v9 = vsel %vm323_vm3, %v3690_v57, 0.0 }
 0x24f   :  { %3463 = vmatmul.msk.bf16.gmra.mxu2 %vm323_vm3, %v653_v56  ;;  %3695 = vpow2.f32 %v595_v43 }
 0x250   :  { %v344_v33 = vpop.xlane.xlu0 %343  ;;  %3697 = vpow2.f32 %v826_v47 }
 0x251   :  { %v341_v61 = vpop.xlane.xlu1 %340  ;;  %3699 = vpow2.f32 %v1054_v29  ;;  %v354_v20 = vsub.f32 %v4513_v37, %v344_v33  ;;  %v1190_v29 = vld [vmem:[%s5746_s7 + $0x8] sm:$0xff] }
 0x252   :  { %v353_v31 = vsub.f32 %v4515_v11, %v341_v61  ;;  %v806_v24 = vpop.xlane.xlu2 %805  ;;  %1229 = vmatpush.msrb.mxu3 %v1190_v29 }
 0x253   :  { %v3692_v48 = vpop.eup %3691  ;;  %v816_v25 = vsub.f32 %v4499_v53, %v806_v24 }
 0x254   :  { %v3694_v26 = vpop.eup %3693  ;;  %v366_v6 = vmul.f32 1.442695, %v353_v31  ;;  %v843_v38 = vsel %vm323_vm3, %v3692_v48, 0.0  ;;  %v881_v45 = vpack.c.bf16 %v3692_v48, %v3682_v10 }
 0x255   :  { %844 = vadd.xlane.f32.xlu2 %v843_v38  ;;  %v1071_v5 = vsel %vm323_vm3, %v3694_v26, 0.0  ;;  %v1109_v8 = vpack.c.bf16 %v3694_v26, %v3684_v22  ;;  %v3696_v19 = vpop.eup %3695 }
 0x256   :  { %3701 = vpow2.f32 %v366_v6  ;;  %3467 = vmatmul.msk.bf16.gmra.mxu0 %vm323_vm3, %v881_v45  ;;  %1072 = vadd.xlane.f32.xlu1 %v1071_v5  ;;  %v3698_v18 = vpop.eup %3697  ;;  %v615_v7 = vsel %vm323_vm3, %v3696_v19, 0.0 }
 0x257   :  { %385 = vadd.xlane.f32.xlu0 %v384_v9  ;;  %3471 = vmatmul.msk.bf16.gmra.mxu1 %vm323_vm3, %v1109_v8  ;;  %v4612_v10 = vpop.eup %3699  ;;  %v846_v22 = vsel %vm323_vm3, %v3698_v18, 0.0 }
 0x258   :  { %v578_v11 = vpop.xlane.xlu0 %577  ;;  %v1074_v27 = vsel %vm323_vm3, %v4612_v10, 0.0 }
 0x259   :  { %v572_v54 = vpop.xlane.xlu1 %571  ;;  %v586_v36 = vsub.f32 %v4524_v28, %v578_v11 }
 0x25a   :  { %v584_v1 = vsub.f32 %v4526_v30, %v572_v54  ;;  %v368_v30 = vmul.f32 1.442695, %v354_v20 }
 0x25b   :  { %v601_v47 = vmul.f32 1.442695, %v586_v36 }
 0x25c   :  { %v3702_v44 = vpop.eup %3701  ;;  %v597_v2 = vmul.f32 1.442695, %v584_v1 }
 0x25d   :  { %616 = vadd.xlane.f32.xlu2 %v615_v7  ;;  %v431_v14 = vpack.c.bf16 %v3702_v44, %v3690_v57  ;;  %v387_v12 = vsel %vm323_vm3, %v3702_v44, 0.0 }
 0x25e   :  { %3703 = vpow2.f32 %v597_v2  ;;  %847 = vadd.xlane.f32.xlu1 %v846_v22 }
 0x25f   :  { %1075 = vadd.xlane.f32.xlu0 %v1074_v27  ;;  %3460 = vmatmul.msk.bf16.gmra.mxu3 %vm323_vm3, %v431_v14  ;;  %3705 = vpow2.f32 %v368_v30 }
 0x260   :  { %v1034_v37 = vpop.xlane.xlu0 %1033  ;;  %3707 = vpow2.f32 %v370_v55 }
 0x261   :  { %v803_v13 = vpop.xlane.xlu1 %802  ;;  %v1044_v42 = vsub.f32 %v4534_v46, %v1034_v37 }
 0x262   :  { %v815_v4 = vsub.f32 %v4536_v52, %v803_v13 }
 0x263   :  { %v1058_v34 = vmul.f32 1.442695, %v1044_v42 }
 0x264   :  { %v3704_v51 = vpop.eup %3703  ;;  %v828_v0 = vmul.f32 1.442695, %v815_v4 }
 0x265   :  { %388 = vadd.xlane.f32.xlu2 %v387_v12  ;;  %v618_v23 = vsel %vm323_vm3, %v3704_v51, 0.0  ;;  %v654_v62 = vpack.c.bf16 %v3704_v51, %v3696_v19  ;;  %v3706_v52 = vpop.eup %3705 }
 0x266   :  { %3709 = vpow2.f32 %v828_v0  ;;  %619 = vadd.xlane.f32.xlu1 %v618_v23  ;;  %v3708_v16 = vpop.eup %3707  ;;  %v390_v17 = vsel %vm323_vm3, %v3706_v52, 0.0 }
 0x267   :  { %3464 = vmatmul.msk.bf16.gmra.mxu2 %vm323_vm3, %v654_v62  ;;  %3711 = vpow2.f32 %v1058_v34  ;;  %v432_v56 = vpack.c.bf16 %v3708_v16, %v3706_v52 }
 0x269   :  { %v1031_v35 = vpop.xlane.xlu1 %1030 }
 0x26a   :  { %v1043_v15 = vsub.f32 %v4544_v60, %v1031_v35  ;;  %v830_v60 = vmul.f32 1.442695, %v816_v25 }
 0x26c   :  { %v3710_v46 = vpop.eup %3709  ;;  %v1056_v41 = vmul.f32 1.442695, %v1043_v15 }
 0x26d   :  { %v849_v49 = vsel %vm323_vm3, %v3710_v46, 0.0  ;;  %v882_v43 = vpack.c.bf16 %v3710_v46, %v3698_v18  ;;  %v4633_v33 = vpop.eup %3711  ;;  %v393_v18 = vsel %vm323_vm3, %v3708_v16, 0.0 }
 0x26e   :  { %3713 = vpow2.f32 %v1056_v41  ;;  %850 = vadd.xlane.f32.xlu0 %v849_v49  ;;  %391 = vadd.xlane.f32.xlu1 %v390_v17  ;;  %v1080_v48 = vsel %vm323_vm3, %v4633_v33, 0.0  ;;  %v4662_v41 = vld [vmem:[%s5745_s6] ss:$0 sm:$0xff] }
 0x26f   :  { %3461 = vmatmul.msk.bf16.gmra.mxu3 %vm323_vm3, %v432_v56  ;;  %3468 = vmatmul.msk.bf16.gmra.mxu0 %vm323_vm3, %v882_v43  ;;  %3715 = vpow2.f32 %v830_v60 }
 0x270   :  { %3717 = vpow2.f32 %v601_v47 }
 0x271   :  { %v575_v53 = vpop.xlane.xlu1 %574 }
 0x272   :  { %v585_v28 = vsub.f32 %v4550_v21, %v575_v53 }
 0x274   :  { %v3714_v61 = vpop.eup %3713  ;;  %v599_v57 = vmul.f32 1.442695, %v585_v28 }
 0x275   :  { %v1077_v31 = vsel %vm323_vm3, %v3714_v61, 0.0  ;;  %v1110_v26 = vpack.c.bf16 %v3714_v61, %v4612_v10  ;;  %v3716_v6 = vpop.eup %3715  ;;  %v1189_v10 = vld [vmem:[%s5746_s7] sm:$0xff] }
 0x276   :  { %3719 = vpow2.f32 %v599_v57  ;;  %1078 = vadd.xlane.f32.xlu2 %v1077_v31  ;;  %1081 = vadd.xlane.f32.xlu1 %v1080_v48  ;;  %v3718_v45 = vpop.eup %3717  ;;  %v852_v11 = vsel %vm323_vm3, %v3716_v6, 0.0 }
 0x277   :  { %3472 = vmatmul.msk.bf16.gmra.mxu1 %vm323_vm3, %v1110_v26  ;;  %v624_v40 = vsel %vm323_vm3, %v3718_v45, 0.0  ;;  %1230 = vmatpush.msrb.mxu3 %v1189_v10 }
 0x279   :  { %v809_v21 = vpop.xlane.xlu1 %808 }
 0x27a   :  { %v817_v38 = vsub.f32 %v4556_v50, %v809_v21 }
 0x27c   :  { %v3720_v5 = vpop.eup %3719  ;;  %v832_v8 = vmul.f32 1.442695, %v817_v38 }
 0x27d   :  { %v621_v9 = vsel %vm323_vm3, %v3720_v5, 0.0  ;;  %v655_v19 = vpack.c.bf16 %v3718_v45, %v3720_v5 }
 0x27e   :  { %3721 = vpow2.f32 %v832_v8  ;;  %622 = vadd.xlane.f32.xlu0 %v621_v9  ;;  %853 = vadd.xlane.f32.xlu2 %v852_v11 }
 0x27f   :  { %3465 = vmatmul.msk.bf16.gmra.mxu2 %vm323_vm3, %v655_v19 }
 0x281   :  { %v374_v20 = vpop.xlane.xlu1 %373 }
 0x284   :  { %v3722_v54 = vpop.eup %3721 }
 0x285   :  { %v855_v50 = vsel %vm323_vm3, %v3722_v54, 0.0  ;;  %v883_v1 = vpack.c.bf16 %v3722_v54, %v3716_v6 }
 0x286   :  { %394 = vadd.xlane.f32.xlu0 %v393_v18  ;;  %625 = vadd.xlane.f32.xlu2 %v624_v40 }
 0x287   :  { %856 = vadd.xlane.f32.xlu1 %v855_v50  ;;  %3469 = vmatmul.msk.bf16.gmra.mxu0 %vm323_vm3, %v883_v1 }
 0x289   :  { %v1064_v27 = vpop.xlane.xlu1 %1063 }
 0x291   :  { %v605_v2 = vpop.xlane.xlu0 %604 }
 0x295   :  { %v454_v44 = vpop.f32.mrf.mxu0 }
 0x299   :  { %v1037_v7 = vpop.xlane.xlu2 %1036  ;;  %v839_v34 = vpop.xlane.xlu1 %838 }
 0x29a   :  { %v1045_v3 = vsub.f32 %v4574_v32, %v1037_v7  ;;  %v377_v30 = vpop.xlane.xlu0 %376 }
 0x29c   :  { %v1060_v22 = vmul.f32 1.442695, %v1045_v3 }
 0x29d   :  { %v456_v14 = vpop.f32.mrf.mxu0 }
 0x29e   :  { %3723 = vpow2.f32 %v1060_v22 }
 0x29f   :  { %3725 = vrcp.f32 %v605_v2 }
 0x2a0   :  { %3727 = vrcp.f32 %v374_v20 }
 0x2a1   :  { %v836_v55 = vpop.xlane.xlu2 %835 }
 0x2a2   :  { %3729 = vrcp.f32 %v836_v55  ;;  %v677_v13 = vpop.f32.mrf.mxu2  ;;  %v1067_v52 = vpop.xlane.xlu0 %1066 }
 0x2a3   :  { %3731 = vrcp.f32 %v1064_v27 }
 0x2a4   :  { %v3724_v37 = vpop.eup %3723  ;;  %3733 = vrcp.f32 %v377_v30 }
 0x2a5   :  { %v1083_v4 = vsel %vm323_vm3, %v3724_v37, 0.0  ;;  %v1111_v51 = vpack.c.bf16 %v3724_v37, %v4633_v33  ;;  %v3726_v42 = vpop.eup %3725  ;;  %v905_v0 = vpop.f32.mrf.mxu0 }
 0x2a6   :  { %1084 = vadd.xlane.f32.xlu0 %v1083_v4  ;;  %v3728_v32 = vpop.eup %3727  ;;  %v697_v12 = vmul.f32 %v3726_v42, %v677_v13 }
 0x2a7   :  { %3473 = vmatmul.msk.bf16.gmra.mxu1 %vm323_vm3, %v1111_v51  ;;  %v474_v62 = vmul.f32 %v3728_v32, %v454_v44 }
 0x2a8   :  { %v3730_v23 = vpop.eup %3729 }
 0x2a9   :  { %v925_v24 = vmul.f32 %v3730_v23, %v905_v0  ;;  %v608_v35 = vpop.xlane.xlu2 %607  ;;  %v705_v15 = vadd.f32 %v697_v12, %v474_v62  ;;  %v3732_v16 = vpop.eup %3731 }
 0x2aa   :  { %3735 = vrcp.f32 %v608_v35  ;;  %v3734_v49 = vpop.eup %3733  ;;  %v679_v43 = vpop.f32.mrf.mxu2 }
 0x2ab   :  { %3737 = vrcp.f32 %v839_v34  ;;  %v933_v25 = vadd.f32 %v925_v24, %v705_v15  ;;  %v475_v47 = vmul.f32 %v3734_v49, %v456_v14  ;;  %v611_v8 = vpop.xlane.xlu1 %610 }
 0x2ac   :  { %v1133_v46 = vpop.f32.mrf.mxu1  ;;  %3739 = vrcp.f32 %v1067_v52 }
 0x2ad   :  { %v1153_v36 = vmul.f32 %v3732_v16, %v1133_v46  ;;  %v907_v60 = vpop.f32.mrf.mxu0  ;;  %3741 = vrcp.f32 %v611_v8 }
 0x2af   :  { %v1161_v17 = vadd.f32 %v1153_v36, %v933_v25 }
 0x2b0   :  { %v3736_v56 = vpop.eup %3735 }
 0x2b1   :  { %v698_v53 = vmul.f32 %v3736_v56, %v679_v43  ;;  %v1173_v33 = vadd.f32 %v4662_v41, %v1161_v17  ;;  %v3738_v28 = vpop.eup %3737  ;;  %v380_v5 = vpop.xlane.xlu2 %379 }
 0x2b2   :  { %v926_v61 = vmul.f32 %v3738_v28, %v907_v60  ;;  %v3740_v31 = vpop.eup %3739  ;;  %v842_v9 = vpop.xlane.xlu0 %841  ;;  %3743 = vrcp.f32 %v380_v5 }
 0x2b3   :  { %v706_v29 = vadd.f32 %v698_v53, %v475_v47  ;;  %v1181_v57 = vmax.f32 %v1173_v33, 0.0  ;;  %3745 = vrcp.f32 %v842_v9  ;;  %v3742_v18 = vpop.eup %3741  ;;  %v1263_v53 = vld [vmem:[%s5747_s8 + $0x38] sm:$0xff] }
 0x2b4   :  { %v1135_v48 = vpop.f32.mrf.mxu1  ;;  %1296 = vmatpush.msra.mxu2 %v1263_v53 }
 0x2b5   :  { %v934_v26 = vadd.f32 %v926_v61, %v706_v29  ;;  %v1154_v21 = vmul.f32 %v3740_v31, %v1135_v48  ;;  %3474 = vmatmul.msk.f32.vlgmr.msrb.gmra.mxu3 %vm75_vm0, %v1181_v57 }
 0x2b7   :  { %v1162_v6 = vadd.f32 %v1154_v21, %v934_v26 }
 0x2b8   :  { %v3744_v50 = vpop.eup %3743 }
 0x2b9   :  { %v1174_v38 = vadd.f32 %v4662_v41, %v1162_v6  ;;  %v1070_v11 = vpop.xlane.xlu2 %1069  ;;  %v383_v19 = vpop.xlane.xlu1 %382 }
 0x2ba   :  { %3747 = vrcp.f32 %v1070_v11  ;;  %v3746_v3 = vpop.eup %3745 }
 0x2bb   :  { %v1182_v45 = vmax.f32 %v1174_v38, 0.0  ;;  %3749 = vrcp.f32 %v383_v19  ;;  %v1262_v38 = vld [vmem:[%s5747_s8 + $0x30] sm:$0xff] }
 0x2bc   :  { %1297 = vmatpush.msra.mxu2 %v1262_v38 }
 0x2bd   :  { %3475 = vmatmul.msk.f32.gmra.mxu3 %vm75_vm0, %v1182_v45  ;;  %v1261_v45 = vld [vmem:[%s5747_s8 + $0x28] sm:$0xff] }
 0x2be   :  { %1298 = vmatpush.msra.mxu2 %v1261_v45 }
 0x2c0   :  { %v3748_v30 = vpop.eup %3747 }
 0x2c1   :  { %v614_v40 = vpop.xlane.xlu0 %613  ;;  %v3750_v4 = vpop.eup %3749 }
 0x2c2   :  { %3751 = vrcp.f32 %v614_v40 }
 0x2c8   :  { %v845_v44 = vpop.xlane.xlu2 %844  ;;  %v3752_v42 = vpop.eup %3751 }
 0x2c9   :  { %v1073_v22 = vpop.xlane.xlu1 %1072  ;;  %3753 = vrcp.f32 %v845_v44 }
 0x2ca   :  { %v459_v54 = vpop.f32.mrf.mxu3  ;;  %3755 = vrcp.f32 %v1073_v22  ;;  %v386_v24 = vpop.xlane.xlu0 %385 }
 0x2cb   :  { %v476_v20 = vmul.f32 %v3744_v50, %v459_v54 }
 0x2cf   :  { %v3754_v34 = vpop.eup %3753 }
 0x2d0   :  { %v3756_v46 = vpop.eup %3755  ;;  %v617_v49 = vpop.xlane.xlu2 %616 }
 0x2d1   :  { %v848_v17 = vpop.xlane.xlu1 %847  ;;  %3757 = vrcp.f32 %v617_v49 }
 0x2d2   :  { %v682_v1 = vpop.f32.mrf.mxu2  ;;  %v461_v13 = vpop.f32.mrf.mxu3  ;;  %3759 = vrcp.f32 %v386_v24 }
 0x2d3   :  { %v910_v10 = vpop.f32.mrf.mxu0  ;;  %v699_v2 = vmul.f32 %v3742_v18, %v682_v1  ;;  %v477_v12 = vmul.f32 %v3750_v4, %v461_v13  ;;  %v1076_v47 = vpop.xlane.xlu0 %1075  ;;  %3761 = vrcp.f32 %v848_v17 }
 0x2d4   :  { %v1138_v7 = vpop.f32.mrf.mxu1  ;;  %v927_v27 = vmul.f32 %v3746_v3, %v910_v10  ;;  %3763 = vrcp.f32 %v1076_v47 }
 0x2d5   :  { %v707_v14 = vadd.f32 %v699_v2, %v476_v20  ;;  %v1155_v37 = vmul.f32 %v3748_v30, %v1138_v7 }
 0x2d7   :  { %v935_v55 = vadd.f32 %v927_v27, %v707_v14  ;;  %v3758_v57 = vpop.eup %3757 }
 0x2d8   :  { %v389_v29 = vpop.xlane.xlu2 %388  ;;  %v3760_v26 = vpop.eup %3759 }
 0x2d9   :  { %v1163_v51 = vadd.f32 %v1155_v37, %v935_v55  ;;  %v620_v61 = vpop.xlane.xlu1 %619  ;;  %v3762_v5 = vpop.eup %3761  ;;  %v1260_v55 = vld [vmem:[%s5747_s8 + $0x20] sm:$0xff] }
 0x2da   :  { %v684_v0 = vpop.f32.mrf.mxu2  ;;  %3765 = vrcp.f32 %v620_v61  ;;  %v3764_v19 = vpop.eup %3763  ;;  %1299 = vmatpush.msra.mxu2 %v1260_v55 }
 0x2db   :  { %v912_v32 = vpop.f32.mrf.mxu0  ;;  %v700_v23 = vmul.f32 %v3752_v42, %v684_v0  ;;  %v1175_v62 = vadd.f32 %v4662_v41, %v1163_v51  ;;  %3767 = vrcp.f32 %v389_v29 }
 0x2dc   :  { %v1140_v35 = vpop.f32.mrf.mxu1  ;;  %v928_v15 = vmul.f32 %v3754_v34, %v912_v32  ;;  %v1258_v34 = vld [vmem:[%s5747_s8 + $0x10] sm:$0xff] }
 0x2dd   :  { %v708_v52 = vadd.f32 %v700_v23, %v477_v12  ;;  %v1183_v16 = vmax.f32 %v1175_v62, 0.0  ;;  %v1156_v36 = vmul.f32 %v3756_v46, %v1140_v35  ;;  %v1259_v23 = vld [vmem:[%s5747_s8 + $0x18] sm:$0xff]  ;;  %v1256_v46 = vld [vmem:[%s5747_s8] sm:$0xff] }
 0x2de   :  { %1300 = vmatpush.msra.mxu2 %v1259_v23 }
 0x2df   :  { %v936_v25 = vadd.f32 %v928_v15, %v708_v52  ;;  %3476 = vmatmul.msk.f32.gmra.mxu3 %vm75_vm0, %v1183_v16  ;;  %v1257_v52 = vld [vmem:[%s5747_s8 + $0x8] sm:$0xff] }
 0x2e0   :  { %v3766_v18 = vpop.eup %3765  ;;  %1301 = vmatpush.msra.mxu2 %v1258_v34 }
 0x2e1   :  { %v1164_v56 = vadd.f32 %v1156_v36, %v936_v25  ;;  %v851_v21 = vpop.xlane.xlu0 %850  ;;  %v3768_v20 = vpop.eup %3767 }
 0x2e2   :  { %v464_v33 = vpop.f32.mrf.mxu3  ;;  %3769 = vrcp.f32 %v851_v21  ;;  %v392_v62 = vpop.xlane.xlu1 %391  ;;  %1302 = vmatpush.msra.mxu2 %v1257_v52 }
 0x2e3   :  { %v1176_v43 = vadd.f32 %v4662_v41, %v1164_v56  ;;  %v478_v6 = vmul.f32 %v3760_v26, %v464_v33 }
 0x2e4   :  { %1303 = vmatpush.msra.mxu2 %v1256_v46 }
 0x2e5   :  { %v1184_v60 = vmax.f32 %v1176_v43, 0.0 }
 0x2e7   :  { %3477 = vmatmul.msk.f32.gmra.mxu3 %vm75_vm0, %v1184_v60 }
 0x2e8   :  { %v3770_v22 = vpop.eup %3769 }
 0x2e9   :  { %v1079_v54 = vpop.xlane.xlu2 %1078 }
 0x2ea   :  { %v687_v28 = vpop.f32.mrf.mxu2  ;;  %v466_v40 = vpop.f32.mrf.mxu3  ;;  %3771 = vrcp.f32 %v1079_v54 }
 0x2eb   :  { %v701_v48 = vmul.f32 %v3758_v57, %v687_v28  ;;  %v479_v7 = vmul.f32 %v3768_v20, %v466_v40  ;;  %v1082_v15 = vpop.xlane.xlu1 %1081 }
 0x2ec   :  { %v915_v31 = vpop.f32.mrf.mxu0 }
 0x2ed   :  { %v709_v8 = vadd.f32 %v701_v48, %v478_v6  ;;  %v929_v9 = vmul.f32 %v3762_v5, %v915_v31 }
 0x2ef   :  { %v937_v1 = vadd.f32 %v929_v9, %v709_v8 }
 0x2f0   :  { %v3772_v13 = vpop.eup %3771 }
 0x2f1   :  { %v854_v24 = vpop.xlane.xlu2 %853  ;;  %v623_v35 = vpop.xlane.xlu0 %622 }
 0x2f2   :  { %v689_v11 = vpop.f32.mrf.mxu2  ;;  %3773 = vrcp.f32 %v623_v35  ;;  %v469_v17 = vpop.f32.mrf.mxu3 }
 0x2f3   :  { %v702_v10 = vmul.f32 %v3766_v18, %v689_v11  ;;  %3775 = vrcp.f32 %v392_v62 }
 0x2f4   :  { %v1143_v50 = vpop.f32.mrf.mxu1  ;;  %v917_v2 = vpop.f32.mrf.mxu0  ;;  %3777 = vrcp.f32 %v854_v24 }
 0x2f5   :  { %v1157_v44 = vmul.f32 %v3764_v19, %v1143_v50  ;;  %v710_v14 = vadd.f32 %v702_v10, %v479_v7  ;;  %v930_v27 = vmul.f32 %v3770_v22, %v917_v2  ;;  %3779 = vrcp.f32 %v1082_v15 }
 0x2f7   :  { %v1165_v3 = vadd.f32 %v1157_v44, %v937_v1  ;;  %v938_v51 = vadd.f32 %v930_v27, %v710_v14 }
 0x2f8   :  { %v3774_v49 = vpop.eup %3773 }
 0x2f9   :  { %v1177_v30 = vadd.f32 %v4662_v41, %v1165_v3  ;;  %v626_v25 = vpop.xlane.xlu2 %625  ;;  %v395_v36 = vpop.xlane.xlu0 %394 }
 0x2fa   :  { %3781 = vrcp.f32 %v626_v25  ;;  %v3776_v60 = vpop.eup %3775  ;;  %v857_v53 = vpop.xlane.xlu1 %856 }
 0x2fb   :  { %v1185_v37 = vmax.f32 %v1177_v30, 0.0  ;;  %3783 = vrcp.f32 %v395_v36  ;;  %v480_v47 = vmul.f32 %v3776_v60, %v469_v17  ;;  %v3778_v33 = vpop.eup %3777  ;;  %v471_v5 = vpop.f32.mrf.mxu3 }
 0x2fc   :  { %v1145_v4 = vpop.f32.mrf.mxu1  ;;  %v3780_v61 = vpop.eup %3779  ;;  %3785 = vrcp.f32 %v857_v53 }
 0x2fd   :  { %v1158_v42 = vmul.f32 %v3772_v13, %v1145_v4  ;;  %3478 = vmatmul.msk.f32.gmra.mxu3 %vm75_vm0, %v1185_v37  ;;  %v1361_v37 = vld [vmem:[%s5748_s10] sm:$0xf] }
 0x2fe   :  { %v1362_v13 = vpack.c.bf16 %v1361_v37, %v1361_v37 }
 0x2ff   :  { %v1166_v0 = vadd.f32 %v1158_v42, %v938_v51 }
 0x300   :  { %v3782_v31 = vpop.eup %3781  ;;  %v1755_v4 = vshrl.u32 %v1362_v13, 16  ;;  %v4729_v42 = vpack.i.b16 %v1362_v13, %v1362_v13 }
 0x301   :  { %v1178_v32 = vadd.f32 %v4662_v41, %v1166_v0  ;;  %v3784_v26 = vpop.eup %3783 }
 0x302   :  { %v692_v16 = vpop.f32.mrf.mxu2  ;;  %v481_v9 = vmul.f32 %v3784_v26, %v471_v5  ;;  %v3786_v19 = vpop.eup %3785  ;;  %v1756_v0 = vpack.i.b16 %v1755_v4, %v1755_v4 }
 0x303   :  { %v1186_v12 = vmax.f32 %v1178_v32, 0.0  ;;  %v703_v43 = vmul.f32 %v3774_v49, %v692_v16 }
 0x304   :  { %v920_v56 = vpop.f32.mrf.mxu0  ;;  %v1758_v23 = vperm.slane %v1756_v0, 0  ;;  %v2214_v62 = vperm.slane %v1756_v0, 1 }
 0x305   :  { %3479 = vmatmul.msk.f32.gmra.mxu3 %vm75_vm0, %v1186_v12  ;;  %v711_v28 = vadd.f32 %v703_v43, %v480_v47  ;;  %v931_v29 = vmul.f32 %v3778_v33, %v920_v56  ;;  %v1527_v12 = vperm.slane %v4729_v42, 0 }
 0x306   :  { %v4740_v46 = vunpack.c.l.bf16 %v1758_v23  ;;  %v4742_v25 = vunpack.c.l.bf16 %v2214_v62  ;;  %v1986_v23 = vperm.slane %v4729_v42, 1 }
 0x307   :  { %v939_v6 = vadd.f32 %v931_v29, %v711_v28  ;;  %v4738_v16 = vunpack.c.l.bf16 %v1527_v12 }
 0x30a   :  { %v694_v57 = vpop.f32.mrf.mxu2 }
 0x30b   :  { %v704_v38 = vmul.f32 %v3782_v31, %v694_v57 }
 0x30c   :  { %v922_v8 = vpop.f32.mrf.mxu0 }
 0x30d   :  { %v712_v54 = vadd.f32 %v704_v38, %v481_v9  ;;  %v932_v18 = vmul.f32 %v3786_v19, %v922_v8 }
 0x30f   :  { %v940_v44 = vadd.f32 %v932_v18, %v712_v54 }
 0x319   :  { %v1085_v48 = vpop.xlane.xlu0 %1084 }
 0x31a   :  { %3787 = vrcp.f32 %v1085_v48 }
 0x320   :  { %v3788_v1 = vpop.eup %3787 }
 0x324   :  { %v1148_v21 = vpop.f32.mrf.mxu1 }
 0x325   :  { %v1159_v45 = vmul.f32 %v3780_v61, %v1148_v21 }
 0x327   :  { %v1167_v11 = vadd.f32 %v1159_v45, %v939_v6 }
 0x329   :  { %v1179_v40 = vadd.f32 %v4662_v41, %v1167_v11 }
 0x32b   :  { %v1187_v50 = vmax.f32 %v1179_v40, 0.0 }
 0x32c   :  { %v1150_v10 = vpop.f32.mrf.mxu1 }
 0x32d   :  { %v1160_v20 = vmul.f32 %v3788_v1, %v1150_v10  ;;  %3480 = vmatmul.msk.f32.gmra.mxu3 %vm75_vm0, %v1187_v50 }
 0x32f   :  { %v1168_v2 = vadd.f32 %v1160_v20, %v940_v44 }
 0x331   :  { %v1180_v7 = vadd.f32 %v4662_v41, %v1168_v2 }
 0x333   :  { %v1188_v3 = vmax.f32 %v1180_v7, 0.0 }
 0x335   :  { %3481 = vmatmul.msk.f32.gmra.mxu3 %vm75_vm0, %v1188_v3 }
 0x338   :  { %v4704_v22 = vpop.f32.mrf.mxu3 }
 0x339   :  { %3482 = vmatmul.msk.f32.vlgmr.msra.gmra.mxu2 %vm323_vm3, %v4704_v22  ;;  %v1353_v8 = vpack.c.bf16 %v4704_v22, %v4704_v22 }
 0x33b   :  { %v1528_v2 = vunpack.c.l.bf16 %v1353_v8 }
 0x33d   :  { %v1760_v12 = vmul.f32 %v4740_v46, %v1528_v2  ;;  %v2216_v62 = vmul.f32 %v4742_v25, %v1528_v2 }
 0x340   :  { %v4708_v14 = vpop.f32.mrf.mxu3 }
 0x341   :  { %3483 = vmatmul.msk.f32.gmra.mxu2 %vm323_vm3, %v4708_v14  ;;  %v1354_v61 = vpack.c.bf16 %v4708_v14, %v4708_v14 }
 0x343   :  { %v4792_v54 = vunpack.c.l.bf16 %v1354_v61 }
 0x345   :  { %v1761_v4 = vmul.f32 %v4740_v46, %v4792_v54  ;;  %v2217_v0 = vmul.f32 %v4742_v25, %v4792_v54 }
 0x362   :  { %v4712_v27 = vpop.f32.mrf.mxu3 }
 0x363   :  { %3484 = vmatmul.msk.f32.gmra.mxu2 %vm323_vm3, %v4712_v27  ;;  %v1355_v57 = vpack.c.bf16 %v4712_v27, %v4712_v27 }
 0x365   :  { %v4786_v9 = vunpack.c.l.bf16 %v1355_v57 }
 0x367   :  { %v1539_v7 = vmul.f32 %v4738_v16, %v4786_v9  ;;  %v1762_v3 = vmul.f32 %v4740_v46, %v4786_v9 }
 0x36a   :  { %v4716_v30 = vpop.f32.mrf.mxu3 }
 0x36b   :  { %3485 = vmatmul.msk.f32.gmra.mxu2 %vm323_vm3, %v4716_v30  ;;  %v1356_v17 = vpack.c.bf16 %v4716_v30, %v4716_v30 }
 0x36d   :  { %v4775_v6 = vunpack.c.l.bf16 %v1356_v17 }
 0x36f   :  { %v1540_v1 = vmul.f32 %v4738_v16, %v4775_v6  ;;  %v1763_v10 = vmul.f32 %v4740_v46, %v4775_v6  ;;  %v2219_v20 = vmul.f32 %v4742_v25, %v4775_v6 }
 0x371   :  { %v1546_v37 = vpack.c.bf16 %v1540_v1, %v1539_v7  ;;  %v1769_v13 = vpack.c.bf16 %v1763_v10, %v1762_v3 }
 0x380   :  { %v4720_v41 = vpop.f32.mrf.mxu3 }
 0x381   :  { %3486 = vmatmul.msk.f32.gmra.mxu2 %vm323_vm3, %v4720_v41  ;;  %v1357_v52 = vpack.c.bf16 %v4720_v41, %v4720_v41 }
 0x383   :  { %v4758_v53 = vunpack.c.l.bf16 %v1357_v52  ;;  %v1987_v52 = vunpack.c.l.bf16 %v1986_v23 }
 0x385   :  { %v1541_v5 = vmul.f32 %v4738_v16, %v4758_v53  ;;  %v1764_v11 = vmul.f32 %v4740_v46, %v4758_v53  ;;  %v2220_v19 = vmul.f32 %v4742_v25, %v4758_v53  ;;  %v1988_v17 = vmul.f32 %v1987_v52, %v1528_v2 }
 0x388   :  { %v1247_v55 = vpop.f32.mrf.mxu3 }
 0x389   :  { %3487 = vmatmul.msk.f32.gmra.mxu2 %vm323_vm3, %v1247_v55  ;;  %v1358_v34 = vpack.c.bf16 %v1247_v55, %v1247_v55 }
 0x38b   :  { %v4744_v36 = vunpack.c.l.bf16 %v1358_v34 }
 0x38d   :  { %v1542_v21 = vmul.f32 %v4738_v16, %v4744_v36  ;;  %v1765_v38 = vmul.f32 %v4740_v46, %v4744_v36  ;;  %v2221_v45 = vmul.f32 %v4742_v25, %v4744_v36 }
 0x38f   :  { %v1547_v18 = vpack.c.bf16 %v1542_v21, %v1541_v5  ;;  %v1770_v40 = vpack.c.bf16 %v1765_v38, %v1764_v11  ;;  %v2226_v50 = vpack.c.bf16 %v2221_v45, %v2220_v19 }
 0x3b0   :  { %v1250_v51 = vpop.f32.mrf.mxu3 }
 0x3b1   :  { %3488 = vmatmul.msk.f32.gmra.mxu2 %vm323_vm3, %v1250_v51  ;;  %v1359_v32 = vpack.c.bf16 %v1250_v51, %v1250_v51 }
 0x3b3   :  { %v4732_v24 = vunpack.c.l.bf16 %v1359_v32  ;;  %v1537_v32 = vmul.f32 %v4738_v16, %v1528_v2 }
 0x3b5   :  { %v1543_v43 = vmul.f32 %v4738_v16, %v4732_v24  ;;  %v1766_v60 = vmul.f32 %v4740_v46, %v4732_v24  ;;  %v2222_v47 = vmul.f32 %v4742_v25, %v4732_v24  ;;  %v1994_v42 = vmul.f32 %v1987_v52, %v4732_v24 }
 0x3b6   :  { %v1991_v24 = vmul.f32 %v1987_v52, %v4775_v6 }
 0x3b8   :  { %v1253_v35 = vpop.f32.mrf.mxu3 }
 0x3b9   :  { %v1360_v15 = vpack.c.bf16 %v1253_v35, %v1253_v35  ;;  %3489 = vmatmul.msk.f32.gmra.mxu2 %vm323_vm3, %v1253_v35  ;;  %3490 = vmatpush.xpose.msk.msrb.mxu0 %vm323_vm3, %v1253_v35  ;;  %v1768_v35 = vpack.c.bf16 %v1761_v4, %v1760_v12  ;;  %v4908_v4 = vld [vmem:[%s5744_s1 + $0x8] sm:$0xff] }
 0x3bb   :  { %v4746_v49 = vunpack.c.l.bf16 %v1360_v15 }
 0x3bc   :  { %v4750_v56 = vpop.f32.mrf.mxu2 }
 0x3bd   :  { %3491 = vmatpush.xpose.msk.msrb.mxu0 %vm323_vm3, %v1250_v51  ;;  %1603 = vperm.xlu0 %3595, %v4750_v56   ;;  %v1544_v33 = vmul.f32 %v4738_v16, %v4746_v49  ;;  %v1767_v28 = vmul.f32 %v4740_v46, %v4746_v49  ;;  %v2223_v29 = vmul.f32 %v4742_v25, %v4746_v49  ;;  %v1329_v46 = vld [vmem:[%s5749_s9] sm:$0xf] }
 0x3be   :  { %1365 = vperm.xlu2 %3594, %v4750_v56   ;;  %v1995_v15 = vmul.f32 %v1987_v52, %v4746_v49  ;;  %v1989_v49 = vmul.f32 %v1987_v52, %v4792_v54 }
 0x3bf   :  { %v1548_v31 = vpack.c.bf16 %v1544_v33, %v1543_v43  ;;  %v1771_v48 = vpack.c.bf16 %v1767_v28, %v1766_v60  ;;  %v2227_v26 = vpack.c.bf16 %v2223_v29, %v2222_v47 }
 0x3c1   :  { %3492 = vmatpush.xpose.msk.msrb.mxu0 %vm323_vm3, %v1247_v55  ;;  %1569 = vmatpush.bf16.msra.mxu1 %v1548_v31  ;;  %v1538_v55 = vmul.f32 %v4738_v16, %v4792_v54  ;;  %v1993_v16 = vmul.f32 %v1987_v52, %v4744_v36  ;;  %v1990_v36 = vmul.f32 %v1987_v52, %v4786_v9 }
 0x3c2   :  { %1792 = vmatpush.bf16.msra.mxu3 %v1771_v48  ;;  %2248 = vmatpush.bf16.msrb.mxu2 %v2227_v26 }
 0x3c3   :  { %v1545_v34 = vpack.c.bf16 %v1538_v55, %v1537_v32 }
 0x3c4   :  { %v4798_v44 = vpop.f32.mrf.mxu2 }
 0x3c5   :  { %3493 = vmatpush.xpose.msk.msrb.mxu0 %vm323_vm3, %v4720_v41  ;;  %1570 = vmatpush.bf16.msra.mxu1 %v1547_v18  ;;  %v2218_v41 = vmul.f32 %v4742_v25, %v4786_v9  ;;  %v1992_v25 = vmul.f32 %v1987_v52, %v4758_v53  ;;  %v4922_v52 = vld [vmem:[%s5744_s1 + $0x10] sm:$0xff] }
 0x3c6   :  { %1793 = vmatpush.bf16.msra.mxu3 %v1770_v40  ;;  %2249 = vmatpush.bf16.msrb.mxu2 %v2226_v50 }
 0x3c7   :  { %3600 = vset.pattern.permute.xlu0 %v4064_v39  ;;  %3596 = vset.pattern.permute.xlu2 %v4064_v39  ;;  %v2225_v51 = vpack.c.bf16 %v2219_v20, %v2218_v41  ;;  %v4045_v20 = vld [vmem:[%s5744_s1] sm:$0xff] }
 0x3c8   :  { %1370 = vperm.xlu1 %3598, %v4798_v44   ;;  %2062 = vperm.xlu2 %3596, %v4750_v56  }
 0x3c9   :  { %2066 = vperm.xlu0 %3600, %v4798_v44   ;;  %3494 = vmatpush.xpose.msk.msrb.mxu0 %vm323_vm3, %v4716_v30  ;;  %v2224_v30 = vpack.c.bf16 %v2217_v0, %v2216_v62 }
 0x3ca   :  { %1571 = vmatpush.bf16.msra.mxu1 %v1546_v37  ;;  %1794 = vmatpush.bf16.msra.mxu3 %v1769_v13 }
 0x3cb   :  { %2250 = vmatpush.bf16.msrb.mxu2 %v2225_v51 }
 0x3cd   :  { %3495 = vmatpush.xpose.msk.msrb.mxu0 %vm323_vm3, %v4712_v27  ;;  %v1999_v27 = vpack.c.bf16 %v1995_v15, %v1994_v42 }
 0x3ce   :  { %1572 = vmatpush.bf16.msra.mxu1 %v1545_v34  ;;  %1795 = vmatpush.bf16.msra.mxu3 %v1768_v35 }
 0x3cf   :  { %2251 = vmatpush.bf16.msrb.mxu2 %v2224_v30 }
 0x3d0   :  { %3597 = vset.pattern.permute.xlu2 %v4061_v58  ;;  %3604 = vset.pattern.permute.xlu1 %v4064_v39 }
 0x3d1   :  { %1834 = vperm.xlu2 %3597, %v4750_v56   ;;  %3496 = vmatpush.xpose.msk.msrb.mxu0 %vm323_vm3, %v4708_v14  ;;  %v1998_v14 = vpack.c.bf16 %v1993_v16, %v1992_v25  ;;  %v1996_v56 = vpack.c.bf16 %v1989_v49, %v1988_v17 }
 0x3d2   :  { %3602 = vset.pattern.permute.xlu0 %v4063_v63 }
 0x3d5   :  { %3497 = vmatpush.xpose.msk.msrb.mxu0 %vm323_vm3, %v4704_v22  ;;  %v1997_v22 = vpack.c.bf16 %v1991_v24, %v1990_v36 }
 0x3d8   :  { %3498 = vmatmul.msk.f32.vlgmr.msrb.gmra.mxu0 %vm323_vm3, %v1329_v46 }
 0x3d9   :  { %2020 = vmatpush.bf16.msra.mxu0 %v1999_v27  ;;  %3599 = vset.pattern.permute.xlu2 %v4062_v59 }
 0x3da   :  { %1607 = vperm.xlu2 %3599, %v4798_v44  }
 0x3dd   :  { %2021 = vmatpush.bf16.msra.mxu0 %v1998_v14 }
 0x3e1   :  { %2022 = vmatpush.bf16.msra.mxu0 %v1997_v22 }
 0x3e2   :  { %3601 = vset.pattern.permute.xlu2 %v4061_v58 }
 0x3e3   :  { %1838 = vperm.xlu2 %3601, %v4798_v44  }
 0x3e5   :  { %2023 = vmatpush.bf16.msra.mxu0 %v1996_v56 }
 0x3e6   :  { %v1311_v43 = vpop.f32.mrf.mxu2 }
 0x3e7   :  { %2070 = vperm.xlu1 %3604, %v1311_v43   ;;  %1375 = vperm.xlu0 %3602, %v1311_v43  }
 0x3eb   :  { %3606 = vset.pattern.permute.xlu2 %v4063_v63 }
 0x3ee   :  { %v1314_v60 = vpop.f32.mrf.mxu2 }
 0x3ef   :  { %3603 = vset.pattern.permute.xlu0 %v4062_v59  ;;  %1380 = vperm.xlu2 %3606, %v1314_v60  }
 0x3f0   :  { %1611 = vperm.xlu0 %3603, %v1311_v43   ;;  %3610 = vset.pattern.permute.xlu1 %v4063_v63 }
 0x3f7   :  { %3607 = vset.pattern.permute.xlu2 %v4062_v59 }
 0x3f8   :  { %3605 = vset.pattern.permute.xlu0 %v4061_v58  ;;  %1615 = vperm.xlu2 %3607, %v1314_v60  }
 0x3f9   :  { %1842 = vperm.xlu0 %3605, %v1311_v43  }
 0x400   :  { %3608 = vset.pattern.permute.xlu2 %v4064_v39 }
 0x401   :  { %2074 = vperm.xlu2 %3608, %v1314_v60   ;;  %3612 = vset.pattern.permute.xlu0 %v4064_v39 }
 0x404   :  { %v1317_v47 = vpop.f32.mrf.mxu2 }
 0x405   :  { %2078 = vperm.xlu0 %3612, %v1317_v47   ;;  %1385 = vperm.xlu1 %3610, %v1317_v47  }
 0x409   :  { %3609 = vset.pattern.permute.xlu2 %v4061_v58 }
 0x40a   :  { %1846 = vperm.xlu2 %3609, %v1314_v60  }
 0x40c   :  { %v1320_v53 = vpop.f32.mrf.mxu2 }
 0x40d   :  { %3613 = vset.pattern.permute.xlu1 %v4061_v58 }
 0x40e   :  { %1850 = vperm.xlu1 %3613, %v1317_v47  }
 0x412   :  { %3611 = vset.pattern.permute.xlu2 %v4062_v59 }
 0x413   :  { %1619 = vperm.xlu2 %3611, %v1317_v47  }
 0x416   :  { %3615 = vset.pattern.permute.xlu1 %v4062_v59 }
 0x417   :  { %1623 = vperm.xlu1 %3615, %v1320_v53  }
 0x418   :  { %v1366_v33 = vpop.permute.xlu2 %1365 }
 0x41b   :  { %3614 = vset.pattern.permute.xlu2 %v4063_v63 }
 0x41c   :  { %1390 = vperm.xlu2 %3614, %v1320_v53  }
 0x41f   :  { %3618 = vset.pattern.permute.xlu1 %v4063_v63 }
 0x422   :  { %v4865_v28 = vpop.permute.xlu2 %2062 }
 0x424   :  { %3616 = vset.pattern.permute.xlu2 %v4064_v39 }
 0x425   :  { %2082 = vperm.xlu2 %3616, %v1320_v53  }
 0x42b   :  { %v1835_v29 = vpop.permute.xlu2 %1834 }
 0x42d   :  { %3617 = vset.pattern.permute.xlu2 %v4061_v58 }
 0x42e   :  { %1854 = vperm.xlu2 %3617, %v1320_v53  }
 0x42f   :  { %v1604_v26 = vpop.permute.xlu0 %1603 }
 0x434   :  { %v1323_v61 = vpop.f32.mrf.mxu2  ;;  %v1608_v57 = vpop.permute.xlu2 %1607 }
 0x435   :  { %2086 = vperm.xlu0 %3612, %v1323_v61   ;;  %1395 = vperm.xlu1 %3618, %v1323_v61  }
 0x436   :  { %3619 = vset.pattern.permute.xlu2 %v4062_v59 }
 0x437   :  { %1627 = vperm.xlu2 %3619, %v1323_v61  }
 0x43a   :  { %v4883_v45 = vpop.permute.xlu1 %1370 }
 0x43b   :  { %v2067_v6 = vpop.permute.xlu0 %2066 }
 0x43c   :  { %v1326_v31 = vpop.f32.mrf.mxu2 }
 0x43d   :  { %3620 = vset.pattern.permute.xlu1 %v4061_v58  ;;  %3625 = vset.pattern.permute.xlu0 %v4063_v63  ;;  %v4873_v48 = vpop.permute.xlu2 %1838 }
 0x43e   :  { %1858 = vperm.xlu1 %3620, %v1323_v61  }
 0x43f   :  { %3621 = vset.pattern.permute.xlu2 %v4063_v63 }
 0x440   :  { %1400 = vperm.xlu2 %3621, %v1326_v31  }
 0x446   :  { %3623 = vset.pattern.permute.xlu1 %v4064_v39 }
 0x447   :  { %2090 = vperm.xlu1 %3623, %v1326_v31  }
 0x448   :  { %3622 = vset.pattern.permute.xlu2 %v4062_v59 }
 0x449   :  { %v4877_v21 = vpop.permute.xlu2 %1380  ;;  %1631 = vperm.xlu2 %3622, %v1326_v31  }
 0x44f   :  { %3626 = vset.pattern.permute.xlu1 %v4062_v59 }
 0x451   :  { %3624 = vset.pattern.permute.xlu2 %v4061_v58 }
 0x452   :  { %v4881_v38 = vpop.permute.xlu2 %1615  ;;  %1862 = vperm.xlu2 %3624, %v1326_v31  }
 0x455   :  { %v1350_v5 = vpop.f32.mrf.mxu0 }
 0x456   :  { %v4885_v8 = vperm.slane %v1350_v5, 1  ;;  %v4887_v9 = vperm.slane %v1350_v5, 2  ;;  %v4892_v10 = vperm.slane %v1350_v5, 0  ;;  %v4899_v7 = vperm.slane %v1350_v5, 3 }
 0x458   :  { %v1866_v11 = vadd.f32 %v4887_v9, %v1835_v29  ;;  %v1636_v19 = vadd.f32 %v4885_v8, %v1608_v57  ;;  %v1404_v37 = vadd.f32 %v4892_v10, %v1366_v33  ;;  %v1635_v30 = vadd.f32 %v4885_v8, %v1604_v26 }
 0x459   :  { %v1376_v54 = vpop.permute.xlu0 %1375  ;;  %v2071_v44 = vpop.permute.xlu1 %2070  ;;  %v2094_v16 = vadd.f32 %v4899_v7, %v4865_v28  ;;  %v2095_v43 = vadd.f32 %v4899_v7, %v2067_v6  ;;  %v1405_v28 = vadd.f32 %v4892_v10, %v4883_v45 }
 0x45a   :  { %vm1874_vm6 = vcmp.ge.f32.partialorder %v1866_v11, 0.0  ;;  %v1882_v18 = vmul.f32 0.2, %v1866_v11  ;;  %3627 = vset.pattern.permute.xlu2 %v4064_v39  ;;  %v1652_v1 = vmul.f32 0.2, %v1636_v19  ;;  %vm1644_vm7 = vcmp.ge.f32.partialorder %v1636_v19, 0.0 }
 0x45b   :  { %v2075_v40 = vpop.permute.xlu2 %2074  ;;  %v2096_v41 = vadd.f32 %v4899_v7, %v2071_v44  ;;  %v1420_v12 = vmul.f32 0.2, %v1404_v37  ;;  %vm1412_vm9 = vcmp.ge.f32.partialorder %v1404_v37, 0.0  ;;  %v1406_v62 = vadd.f32 %v4892_v10, %v1376_v54 }
 0x45c   :  { %v1890_v50 = vsel %vm1874_vm6, %v1866_v11, %v1882_v18  ;;  %v1660_v55 = vsel %vm1644_vm7, %v1636_v19, %v1652_v1  ;;  %v1651_v25 = vmul.f32 0.2, %v1635_v30  ;;  %vm1643_vm11 = vcmp.ge.f32.partialorder %v1635_v30, 0.0 }
 0x45d   :  { %v4897_v2 = vadd.f32 %v4045_v20, %v1890_v50  ;;  %v4911_v51 = vadd.f32 %v4908_v4, %v1660_v55  ;;  %v2112_v0 = vmul.f32 0.2, %v2096_v41  ;;  %vm2104_vm8 = vcmp.ge.f32.partialorder %v2096_v41, 0.0 }
 0x45e   :  { %v1428_v35 = vsel %vm1412_vm9, %v1404_v37, %v1420_v12  ;;  %v1422_v42 = vmul.f32 0.2, %v1406_v62  ;;  %vm1414_vm10 = vcmp.ge.f32.partialorder %v1406_v62, 0.0  ;;  %v2110_v17 = vmul.f32 0.2, %v2094_v16 }
 0x45f   :  { %v1906_v3 = vsel %vm323_vm3, %v4897_v2, -inf  ;;  %v1678_v23 = vsel %vm323_vm3, %v4911_v51, -inf  ;;  %v2120_v34 = vsel %vm2104_vm8, %v2096_v41, %v2112_v0  ;;  %v4927_v27 = vadd.f32 %v4045_v20, %v1428_v35  ;;  %v4048_v35 = vld [vmem:[%s5744_s1 + $0x18] sm:$0xff] }
 0x460   :  { %1907 = vmax.xlane.f32.xlu0 %v1906_v3  ;;  %v4925_v15 = vadd.f32 %v4922_v52, %v2120_v34  ;;  %v1430_v49 = vsel %vm1414_vm10, %v1406_v62, %v1422_v42  ;;  %v1659_v56 = vsel %vm1643_vm11, %v1635_v30, %v1651_v25  ;;  %vm2102_vm12 = vcmp.ge.f32.partialorder %v2094_v16, 0.0 }
 0x461   :  { %v1444_v22 = vsel %vm323_vm3, %v4927_v27, -inf  ;;  %v4938_v60 = vadd.f32 %v4922_v52, %v1430_v49  ;;  %v4940_v53 = vadd.f32 %v4045_v20, %v1659_v56  ;;  %v2118_v33 = vsel %vm2102_vm12, %v2094_v16, %v2110_v17 }
 0x462   :  { %v1612_v13 = vpop.permute.xlu0 %1611  ;;  %v2140_v24 = vsel %vm323_vm3, %v4925_v15, -inf  ;;  %v2111_v29 = vmul.f32 0.2, %v2095_v43  ;;  %vm2103_vm14 = vcmp.ge.f32.partialorder %v2095_v43, 0.0  ;;  %v4948_v31 = vadd.f32 %v4045_v20, %v2118_v33 }
 0x463   :  { %v1450_v57 = vsel %vm323_vm3, %v4938_v60, -inf  ;;  %v2097_v26 = vadd.f32 %v4899_v7, %v2075_v40  ;;  %v1675_v6 = vsel %vm323_vm3, %v4940_v53, -inf  ;;  %v1421_v11 = vmul.f32 0.2, %v1405_v28 }
 0x464   :  { %v4913_v32 = vpop.permute.xlu2 %1846  ;;  %v1637_v45 = vadd.f32 %v4885_v8, %v1612_v13  ;;  %v2119_v19 = vsel %vm2103_vm14, %v2095_v43, %v2111_v29  ;;  %vm1413_vm15 = vcmp.ge.f32.partialorder %v1405_v28, 0.0  ;;  %v2134_v18 = vsel %vm323_vm3, %v4948_v31, -inf }
 0x465   :  { %v2113_v1 = vmul.f32 0.2, %v2097_v26  ;;  %v4960_v40 = vadd.f32 %v4908_v4, %v2119_v19  ;;  %v1429_v44 = vsel %vm1413_vm15, %v1405_v28, %v1421_v11  ;;  %v1867_v20 = vadd.f32 %v4887_v9, %v4873_v48 }
 0x466   :  { %v1653_v3 = vmul.f32 0.2, %v1637_v45  ;;  %vm2105_vm1 = vcmp.ge.f32.partialorder %v2097_v26, 0.0  ;;  %vm1645_vm2 = vcmp.ge.f32.partialorder %v1637_v45, 0.0  ;;  %v4967_v55 = vadd.f32 %v4908_v4, %v1429_v44 }
 0x467   :  { %v2137_v0 = vsel %vm323_vm3, %v4960_v40, -inf  ;;  %v2121_v12 = vsel %vm2105_vm1, %v2097_v26, %v2113_v1  ;;  %vm1875_vm4 = vcmp.ge.f32.partialorder %v1867_v20, 0.0  ;;  %v1407_v62 = vadd.f32 %v4892_v10, %v4877_v21 }
 0x468   :  { %1679 = vmax.xlane.f32.xlu0 %v1678_v23  ;;  %v1883_v23 = vmul.f32 0.2, %v1867_v20  ;;  %v1661_v48 = vsel %vm1645_vm2, %v1637_v45, %v1653_v3  ;;  %v1447_v34 = vsel %vm323_vm3, %v4967_v55, -inf  ;;  %v4979_v30 = vadd.f32 %v4048_v35, %v2121_v12 }
 0x469   :  { %v4982_v16 = vadd.f32 %v4922_v52, %v1661_v48  ;;  %v1638_v25 = vadd.f32 %v4885_v8, %v4881_v38  ;;  %v1423_v21 = vmul.f32 0.2, %v1407_v62  ;;  %vm1415_vm6 = vcmp.ge.f32.partialorder %v1407_v62, 0.0 }
 0x46a   :  { %v1869_v38 = vadd.f32 %v4887_v9, %v4913_v32 }
 0x46b   :  { %v1843_v46 = vpop.permute.xlu0 %1842  ;;  %v1654_v17 = vmul.f32 0.2, %v1638_v25  ;;  %v1431_v43 = vsel %vm1415_vm6, %v1407_v62, %v1423_v21  ;;  %vm1646_vm7 = vcmp.ge.f32.partialorder %v1638_v25, 0.0 }
 0x46c   :  { %v1868_v36 = vadd.f32 %v4887_v9, %v1843_v46  ;;  %v1891_v46 = vsel %vm1875_vm4, %v1867_v20, %v1883_v23  ;;  %v1885_v26 = vmul.f32 0.2, %v1869_v38  ;;  %vm1877_vm9 = vcmp.ge.f32.partialorder %v1869_v38, 0.0 }
 0x46d   :  { %v1620_v14 = vpop.permute.xlu2 %1619  ;;  %v1662_v32 = vsel %vm1646_vm7, %v1638_v25, %v1654_v17 }
 0x46e   :  { %v1884_v47 = vmul.f32 0.2, %v1868_v36  ;;  %vm1876_vm13 = vcmp.ge.f32.partialorder %v1868_v36, 0.0  ;;  %v1639_v37 = vadd.f32 %v4885_v8, %v1620_v14  ;;  %v5008_v11 = vadd.f32 %v4048_v35, %v1662_v32 }
 0x46f   :  { %v1893_v20 = vsel %vm1877_vm9, %v1869_v38, %v1885_v26 }
 0x470   :  { %2141 = vmax.xlane.f32.xlu0 %v2140_v24  ;;  %v1892_v5 = vsel %vm1876_vm13, %v1868_v36, %v1884_v47  ;;  %v1655_v42 = vmul.f32 0.2, %v1639_v37  ;;  %vm1647_vm5 = vcmp.ge.f32.partialorder %v1639_v37, 0.0  ;;  %v2143_v24 = vsel %vm323_vm3, %v4979_v30, -inf }
 0x471   :  { %1445 = vmax.xlane.f32.xlu1 %v1444_v22  ;;  %v4957_v50 = vadd.f32 %v4922_v52, %v1892_v5  ;;  %v4989_v36 = vadd.f32 %v4908_v4, %v1891_v46  ;;  %v1681_v52 = vsel %vm323_vm3, %v4982_v16, -inf  ;;  %v4049_v4 = vld [vmem:[%s5744_s1 + $0x20] sm:$0xff]  ;;  %v5019_v12 = vadd.f32 %v4048_v35, %v1893_v20 }
 0x472   :  { %v1663_v49 = vsel %vm1647_vm5, %v1639_v37, %v1655_v42 }
 0x473   :  { %v1912_v41 = vsel %vm323_vm3, %v4957_v50, -inf  ;;  %v1909_v47 = vsel %vm323_vm3, %v4989_v36, -inf  ;;  %v5001_v33 = vadd.f32 %v4049_v4, %v1663_v49  ;;  %v1915_v25 = vsel %vm323_vm3, %v5019_v12, -inf }
 0x475   :  { %v1687_v5 = vsel %vm323_vm3, %v5001_v33, -inf }
 0x476   :  { %v4944_v61 = vpop.permute.xlu2 %1390 }
 0x477   :  { %v1386_v54 = vpop.permute.xlu1 %1385  ;;  %v1409_v42 = vadd.f32 %v4892_v10, %v4944_v61 }
 0x478   :  { %1451 = vmax.xlane.f32.xlu0 %v1450_v57  ;;  %v1408_v28 = vadd.f32 %v4892_v10, %v1386_v54  ;;  %v5004_v57 = vadd.f32 %v4048_v35, %v1431_v43 }
 0x479   :  { %1676 = vmax.xlane.f32.xlu1 %v1675_v6  ;;  %v2079_v6 = vpop.permute.xlu0 %2078  ;;  %v1425_v61 = vmul.f32 0.2, %v1409_v42  ;;  %vm1417_vm14 = vcmp.ge.f32.partialorder %v1409_v42, 0.0 }
 0x47a   :  { %v1424_v45 = vmul.f32 0.2, %v1408_v28  ;;  %v1453_v54 = vsel %vm323_vm3, %v5004_v57, -inf  ;;  %vm1416_vm10 = vcmp.ge.f32.partialorder %v1408_v28, 0.0  ;;  %v2098_v1 = vadd.f32 %v4899_v7, %v2079_v6 }
 0x47b   :  { %2135 = vmax.xlane.f32.xlu2 %v2134_v18  ;;  %v1433_v26 = vsel %vm1417_vm14, %v1409_v42, %v1425_v61 }
 0x47c   :  { %v1432_v23 = vsel %vm1416_vm10, %v1408_v28, %v1424_v45  ;;  %v2114_v48 = vmul.f32 0.2, %v2098_v1  ;;  %vm2106_vm12 = vcmp.ge.f32.partialorder %v2098_v1, 0.0 }
 0x47e   :  { %v2122_v35 = vsel %vm2106_vm12, %v2098_v1, %v2114_v48  ;;  %v4051_v48 = vld [vmem:[%s5744_s1 + $0x30] sm:$0xff] }
 0x47f   :  { %v2083_v13 = vpop.permute.xlu2 %2082  ;;  %v5037_v17 = vadd.f32 %v4049_v4, %v2122_v35 }
 0x480   :  { %1913 = vmax.xlane.f32.xlu0 %v1912_v41  ;;  %v1851_v14 = vpop.permute.xlu1 %1850  ;;  %v2099_v19 = vadd.f32 %v4899_v7, %v2083_v13  ;;  %v1684_v41 = vsel %vm323_vm3, %v5008_v11, -inf }
 0x481   :  { %2138 = vmax.xlane.f32.xlu1 %v2137_v0  ;;  %v1870_v22 = vadd.f32 %v4887_v9, %v1851_v14  ;;  %v2146_v32 = vsel %vm323_vm3, %v5037_v17, -inf }
 0x482   :  { %v2115_v0 = vmul.f32 0.2, %v2099_v19  ;;  %vm2107_vm11 = vcmp.ge.f32.partialorder %v2099_v19, 0.0 }
 0x483   :  { %1448 = vmax.xlane.f32.xlu2 %v1447_v34  ;;  %v1886_v29 = vmul.f32 0.2, %v1870_v22  ;;  %vm1878_vm8 = vcmp.ge.f32.partialorder %v1870_v22, 0.0  ;;  %v5023_v34 = vadd.f32 %v4049_v4, %v1432_v23 }
 0x484   :  { %v2123_v14 = vsel %vm2107_vm11, %v2099_v19, %v2115_v0 }
 0x485   :  { %v1894_v18 = vsel %vm1878_vm8, %v1870_v22, %v1886_v29  ;;  %v4050_v22 = vld [vmem:[%s5744_s1 + $0x28] sm:$0xff] }
 0x486   :  { %v5016_v37 = vadd.f32 %v4049_v4, %v1894_v18  ;;  %v5048_v4 = vadd.f32 %v4050_v22, %v1433_v26 }
 0x488   :  { %2144 = vmax.xlane.f32.xlu0 %v2143_v24  ;;  %v1855_v56 = vpop.permute.xlu2 %1854  ;;  %v1918_v62 = vsel %vm323_vm3, %v5016_v37, -inf  ;;  %v1456_v24 = vsel %vm323_vm3, %v5023_v34, -inf  ;;  %v1459_v18 = vsel %vm323_vm3, %v5048_v4, -inf }
 0x489   :  { %1682 = vmax.xlane.f32.xlu1 %v1681_v52  ;;  %v1624_v44 = vpop.permute.xlu1 %1623  ;;  %v5034_v52 = vadd.f32 %v4050_v22, %v2123_v14  ;;  %v1871_v49 = vadd.f32 %v4887_v9, %v1855_v56 }
 0x48a   :  { %v1640_v13 = vadd.f32 %v4885_v8, %v1624_v44 }
 0x48b   :  { %1910 = vmax.xlane.f32.xlu2 %v1909_v47  ;;  %v2149_v43 = vsel %vm323_vm3, %v5034_v52, -inf  ;;  %v1887_v28 = vmul.f32 0.2, %v1871_v49  ;;  %vm1879_vm15 = vcmp.ge.f32.partialorder %v1871_v49, 0.0 }
 0x48c   :  { %v1656_v46 = vmul.f32 0.2, %v1640_v13  ;;  %vm1648_vm13 = vcmp.ge.f32.partialorder %v1640_v13, 0.0 }
 0x48d   :  { %v1895_v45 = vsel %vm1879_vm15, %v1871_v49, %v1887_v28  ;;  %v4052_v28 = vld [vmem:[%s5744_s1 + $0x38] sm:$0xff] }
 0x48e   :  { %v1664_v38 = vsel %vm1648_vm13, %v1640_v13, %v1656_v46  ;;  %v5052_v1 = vadd.f32 %v4050_v22, %v1895_v45 }
 0x48f   :  { %v5041_v47 = vadd.f32 %v4050_v22, %v1664_v38 }
 0x490   :  { %1688 = vmax.xlane.f32.xlu0 %v1687_v5  ;;  %v1921_v23 = vsel %vm323_vm3, %v5052_v1, -inf }
 0x491   :  { %1454 = vmax.xlane.f32.xlu1 %v1453_v54  ;;  %v1628_v3 = vpop.permute.xlu2 %1627  ;;  %v1690_v56 = vsel %vm323_vm3, %v5041_v47, -inf }
 0x492   :  { %v1641_v29 = vadd.f32 %v4885_v8, %v1628_v3 }
 0x493   :  { %1685 = vmax.xlane.f32.xlu2 %v1684_v41 }
 0x494   :  { %v1657_v6 = vmul.f32 0.2, %v1641_v29  ;;  %vm1649_vm1 = vcmp.ge.f32.partialorder %v1641_v29, 0.0 }
 0x496   :  { %v1665_v41 = vsel %vm1649_vm1, %v1641_v29, %v1657_v6 }
 0x498   :  { %1919 = vmax.xlane.f32.xlu0 %v1918_v62  ;;  %v5062_v62 = vadd.f32 %v4051_v48, %v1665_v41 }
 0x499   :  { %1916 = vmax.xlane.f32.xlu1 %v1915_v25 }
 0x49a   :  { %v1401_v21 = vpop.permute.xlu2 %1400 }
 0x49b   :  { %1457 = vmax.xlane.f32.xlu2 %v1456_v24 }
 0x4a0   :  { %2150 = vmax.xlane.f32.xlu0 %v2149_v43 }
 0x4a1   :  { %2147 = vmax.xlane.f32.xlu1 %v2146_v32 }
 0x4a3   :  { %1691 = vmax.xlane.f32.xlu2 %v1690_v56  ;;  %v1632_v5 = vpop.permute.xlu2 %1631 }
 0x4a4   :  { %v1642_v44 = vadd.f32 %v4885_v8, %v1632_v5  ;;  %v1411_v8 = vadd.f32 %v4892_v10, %v1401_v21 }
 0x4a6   :  { %v1658_v42 = vmul.f32 0.2, %v1642_v44  ;;  %vm1650_vm5 = vcmp.ge.f32.partialorder %v1642_v44, 0.0  ;;  %v1427_v61 = vmul.f32 0.2, %v1411_v8  ;;  %vm1419_vm6 = vcmp.ge.f32.partialorder %v1411_v8, 0.0 }
 0x4a7   :  { %v1396_v19 = vpop.permute.xlu1 %1395  ;;  %v2087_v54 = vpop.permute.xlu0 %2086 }
 0x4a8   :  { %v1410_v20 = vadd.f32 %v4892_v10, %v1396_v19  ;;  %v2100_v3 = vadd.f32 %v4899_v7, %v2087_v54  ;;  %v1693_v10 = vsel %vm323_vm3, %v5062_v62, -inf  ;;  %v1666_v21 = vsel %vm1650_vm5, %v1642_v44, %v1658_v42 }
 0x4a9   :  { %1460 = vmax.xlane.f32.xlu1 %v1459_v18  ;;  %v5079_v29 = vadd.f32 %v4052_v28, %v1666_v21  ;;  %v1435_v26 = vsel %vm1419_vm6, %v1411_v8, %v1427_v61 }
 0x4aa   :  { %v1426_v0 = vmul.f32 0.2, %v1410_v20  ;;  %vm2108_vm2 = vcmp.ge.f32.partialorder %v2100_v3, 0.0  ;;  %v2116_v13 = vmul.f32 0.2, %v2100_v3  ;;  %vm1418_vm4 = vcmp.ge.f32.partialorder %v1410_v20, 0.0 }
 0x4ab   :  { %1922 = vmax.xlane.f32.xlu2 %v1921_v23  ;;  %v1696_v56 = vsel %vm323_vm3, %v5079_v29, -inf  ;;  %v5083_v6 = vadd.f32 %v4052_v28, %v1435_v26 }
 0x4ac   :  { %v1434_v46 = vsel %vm1418_vm4, %v1410_v20, %v1426_v0  ;;  %v2124_v25 = vsel %vm2108_vm2, %v2100_v3, %v2116_v13  ;;  %v1863_v14 = vpop.permute.xlu2 %1862 }
 0x4ad   :  { %v5065_v35 = vadd.f32 %v4051_v48, %v1434_v46  ;;  %v5069_v22 = vadd.f32 %v4051_v48, %v2124_v25  ;;  %v1873_v49 = vadd.f32 %v4887_v9, %v1863_v14  ;;  %v1465_v18 = vsel %vm323_vm3, %v5083_v6, -inf }
 0x4af   :  { %v1462_v24 = vsel %vm323_vm3, %v5065_v35, -inf  ;;  %v2152_v43 = vsel %vm323_vm3, %v5069_v22, -inf  ;;  %v1889_v32 = vmul.f32 0.2, %v1873_v49  ;;  %vm1881_vm7 = vcmp.ge.f32.partialorder %v1873_v49, 0.0 }
 0x4b0   :  { %v1859_v38 = vpop.permute.xlu1 %1858  ;;  %1463 = vmax.xlane.f32.xlu0 %v1462_v24 }
 0x4b1   :  { %1694 = vmax.xlane.f32.xlu1 %v1693_v10  ;;  %v1897_v5 = vsel %vm1881_vm7, %v1873_v49, %v1889_v32  ;;  %v1872_v19 = vadd.f32 %v4887_v9, %v1859_v38 }
 0x4b2   :  { %v5089_v44 = vadd.f32 %v4052_v28, %v1897_v5 }
 0x4b3   :  { %2153 = vmax.xlane.f32.xlu2 %v2152_v43  ;;  %v1888_v3 = vmul.f32 0.2, %v1872_v19  ;;  %vm1880_vm9 = vcmp.ge.f32.partialorder %v1872_v19, 0.0 }
 0x4b4   :  { %v1927_v0 = vsel %vm323_vm3, %v5089_v44, -inf }
 0x4b8   :  { %1697 = vmax.xlane.f32.xlu0 %v1696_v56 }
 0x4b9   :  { %v2091_v45 = vpop.permute.xlu1 %2090 }
 0x4ba   :  { %v2101_v54 = vadd.f32 %v4899_v7, %v2091_v45  ;;  %v1896_v7 = vsel %vm1880_vm9, %v1872_v19, %v1888_v3 }
 0x4bb   :  { %1466 = vmax.xlane.f32.xlu2 %v1465_v18  ;;  %v5097_v23 = vadd.f32 %v4051_v48, %v1896_v7 }
 0x4bc   :  { %vm2109_vm8 = vcmp.ge.f32.partialorder %v2101_v54, 0.0  ;;  %v2117_v20 = vmul.f32 0.2, %v2101_v54 }
 0x4bd   :  { %v1924_v8 = vsel %vm323_vm3, %v5097_v23, -inf }
 0x4be   :  { %v2125_v41 = vsel %vm2109_vm8, %v2101_v54, %v2117_v20 }
 0x4bf   :  { %v5093_v13 = vadd.f32 %v4052_v28, %v2125_v41 }
 0x4c0   :  { %1928 = vmax.xlane.f32.xlu0 %v1927_v0 }
 0x4c1   :  { %v2155_v9 = vsel %vm323_vm3, %v5093_v13, -inf }
 0x4c2   :  { %2156 = vmax.xlane.f32.xlu1 %v2155_v9 }
 0x4ca   :  { %1925 = vmax.xlane.f32.xlu1 %v1924_v8 }
 0x4d3   :  { %v1908_v42 = vpop.xlane.xlu0 %1907 }
 0x4d4   :  { %v1930_v46 = vsub.f32 %v4897_v2, %v1908_v42 }
 0x4d6   :  { %v1938_v25 = vmul.f32 1.442695, %v1930_v46 }
 0x4d8   :  { %3789 = vpow2.f32 %v1938_v25 }
 0x4db   :  { %v1680_v14 = vpop.xlane.xlu0 %1679 }
 0x4dc   :  { %v1700_v24 = vsub.f32 %v4911_v51, %v1680_v14 }
 0x4de   :  { %v5103_v61 = vpop.eup %3789  ;;  %v1709_v49 = vmul.f32 1.442695, %v1700_v24 }
 0x4df   :  { %v1954_v38 = vsel %vm323_vm3, %v5103_v61, 0.0 }
 0x4e0   :  { %3791 = vpow2.f32 %v1709_v49  ;;  %1955 = vadd.xlane.f32.xlu0 %v1954_v38 }
 0x4e3   :  { %v2142_v48 = vpop.xlane.xlu0 %2141 }
 0x4e4   :  { %v1446_v10 = vpop.xlane.xlu1 %1445  ;;  %v2160_v5 = vsub.f32 %v4925_v15, %v2142_v48 }
 0x4e5   :  { %v1468_v21 = vsub.f32 %v4927_v27, %v1446_v10 }
 0x4e6   :  { %v3792_v43 = vpop.eup %3791  ;;  %v2170_v3 = vmul.f32 1.442695, %v2160_v5 }
 0x4e7   :  { %v1476_v28 = vmul.f32 1.442695, %v1468_v21  ;;  %v1726_v2 = vsel %vm323_vm3, %v3792_v43, 0.0 }
 0x4e8   :  { %1727 = vadd.xlane.f32.xlu0 %v1726_v2 }
 0x4e9   :  { %3793 = vpow2.f32 %v1476_v28 }
 0x4eb   :  { %v1452_v32 = vpop.xlane.xlu0 %1451 }
 0x4ec   :  { %v1470_v51 = vsub.f32 %v4938_v60, %v1452_v32  ;;  %v1677_v26 = vpop.xlane.xlu1 %1676 }
 0x4ed   :  { %v1699_v56 = vsub.f32 %v4940_v53, %v1677_v26 }
 0x4ee   :  { %v1480_v45 = vmul.f32 1.442695, %v1470_v51  ;;  %v2136_v18 = vpop.xlane.xlu2 %2135 }
 0x4ef   :  { %v3794_v19 = vpop.eup %3793  ;;  %v1707_v54 = vmul.f32 1.442695, %v1699_v56  ;;  %v2158_v27 = vsub.f32 %v4948_v31, %v2136_v18 }
 0x4f0   :  { %3795 = vpow2.f32 %v1480_v45  ;;  %v1492_v20 = vsel %vm323_vm3, %v3794_v19, 0.0 }
 0x4f1   :  { %3797 = vpow2.f32 %v1707_v54  ;;  %1493 = vadd.xlane.f32.xlu2 %v1492_v20  ;;  %v2166_v41 = vmul.f32 1.442695, %v2158_v27 }
 0x4f3   :  { %v1914_v0 = vpop.xlane.xlu0 %1913  ;;  %3799 = vpow2.f32 %v2166_v41 }
 0x4f4   :  { %v2139_v60 = vpop.xlane.xlu1 %2138  ;;  %3801 = vpow2.f32 %v2170_v3  ;;  %v1932_v28 = vsub.f32 %v4957_v50, %v1914_v0 }
 0x4f5   :  { %v2159_v53 = vsub.f32 %v4960_v40, %v2139_v60 }
 0x4f6   :  { %v5115_v9 = vpop.eup %3795  ;;  %v1449_v8 = vpop.xlane.xlu2 %1448  ;;  %v1942_v18 = vmul.f32 1.442695, %v1932_v28 }
 0x4f7   :  { %v3798_v15 = vpop.eup %3797  ;;  %v2168_v7 = vmul.f32 1.442695, %v2159_v53  ;;  %v1498_v31 = vsel %vm323_vm3, %v5115_v9, 0.0  ;;  %v1469_v46 = vsub.f32 %v4967_v55, %v1449_v8 }
 0x4f8   :  { %v1772_v42 = vpack.c.bf16 %v3792_v43, %v3798_v15  ;;  %1499 = vadd.xlane.f32.xlu0 %v1498_v31  ;;  %v1723_v25 = vsel %vm323_vm3, %v3798_v15, 0.0 }
 0x4f9   :  { %3803 = vpow2.f32 %v2168_v7  ;;  %1724 = vadd.xlane.f32.xlu1 %v1723_v25  ;;  %v3800_v14 = vpop.eup %3799  ;;  %v1478_v24 = vmul.f32 1.442695, %v1469_v46 }
 0x4fa   :  { %3503 = vmatmul.msk.bf16.vlgmr.msra.gmra.mxu3 %vm323_vm3, %v1772_v42  ;;  %v2182_v49 = vsel %vm323_vm3, %v3800_v14, 0.0  ;;  %v3802_v38 = vpop.eup %3801 }
 0x4fb   :  { %v2145_v40 = vpop.xlane.xlu0 %2144  ;;  %3805 = vpow2.f32 %v1478_v24  ;;  %2183 = vadd.xlane.f32.xlu2 %v2182_v49  ;;  %v2188_v43 = vsel %vm323_vm3, %v3802_v38, 0.0 }
 0x4fc   :  { %v1683_v48 = vpop.xlane.xlu1 %1682  ;;  %v2161_v21 = vsub.f32 %v4979_v30, %v2145_v40 }
 0x4fd   :  { %v1701_v51 = vsub.f32 %v4982_v16, %v1683_v48 }
 0x4fe   :  { %v1911_v55 = vpop.xlane.xlu2 %1910  ;;  %v2172_v45 = vmul.f32 1.442695, %v2161_v21 }
 0x4ff   :  { %v3804_v10 = vpop.eup %3803  ;;  %v1931_v32 = vsub.f32 %v4989_v36, %v1911_v55  ;;  %v1711_v50 = vmul.f32 1.442695, %v1701_v51 }
 0x500   :  { %v2228_v2 = vpack.c.bf16 %v3804_v10, %v3800_v14  ;;  %2189 = vadd.xlane.f32.xlu0 %v2188_v43  ;;  %v2185_v53 = vsel %vm323_vm3, %v3804_v10, 0.0 }
 0x501   :  { %v3806_v26 = vpop.eup %3805  ;;  %v1940_v56 = vmul.f32 1.442695, %v1931_v32 }
 0x502   :  { %3511 = vmatmul.msk.bf16.vlgmr.msrb.gmra.mxu2 %vm323_vm3, %v2228_v2  ;;  %v1549_v5 = vpack.c.bf16 %v3806_v26, %v3794_v19  ;;  %v1495_v30 = vsel %vm323_vm3, %v3806_v26, 0.0 }
 0x503   :  { %v1689_v54 = vpop.xlane.xlu0 %1688  ;;  %3807 = vpow2.f32 %v1940_v56  ;;  %1496 = vadd.xlane.f32.xlu1 %v1495_v30 }
 0x504   :  { %v1455_v27 = vpop.xlane.xlu1 %1454  ;;  %3499 = vmatmul.msk.bf16.vlgmr.msra.gmra.mxu1 %vm323_vm3, %v1549_v5  ;;  %3809 = vpow2.f32 %v2172_v45  ;;  %v1703_v42 = vsub.f32 %v5001_v33, %v1689_v54 }
 0x505   :  { %v1471_v20 = vsub.f32 %v5004_v57, %v1455_v27  ;;  %3811 = vpow2.f32 %v1942_v18 }
 0x506   :  { %v1686_v36 = vpop.xlane.xlu2 %1685  ;;  %3813 = vpow2.f32 %v1711_v50 }
 0x507   :  { %v1482_v16 = vmul.f32 1.442695, %v1471_v20  ;;  %v1702_v3 = vsub.f32 %v5008_v11, %v1686_v36 }
 0x509   :  { %v3808_v19 = vpop.eup %3807  ;;  %3815 = vpow2.f32 %v1482_v16  ;;  %v1713_v41 = vmul.f32 1.442695, %v1702_v3 }
 0x50a   :  { %v2000_v0 = vpack.c.bf16 %v3808_v19, %v5103_v61  ;;  %v1957_v15 = vsel %vm323_vm3, %v3808_v19, 0.0  ;;  %v5136_v7 = vpop.eup %3809 }
 0x50b   :  { %v1920_v60 = vpop.xlane.xlu0 %1919  ;;  %3817 = vpow2.f32 %v1713_v41  ;;  %2186 = vadd.xlane.f32.xlu1 %v2185_v53  ;;  %1958 = vadd.xlane.f32.xlu2 %v1957_v15  ;;  %v3812_v11 = vpop.eup %3811  ;;  %v2229_v14 = vpack.c.bf16 %v5136_v7, %v3802_v38  ;;  %v2191_v53 = vsel %vm323_vm3, %v5136_v7, 0.0 }
 0x50c   :  { %v1917_v57 = vpop.xlane.xlu1 %1916  ;;  %3507 = vmatmul.msk.bf16.vlgmr.msra.gmra.mxu0 %vm323_vm3, %v2000_v0  ;;  %v3814_v31 = vpop.eup %3813  ;;  %v1960_v49 = vsel %vm323_vm3, %v3812_v11, 0.0  ;;  %v1934_v26 = vsub.f32 %v5016_v37, %v1920_v60 }
 0x50d   :  { %v1933_v8 = vsub.f32 %v5019_v12, %v1917_v57  ;;  %v1715_v12 = vmul.f32 1.442695, %v1703_v42  ;;  %v1729_v10 = vsel %vm323_vm3, %v3814_v31, 0.0 }
 0x50e   :  { %v1458_v46 = vpop.xlane.xlu2 %1457  ;;  %v1946_v27 = vmul.f32 1.442695, %v1934_v26 }
 0x50f   :  { %v1944_v61 = vmul.f32 1.442695, %v1933_v8  ;;  %v3816_v25 = vpop.eup %3815  ;;  %v1472_v40 = vsub.f32 %v5023_v34, %v1458_v46 }
 0x510   :  { %v1550_v21 = vpack.c.bf16 %v3816_v25, %v5115_v9  ;;  %v1501_v56 = vsel %vm323_vm3, %v3816_v25, 0.0 }
 0x511   :  { %3819 = vpow2.f32 %v1944_v61  ;;  %v3818_v24 = vpop.eup %3817  ;;  %v1484_v34 = vmul.f32 1.442695, %v1472_v40 }
 0x512   :  { %3512 = vmatmul.msk.bf16.gmra.mxu2 %vm323_vm3, %v2229_v14  ;;  %v1773_v33 = vpack.c.bf16 %v3818_v24, %v3814_v31  ;;  %3821 = vpow2.f32 %v1715_v12  ;;  %v1732_v5 = vsel %vm323_vm3, %v3818_v24, 0.0 }
 0x513   :  { %v2151_v48 = vpop.xlane.xlu0 %2150  ;;  %1730 = vadd.xlane.f32.xlu2 %v1729_v10  ;;  %1961 = vadd.xlane.f32.xlu1 %v1960_v49 }
 0x514   :  { %v2163_v55 = vsub.f32 %v5034_v52, %v2151_v48  ;;  %v2148_v43 = vpop.xlane.xlu1 %2147  ;;  %3500 = vmatmul.msk.bf16.gmra.mxu1 %vm323_vm3, %v1550_v21  ;;  %3504 = vmatmul.msk.bf16.gmra.mxu3 %vm323_vm3, %v1773_v33 }
 0x515   :  { %v2162_v38 = vsub.f32 %v5037_v17, %v2148_v43 }
 0x516   :  { %v2176_v28 = vmul.f32 1.442695, %v2163_v55  ;;  %v1692_v51 = vpop.xlane.xlu2 %1691 }
 0x517   :  { %v3820_v2 = vpop.eup %3819  ;;  %v2174_v32 = vmul.f32 1.442695, %v2162_v38  ;;  %v1704_v9 = vsub.f32 %v5041_v47, %v1692_v51 }
 0x518   :  { %3823 = vpow2.f32 %v2176_v28  ;;  %v1963_v52 = vsel %vm323_vm3, %v3820_v2, 0.0  ;;  %v2001_v45 = vpack.c.bf16 %v3820_v2, %v3812_v11  ;;  %v3822_v30 = vpop.eup %3821 }
 0x519   :  { %3825 = vpow2.f32 %v2174_v32  ;;  %1964 = vadd.xlane.f32.xlu0 %v1963_v52  ;;  %v1717_v17 = vmul.f32 1.442695, %v1704_v9  ;;  %v1735_v3 = vsel %vm323_vm3, %v3822_v30, 0.0 }
 0x51a   :  { %3827 = vpow2.f32 %v1484_v34 }
 0x51b   :  { %3829 = vpow2.f32 %v1717_v17  ;;  %1502 = vadd.xlane.f32.xlu2 %v1501_v56  ;;  %1733 = vadd.xlane.f32.xlu1 %v1732_v5 }
 0x51c   :  { %v1461_v54 = vpop.xlane.xlu1 %1460  ;;  %3508 = vmatmul.msk.bf16.gmra.mxu0 %vm323_vm3, %v2001_v45 }
 0x51d   :  { %v1473_v47 = vsub.f32 %v5048_v4, %v1461_v54 }
 0x51e   :  { %v3824_v18 = vpop.eup %3823  ;;  %v1923_v20 = vpop.xlane.xlu2 %1922 }
 0x51f   :  { %v3826_v50 = vpop.eup %3825  ;;  %v1486_v37 = vmul.f32 1.442695, %v1473_v47  ;;  %v1935_v36 = vsub.f32 %v5052_v1, %v1923_v20  ;;  %v2197_v21 = vsel %vm323_vm3, %v3824_v18, 0.0  ;;  %v2315_v20 = vld [vmem:[%s5751_s12 + $0x30] sm:$0xff] }
 0x520   :  { %v3828_v16 = vpop.eup %3827  ;;  %v2230_v19 = vpack.c.bf16 %v3824_v18, %v3826_v50  ;;  %v2194_v24 = vsel %vm323_vm3, %v3826_v50, 0.0 }
 0x521   :  { %3831 = vpow2.f32 %v1486_v37  ;;  %1736 = vadd.xlane.f32.xlu0 %v1735_v3  ;;  %v3830_v41 = vpop.eup %3829  ;;  %v1948_v0 = vmul.f32 1.442695, %v1935_v36  ;;  %v1504_v60 = vsel %vm323_vm3, %v3828_v16, 0.0 }
 0x522   :  { %3833 = vpow2.f32 %v1946_v27  ;;  %3513 = vmatmul.msk.bf16.gmra.mxu2 %vm323_vm3, %v2230_v19  ;;  %v1774_v15 = vpack.c.bf16 %v3830_v41, %v3822_v30  ;;  %v1738_v43 = vsel %vm323_vm3, %v3830_v41, 0.0 }
 0x523   :  { %v1464_v4 = vpop.xlane.xlu0 %1463  ;;  %3835 = vpow2.f32 %v1948_v0  ;;  %1505 = vadd.xlane.f32.xlu1 %v1504_v60  ;;  %2192 = vadd.xlane.f32.xlu2 %v2191_v53  ;;  %v2314_v0 = vld [vmem:[%s5751_s12 + $0x28] sm:$0xff]  ;;  %v2313_v60 = vld [vmem:[%s5751_s12 + $0x20] sm:$0xff]  ;;  %v2312_v53 = vld [vmem:[%s5751_s12 + $0x18] sm:$0xff] }
 0x524   :  { %v1695_v57 = vpop.xlane.xlu1 %1694  ;;  %3505 = vmatmul.msk.bf16.gmra.mxu3 %vm323_vm3, %v1774_v15  ;;  %v1474_v25 = vsub.f32 %v5065_v35, %v1464_v4  ;;  %v2311_v15 = vld [vmem:[%s5751_s12 + $0x10] sm:$0xff] }
 0x525   :  { %v1705_v8 = vsub.f32 %v5062_v62, %v1695_v57 }
 0x526   :  { %v2154_v11 = vpop.xlane.xlu2 %2153  ;;  %v1488_v12 = vmul.f32 1.442695, %v1474_v25  ;;  %v2309_v25 = vld [vmem:[%s5751_s12] sm:$0xff] }
 0x527   :  { %v3832_v1 = vpop.eup %3831  ;;  %v1719_v7 = vmul.f32 1.442695, %v1705_v8  ;;  %v2164_v33 = vsub.f32 %v5069_v22, %v2154_v11 }
 0x528   :  { %v3834_v31 = vpop.eup %3833  ;;  %v1507_v42 = vsel %vm323_vm3, %v3832_v1, 0.0  ;;  %v1551_v61 = vpack.c.bf16 %v3832_v1, %v3828_v16 }
 0x529   :  { %1508 = vadd.xlane.f32.xlu0 %v1507_v42  ;;  %v3836_v46 = vpop.eup %3835  ;;  %v1966_v40 = vsel %vm323_vm3, %v3834_v31, 0.0  ;;  %3837 = vpow2.f32 %v1719_v7  ;;  %v2178_v34 = vmul.f32 1.442695, %v2164_v33 }
 0x52a   :  { %3501 = vmatmul.msk.bf16.gmra.mxu1 %vm323_vm3, %v1551_v61  ;;  %v2002_v49 = vpack.c.bf16 %v3836_v46, %v3834_v31  ;;  %v2310_v31 = vld [vmem:[%s5751_s12 + $0x8] sm:$0xff] }
 0x52b   :  { %v1698_v14 = vpop.xlane.xlu0 %1697  ;;  %2195 = vadd.xlane.f32.xlu1 %v2194_v24  ;;  %1967 = vadd.xlane.f32.xlu2 %v1966_v40 }
 0x52c   :  { %v1706_v62 = vsub.f32 %v5079_v29, %v1698_v14  ;;  %3509 = vmatmul.msk.bf16.gmra.mxu0 %vm323_vm3, %v2002_v49  ;;  %v1969_v29 = vsel %vm323_vm3, %v3836_v46, 0.0 }
 0x52e   :  { %v1721_v48 = vmul.f32 1.442695, %v1706_v62  ;;  %v1467_v10 = vpop.xlane.xlu2 %1466 }
 0x52f   :  { %v1475_v35 = vsub.f32 %v5083_v6, %v1467_v10  ;;  %v3838_v38 = vpop.eup %3837 }
 0x530   :  { %3839 = vpow2.f32 %v1721_v48  ;;  %v1741_v17 = vsel %vm323_vm3, %v3838_v38, 0.0 }
 0x531   :  { %2198 = vadd.xlane.f32.xlu0 %v2197_v21  ;;  %3841 = vpow2.f32 %v1488_v12  ;;  %v1490_v55 = vmul.f32 1.442695, %v1475_v35 }
 0x533   :  { %3843 = vpow2.f32 %v1490_v55  ;;  %1970 = vadd.xlane.f32.xlu1 %v1969_v29  ;;  %1739 = vadd.xlane.f32.xlu2 %v1738_v43  ;;  %v1929_v32 = vpop.xlane.xlu0 %1928 }
 0x534   :  { %3845 = vpow2.f32 %v2178_v34  ;;  %v1937_v52 = vsub.f32 %v5089_v44, %v1929_v32 }
 0x535   :  { %v2157_v28 = vpop.xlane.xlu1 %2156 }
 0x536   :  { %v3840_v2 = vpop.eup %3839  ;;  %v2165_v6 = vsub.f32 %v5093_v13, %v2157_v28  ;;  %v2316_v13 = vld [vmem:[%s5751_s12 + $0x38] sm:$0xff]  ;;  %v1952_v45 = vmul.f32 1.442695, %v1937_v52 }
 0x537   :  { %v1775_v51 = vpack.c.bf16 %v3840_v2, %v3838_v38  ;;  %v3842_v9 = vpop.eup %3841  ;;  %2349 = vmatpush.msrb.mxu1 %v2316_v13  ;;  %v1744_v4 = vsel %vm323_vm3, %v3840_v2, 0.0 }
 0x538   :  { %v2180_v22 = vmul.f32 1.442695, %v2165_v6  ;;  %v1510_v56 = vsel %vm323_vm3, %v3842_v9, 0.0 }
 0x539   :  { %3506 = vmatmul.msk.bf16.gmra.mxu3 %vm323_vm3, %v1775_v51  ;;  %v3844_v26 = vpop.eup %3843  ;;  %2350 = vmatpush.msrb.mxu1 %v2315_v20  ;;  %v5220_v51 = vld [vmem:[%s5750_s11] ss:$0 sm:$0xff] }
 0x53a   :  { %3847 = vpow2.f32 %v2180_v22  ;;  %v1552_v5 = vpack.c.bf16 %v3844_v26, %v3842_v9  ;;  %v3846_v30 = vpop.eup %3845  ;;  %v1513_v50 = vsel %vm323_vm3, %v3844_v26, 0.0 }
 0x53b   :  { %1742 = vadd.xlane.f32.xlu1 %v1741_v17  ;;  %1511 = vadd.xlane.f32.xlu2 %v1510_v56  ;;  %3849 = vpow2.f32 %v1952_v45  ;;  %v2200_v37 = vsel %vm323_vm3, %v3846_v30, 0.0 }
 0x53c   :  { %3502 = vmatmul.msk.bf16.gmra.mxu1 %vm323_vm3, %v1552_v5 }
 0x53d   :  { %v1926_v54 = vpop.xlane.xlu1 %1925  ;;  %2351 = vmatpush.msrb.mxu1 %v2314_v0 }
 0x53e   :  { %v1936_v44 = vsub.f32 %v5097_v23, %v1926_v54 }
 0x53f   :  { %2352 = vmatpush.msrb.mxu1 %v2313_v60 }
 0x540   :  { %v3848_v47 = vpop.eup %3847  ;;  %v1950_v18 = vmul.f32 1.442695, %v1936_v44 }
 0x541   :  { %v2231_v27 = vpack.c.bf16 %v3848_v47, %v3846_v30  ;;  %v3850_v23 = vpop.eup %3849  ;;  %v2203_v19 = vsel %vm323_vm3, %v3848_v47, 0.0  ;;  %2353 = vmatpush.msrb.mxu1 %v2312_v53 }
 0x542   :  { %3851 = vpow2.f32 %v1950_v18  ;;  %v1975_v41 = vsel %vm323_vm3, %v3850_v23, 0.0 }
 0x543   :  { %3514 = vmatmul.msk.bf16.gmra.mxu2 %vm323_vm3, %v2231_v27  ;;  %1514 = vadd.xlane.f32.xlu1 %v1513_v50 }
 0x544   :  { %2201 = vadd.xlane.f32.xlu2 %v2200_v37  ;;  %2354 = vmatpush.msrb.mxu1 %v2311_v15 }
 0x546   :  { %2355 = vmatpush.msrb.mxu1 %v2310_v31 }
 0x548   :  { %v3852_v16 = vpop.eup %3851  ;;  %2356 = vmatpush.msrb.mxu1 %v2309_v25 }
 0x549   :  { %v1972_v36 = vsel %vm323_vm3, %v3852_v16, 0.0  ;;  %v2003_v3 = vpack.c.bf16 %v3850_v23, %v3852_v16 }
 0x54a   :  { %1973 = vadd.xlane.f32.xlu0 %v1972_v36 }
 0x54b   :  { %3510 = vmatmul.msk.bf16.gmra.mxu0 %vm323_vm3, %v2003_v3  ;;  %2204 = vadd.xlane.f32.xlu1 %v2203_v19 }
 0x54c   :  { %1976 = vadd.xlane.f32.xlu2 %v1975_v41 }
 0x552   :  { %1745 = vadd.xlane.f32.xlu0 %v1744_v4 }
 0x553   :  { %v1956_v57 = vpop.xlane.xlu0 %1955 }
 0x55b   :  { %v1728_v11 = vpop.xlane.xlu0 %1727 }
 0x564   :  { %v1494_v1 = vpop.xlane.xlu2 %1493 }
 0x565   :  { %3853 = vrcp.f32 %v1494_v1 }
 0x56b   :  { %v1500_v46 = vpop.xlane.xlu0 %1499  ;;  %v3854_v12 = vpop.eup %3853 }
 0x56c   :  { %v1725_v8 = vpop.xlane.xlu1 %1724 }
 0x56d   :  { %3855 = vrcp.f32 %v1725_v8 }
 0x56e   :  { %v2184_v42 = vpop.xlane.xlu2 %2183  ;;  %3857 = vrcp.f32 %v1956_v57 }
 0x56f   :  { %3859 = vrcp.f32 %v2184_v42 }
 0x573   :  { %v2190_v40 = vpop.xlane.xlu0 %2189  ;;  %v3856_v21 = vpop.eup %3855 }
 0x574   :  { %v3858_v55 = vpop.eup %3857 }
 0x575   :  { %v3860_v28 = vpop.eup %3859 }
 0x576   :  { %v1497_v61 = vpop.xlane.xlu1 %1496 }
 0x577   :  { %3861 = vrcp.f32 %v1497_v61 }
 0x578   :  { %3863 = vrcp.f32 %v1728_v11 }
 0x57d   :  { %v1797_v49 = vpop.f32.mrf.mxu3  ;;  %v3862_v22 = vpop.eup %3861 }
 0x57e   :  { %v2187_v7 = vpop.xlane.xlu1 %2186  ;;  %v1959_v14 = vpop.xlane.xlu2 %1958  ;;  %v1817_v33 = vmul.f32 %v3856_v21, %v1797_v49 }
 0x57f   :  { %3865 = vrcp.f32 %v1959_v14  ;;  %v3864_v13 = vpop.eup %3863 }
 0x580   :  { %3867 = vrcp.f32 %v2187_v7 }
 0x581   :  { %v1574_v24 = vpop.f32.mrf.mxu1  ;;  %3869 = vrcp.f32 %v1500_v46 }
 0x582   :  { %v1594_v48 = vmul.f32 %v3854_v12, %v1574_v24 }
 0x584   :  { %v1825_v38 = vadd.f32 %v1817_v33, %v1594_v48 }
 0x585   :  { %v2253_v62 = vpop.f32.mrf.mxu2  ;;  %v1799_v52 = vpop.f32.mrf.mxu3 }
 0x586   :  { %v1731_v10 = vpop.xlane.xlu2 %1730  ;;  %v1962_v35 = vpop.xlane.xlu1 %1961  ;;  %v2273_v32 = vmul.f32 %v3860_v28, %v2253_v62  ;;  %v1818_v45 = vmul.f32 %v3864_v13, %v1799_v52 }
 0x587   :  { %v3866_v44 = vpop.eup %3865  ;;  %3871 = vrcp.f32 %v1731_v10 }
 0x588   :  { %v3868_v50 = vpop.eup %3867  ;;  %3873 = vrcp.f32 %v1962_v35 }
 0x589   :  { %v1576_v29 = vpop.f32.mrf.mxu1  ;;  %v2025_v43 = vpop.f32.mrf.mxu0  ;;  %3875 = vrcp.f32 %v2190_v40 }
 0x58a   :  { %v2045_v34 = vmul.f32 %v3858_v55, %v2025_v43  ;;  %v1595_v26 = vmul.f32 %v3862_v22, %v1576_v29  ;;  %v3870_v3 = vpop.eup %3869 }
 0x58c   :  { %v1965_v2 = vpop.xlane.xlu0 %1964  ;;  %v2053_v6 = vadd.f32 %v2045_v34, %v1825_v38  ;;  %v1826_v47 = vadd.f32 %v1818_v45, %v1595_v26 }
 0x58d   :  { %v2255_v9 = vpop.f32.mrf.mxu2  ;;  %v3872_v4 = vpop.eup %3871 }
 0x58e   :  { %v2281_v17 = vadd.f32 %v2273_v32, %v2053_v6  ;;  %v1503_v56 = vpop.xlane.xlu2 %1502  ;;  %v1734_v5 = vpop.xlane.xlu1 %1733  ;;  %v2274_v20 = vmul.f32 %v3868_v50, %v2255_v9 }
 0x58f   :  { %3877 = vrcp.f32 %v1503_v56  ;;  %v3874_v1 = vpop.eup %3873 }
 0x590   :  { %v2293_v54 = vadd.f32 %v5220_v51, %v2281_v17  ;;  %3879 = vrcp.f32 %v1734_v5  ;;  %v3876_v61 = vpop.eup %3875 }
 0x591   :  { %v2027_v30 = vpop.f32.mrf.mxu0  ;;  %v1579_v37 = vpop.f32.mrf.mxu1  ;;  %3881 = vrcp.f32 %v1965_v2 }
 0x592   :  { %v2301_v18 = vmax.f32 %v2293_v54, 0.0  ;;  %v2046_v27 = vmul.f32 %v3866_v44, %v2027_v30  ;;  %v1596_v53 = vmul.f32 %v3870_v3, %v1579_v37 }
 0x594   :  { %v2054_v23 = vadd.f32 %v2046_v27, %v1826_v47  ;;  %3515 = vmatmul.msk.f32.vlgmr.msrb.gmra.mxu1 %vm323_vm3, %v2301_v18  ;;  %v1737_v36 = vpop.xlane.xlu0 %1736 }
 0x595   :  { %v2258_v16 = vpop.f32.mrf.mxu2  ;;  %v3878_v24 = vpop.eup %3877 }
 0x596   :  { %v2282_v19 = vadd.f32 %v2274_v20, %v2054_v23  ;;  %v1506_v41 = vpop.xlane.xlu1 %1505  ;;  %v2193_v0 = vpop.xlane.xlu2 %2192  ;;  %v2275_v46 = vmul.f32 %v3876_v61, %v2258_v16 }
 0x597   :  { %v1802_v60 = vpop.f32.mrf.mxu3  ;;  %3883 = vrcp.f32 %v2193_v0  ;;  %v3880_v12 = vpop.eup %3879 }
 0x598   :  { %v2294_v15 = vadd.f32 %v5220_v51, %v2282_v19  ;;  %v1819_v57 = vmul.f32 %v3872_v4, %v1802_v60  ;;  %v3882_v10 = vpop.eup %3881  ;;  %3885 = vrcp.f32 %v1506_v41 }
 0x599   :  { %v2030_v8 = vpop.f32.mrf.mxu0  ;;  %v1581_v14 = vpop.f32.mrf.mxu1  ;;  %3887 = vrcp.f32 %v1737_v36 }
 0x59a   :  { %v2302_v11 = vmax.f32 %v2294_v15, 0.0  ;;  %v1827_v31 = vadd.f32 %v1819_v57, %v1596_v53  ;;  %v2047_v42 = vmul.f32 %v3874_v1, %v2030_v8  ;;  %v1597_v35 = vmul.f32 %v3878_v24, %v1581_v14 }
 0x59c   :  { %v2055_v25 = vadd.f32 %v2047_v42, %v1827_v31  ;;  %3516 = vmatmul.msk.f32.gmra.mxu1 %vm323_vm3, %v2302_v11  ;;  %v1509_v33 = vpop.xlane.xlu0 %1508 }
 0x59d   :  { %v2260_v7 = vpop.f32.mrf.mxu2  ;;  %v3884_v29 = vpop.eup %3883 }
 0x59e   :  { %v2283_v40 = vadd.f32 %v2275_v46, %v2055_v25  ;;  %v2196_v49 = vpop.xlane.xlu1 %2195  ;;  %v1968_v62 = vpop.xlane.xlu2 %1967  ;;  %v2276_v2 = vmul.f32 %v3884_v29, %v2260_v7 }
 0x59f   :  { %v1804_v48 = vpop.f32.mrf.mxu3  ;;  %3889 = vrcp.f32 %v2196_v49  ;;  %v3886_v6 = vpop.eup %3885  ;;  %v2382_v49 = vld [vmem:[%s5752_s13] sm:$0xff] }
 0x5a0   :  { %v2295_v21 = vadd.f32 %v5220_v51, %v2283_v40  ;;  %v1820_v55 = vmul.f32 %v3880_v12, %v1804_v48  ;;  %3891 = vrcp.f32 %v1968_v62  ;;  %v3888_v26 = vpop.eup %3887  ;;  %v2383_v40 = vld [vmem:[%s5752_s13 + $0x8] sm:$0xff] }
 0x5a1   :  { %v2032_v43 = vpop.f32.mrf.mxu0  ;;  %3893 = vrcp.f32 %v1509_v33  ;;  %2422 = vmatpush.msrb.mxu3 %v2383_v40 }
 0x5a2   :  { %v2303_v38 = vmax.f32 %v2295_v21, 0.0  ;;  %v1828_v34 = vadd.f32 %v1820_v55, %v1597_v35  ;;  %v2048_v28 = vmul.f32 %v3882_v10, %v2032_v43 }
 0x5a3   :  { %2423 = vmatpush.msrb.mxu3 %v2382_v49 }
 0x5a4   :  { %v2056_v32 = vadd.f32 %v2048_v28, %v1828_v34  ;;  %3517 = vmatmul.msk.f32.gmra.mxu1 %vm323_vm3, %v2303_v38  ;;  %v2199_v27 = vpop.xlane.xlu0 %2198 }
 0x5a5   :  { %v2263_v22 = vpop.f32.mrf.mxu2  ;;  %v3890_v13 = vpop.eup %3889 }
 0x5a6   :  { %v2284_v9 = vadd.f32 %v2276_v2, %v2056_v32  ;;  %v1740_v56 = vpop.xlane.xlu2 %1739  ;;  %v1971_v54 = vpop.xlane.xlu1 %1970  ;;  %v2277_v20 = vmul.f32 %v3890_v13, %v2263_v22 }
 0x5a7   :  { %v1584_v52 = vpop.f32.mrf.mxu1  ;;  %v1807_v5 = vpop.f32.mrf.mxu3  ;;  %3895 = vrcp.f32 %v1740_v56 }
 0x5a8   :  { %v1598_v17 = vmul.f32 %v3886_v6, %v1584_v52  ;;  %v2296_v45 = vadd.f32 %v5220_v51, %v2284_v9  ;;  %v1821_v44 = vmul.f32 %v3888_v26, %v1807_v5  ;;  %v3892_v30 = vpop.eup %3891  ;;  %3897 = vrcp.f32 %v1971_v54 }
 0x5a9   :  { %v2035_v47 = vpop.f32.mrf.mxu0  ;;  %3899 = vrcp.f32 %v2199_v27  ;;  %v3894_v16 = vpop.eup %3893 }
 0x5aa   :  { %v2304_v18 = vmax.f32 %v2296_v45, 0.0  ;;  %v1829_v50 = vadd.f32 %v1821_v44, %v1598_v17  ;;  %v2049_v37 = vmul.f32 %v3892_v30, %v2035_v47 }
 0x5ac   :  { %v2057_v23 = vadd.f32 %v2049_v37, %v1829_v50  ;;  %3518 = vmatmul.msk.f32.gmra.mxu1 %vm323_vm3, %v2304_v18 }
 0x5ad   :  { %v3896_v19 = vpop.eup %3895  ;;  %v2265_v15 = vpop.f32.mrf.mxu2 }
 0x5ae   :  { %v2285_v36 = vadd.f32 %v2277_v20, %v2057_v23  ;;  %v3898_v53 = vpop.eup %3897  ;;  %v1512_v8 = vpop.xlane.xlu2 %1511 }
 0x5af   :  { %v1586_v3 = vpop.f32.mrf.mxu1  ;;  %v1809_v0 = vpop.f32.mrf.mxu3 }
 0x5b0   :  { %v1599_v41 = vmul.f32 %v3894_v16, %v1586_v3  ;;  %v2297_v4 = vadd.f32 %v5220_v51, %v2285_v36  ;;  %v1822_v60 = vmul.f32 %v3896_v19, %v1809_v0  ;;  %v3900_v42 = vpop.eup %3899  ;;  %v1743_v46 = vpop.xlane.xlu1 %1742 }
 0x5b1   :  { %v2037_v57 = vpop.f32.mrf.mxu0  ;;  %v2278_v61 = vmul.f32 %v3900_v42, %v2265_v15  ;;  %3901 = vrcp.f32 %v1743_v46 }
 0x5b2   :  { %v2305_v1 = vmax.f32 %v2297_v4, 0.0  ;;  %v1830_v11 = vadd.f32 %v1822_v60, %v1599_v41  ;;  %v2050_v31 = vmul.f32 %v3898_v53, %v2037_v57  ;;  %3903 = vrcp.f32 %v1512_v8  ;;  %v2481_v57 = vld [vmem:[%s5753_s15] sm:$0xf] }
 0x5b4   :  { %v2058_v25 = vadd.f32 %v2050_v31, %v1830_v11  ;;  %3519 = vmatmul.msk.f32.gmra.mxu1 %vm323_vm3, %v2305_v1  ;;  %v2482_v1 = vpack.c.bf16 %v2481_v57, %v2481_v57 }
 0x5b6   :  { %v2286_v7 = vadd.f32 %v2278_v61, %v2058_v25  ;;  %v2875_v8 = vshrl.u32 %v2482_v1, 16  ;;  %v5269_v42 = vpack.i.b16 %v2482_v1, %v2482_v1 }
 0x5b7   :  { %v2202_v62 = vpop.xlane.xlu2 %2201  ;;  %v3902_v21 = vpop.eup %3901 }
 0x5b8   :  { %v2298_v14 = vadd.f32 %v5220_v51, %v2286_v7  ;;  %v1515_v48 = vpop.xlane.xlu1 %1514  ;;  %v3904_v29 = vpop.eup %3903  ;;  %v2876_v31 = vpack.i.b16 %v2875_v8, %v2875_v8  ;;  %v3106_v25 = vperm.slane %v5269_v42, 1 }
 0x5b9   :  { %v1589_v10 = vpop.f32.mrf.mxu1 }
 0x5ba   :  { %v2306_v24 = vmax.f32 %v2298_v14, 0.0  ;;  %v1600_v38 = vmul.f32 %v3904_v29, %v1589_v10  ;;  %v2878_v46 = vperm.slane %v2876_v31, 0  ;;  %v3334_v14 = vperm.slane %v2876_v31, 1 }
 0x5bb   :  { %v3107_v10 = vunpack.c.l.bf16 %v3106_v25 }
 0x5bc   :  { %3520 = vmatmul.msk.f32.gmra.mxu1 %vm323_vm3, %v2306_v24  ;;  %v1812_v35 = vpop.f32.mrf.mxu3 }
 0x5bd   :  { %v1974_v12 = vpop.xlane.xlu0 %1973  ;;  %v1823_v33 = vmul.f32 %v3902_v21, %v1812_v35 }
 0x5be   :  { %3905 = vrcp.f32 %v1974_v12 }
 0x5bf   :  { %3907 = vrcp.f32 %v2202_v62  ;;  %v1977_v34 = vpop.xlane.xlu2 %1976  ;;  %v1831_v32 = vadd.f32 %v1823_v33, %v1600_v38  ;;  %v3335_v33 = vunpack.c.l.bf16 %v3334_v14 }
 0x5c0   :  { %v2205_v6 = vpop.xlane.xlu1 %2204 }
 0x5c1   :  { %v1591_v56 = vpop.f32.mrf.mxu1 }
 0x5c4   :  { %v3906_v28 = vpop.eup %3905  ;;  %v1814_v5 = vpop.f32.mrf.mxu3 }
 0x5c5   :  { %v1746_v55 = vpop.xlane.xlu0 %1745  ;;  %v3908_v22 = vpop.eup %3907 }
 0x5c6   :  { %3909 = vrcp.f32 %v1746_v55  ;;  %v2268_v43 = vpop.f32.mrf.mxu2 }
 0x5c7   :  { %3911 = vrcp.f32 %v1515_v48  ;;  %v2279_v52 = vmul.f32 %v3908_v22, %v2268_v43  ;;  %v2879_v48 = vunpack.c.l.bf16 %v2878_v46  ;;  %v2647_v46 = vperm.slane %v5269_v42, 0 }
 0x5c8   :  { %v2040_v2 = vpop.f32.mrf.mxu0  ;;  %3913 = vrcp.f32 %v1977_v34 }
 0x5c9   :  { %v2051_v9 = vmul.f32 %v3906_v28, %v2040_v2  ;;  %3915 = vrcp.f32 %v2205_v6 }
 0x5cb   :  { %v2059_v26 = vadd.f32 %v2051_v9, %v1831_v32 }
 0x5cc   :  { %v3910_v17 = vpop.eup %3909 }
 0x5cd   :  { %v2287_v13 = vadd.f32 %v2279_v52, %v2059_v26  ;;  %v1824_v45 = vmul.f32 %v3910_v17, %v1814_v5  ;;  %v3912_v54 = vpop.eup %3911 }
 0x5ce   :  { %v1601_v44 = vmul.f32 %v3912_v54, %v1591_v56  ;;  %v3914_v47 = vpop.eup %3913  ;;  %v2270_v18 = vpop.f32.mrf.mxu2 }
 0x5cf   :  { %v2299_v30 = vadd.f32 %v5220_v51, %v2287_v13  ;;  %v3916_v23 = vpop.eup %3915 }
 0x5d0   :  { %v2042_v27 = vpop.f32.mrf.mxu0  ;;  %v1832_v37 = vadd.f32 %v1824_v45, %v1601_v44  ;;  %v2280_v16 = vmul.f32 %v3916_v23, %v2270_v18 }
 0x5d1   :  { %v2307_v50 = vmax.f32 %v2299_v30, 0.0  ;;  %v2052_v20 = vmul.f32 %v3914_v47, %v2042_v27 }
 0x5d3   :  { %v2060_v36 = vadd.f32 %v2052_v20, %v1832_v37  ;;  %3521 = vmatmul.msk.f32.gmra.mxu1 %vm323_vm3, %v2307_v50 }
 0x5d5   :  { %v2288_v3 = vadd.f32 %v2280_v16, %v2060_v36 }
 0x5d7   :  { %v2300_v19 = vadd.f32 %v5220_v51, %v2288_v3 }
 0x5d9   :  { %v2308_v41 = vmax.f32 %v2300_v19, 0.0 }
 0x5db   :  { %3522 = vmatmul.msk.f32.gmra.mxu1 %vm323_vm3, %v2308_v41 }
 0x611   :  { %v5244_v0 = vpop.f32.mrf.mxu1 }
 0x612   :  { %3523 = vmatmul.msk.f32.vlgmr.msrb.gmra.mxu3 %vm75_vm0, %v5244_v0  ;;  %v2473_v13 = vpack.c.bf16 %v5244_v0, %v5244_v0 }
 0x614   :  { %v2648_v16 = vunpack.c.l.bf16 %v2473_v13 }
 0x616   :  { %v2880_v31 = vmul.f32 %v2879_v48, %v2648_v16 }
 0x619   :  { %v5248_v4 = vpop.f32.mrf.mxu1 }
 0x61a   :  { %3524 = vmatmul.msk.f32.gmra.mxu3 %vm75_vm0, %v5248_v4  ;;  %v2474_v6 = vpack.c.bf16 %v5248_v4, %v5248_v4 }
 0x61c   :  { %v2649_v47 = vunpack.c.l.bf16 %v2474_v6 }
 0x61e   :  { %v3109_v8 = vmul.f32 %v3107_v10, %v2649_v47 }
 0x621   :  { %v5252_v60 = vpop.f32.mrf.mxu1 }
 0x622   :  { %3525 = vmatmul.msk.f32.gmra.mxu3 %vm75_vm0, %v5252_v60  ;;  %v2475_v55 = vpack.c.bf16 %v5252_v60, %v5252_v60 }
 0x624   :  { %v2650_v45 = vunpack.c.l.bf16 %v2475_v55 }
 0x626   :  { %v2882_v36 = vmul.f32 %v2879_v48, %v2650_v45  ;;  %v3110_v3 = vmul.f32 %v3107_v10, %v2650_v45  ;;  %v3338_v19 = vmul.f32 %v3335_v33, %v2650_v45 }
 0x629   :  { %v5256_v53 = vpop.f32.mrf.mxu1 }
 0x62a   :  { %3526 = vmatmul.msk.f32.gmra.mxu3 %vm75_vm0, %v5256_v53  ;;  %v2476_v12 = vpack.c.bf16 %v5256_v53, %v5256_v53 }
 0x62c   :  { %v5297_v9 = vunpack.c.l.bf16 %v2476_v12 }
 0x62e   :  { %v2883_v27 = vmul.f32 %v2879_v48, %v5297_v9  ;;  %v3111_v20 = vmul.f32 %v3107_v10, %v5297_v9  ;;  %v3339_v23 = vmul.f32 %v3335_v33, %v5297_v9 }
 0x630   :  { %v2889_v41 = vpack.c.bf16 %v2883_v27, %v2882_v36  ;;  %v3117_v57 = vpack.c.bf16 %v3111_v20, %v3110_v3  ;;  %v3345_v1 = vpack.c.bf16 %v3339_v23, %v3338_v19 }
 0x631   :  { %v5260_v51 = vpop.f32.mrf.mxu1 }
 0x632   :  { %3527 = vmatmul.msk.f32.gmra.mxu3 %vm75_vm0, %v5260_v51  ;;  %v2477_v24 = vpack.c.bf16 %v5260_v51, %v5260_v51 }
 0x634   :  { %v5286_v29 = vunpack.c.l.bf16 %v2477_v24  ;;  %v2656_v24 = vunpack.c.l.bf16 %v2647_v46 }
 0x636   :  { %v2884_v54 = vmul.f32 %v2879_v48, %v5286_v29  ;;  %v3112_v44 = vmul.f32 %v3107_v10, %v5286_v29  ;;  %v3340_v30 = vmul.f32 %v3335_v33, %v5286_v29  ;;  %v2661_v12 = vmul.f32 %v2656_v24, %v5286_v29 }
 0x639   :  { %v2373_v15 = vpop.f32.mrf.mxu1 }
 0x63a   :  { %3528 = vmatmul.msk.f32.gmra.mxu3 %vm75_vm0, %v2373_v15  ;;  %v2478_v7 = vpack.c.bf16 %v2373_v15, %v2373_v15 }
 0x63c   :  { %v5280_v35 = vunpack.c.l.bf16 %v2478_v7 }
 0x63e   :  { %v2885_v17 = vmul.f32 %v2879_v48, %v5280_v35  ;;  %v3113_v56 = vmul.f32 %v3107_v10, %v5280_v35  ;;  %v3341_v5 = vmul.f32 %v3335_v33, %v5280_v35  ;;  %v2662_v42 = vmul.f32 %v2656_v24, %v5280_v35 }
 0x63f   :  { %v2657_v35 = vmul.f32 %v2656_v24, %v2648_v16 }
 0x640   :  { %v2890_v18 = vpack.c.bf16 %v2885_v17, %v2884_v54  ;;  %v3118_v50 = vpack.c.bf16 %v3113_v56, %v3112_v44  ;;  %v3346_v37 = vpack.c.bf16 %v3341_v5, %v3340_v30 }
 0x650   :  { %v2376_v11 = vpop.f32.mrf.mxu1 }
 0x651   :  { %3529 = vmatmul.msk.f32.gmra.mxu3 %vm75_vm0, %v2376_v11  ;;  %v2479_v61 = vpack.c.bf16 %v2376_v11, %v2376_v11 }
 0x653   :  { %v5274_v40 = vunpack.c.l.bf16 %v2479_v61  ;;  %v3336_v61 = vmul.f32 %v3335_v33, %v2648_v16 }
 0x655   :  { %v2886_v43 = vmul.f32 %v2879_v48, %v5274_v40  ;;  %v3114_v38 = vmul.f32 %v3107_v10, %v5274_v40  ;;  %v3342_v2 = vmul.f32 %v3335_v33, %v5274_v40 }
 0x658   :  { %v2379_v49 = vpop.f32.mrf.mxu1 }
 0x659   :  { %v2480_v62 = vpack.c.bf16 %v2379_v49, %v2379_v49  ;;  %3530 = vmatmul.msk.f32.gmra.mxu3 %vm75_vm0, %v2379_v49  ;;  %3531 = vmatpush.xpose.msk.msrb.mxu0 %vm75_vm0, %v2379_v49  ;;  %v2663_v49 = vmul.f32 %v2656_v24, %v5274_v40  ;;  %v2659_v40 = vmul.f32 %v2656_v24, %v2650_v45 }
 0x65b   :  { %v5282_v21 = vunpack.c.l.bf16 %v2480_v62 }
 0x65d   :  { %3532 = vmatpush.xpose.msk.msrb.mxu0 %vm75_vm0, %v2376_v11  ;;  %v2887_v34 = vmul.f32 %v2879_v48, %v5282_v21  ;;  %v3115_v28 = vmul.f32 %v3107_v10, %v5282_v21  ;;  %v3343_v32 = vmul.f32 %v3335_v33, %v5282_v21  ;;  %v3337_v11 = vmul.f32 %v3335_v33, %v2649_v47 }
 0x65f   :  { %v2891_v22 = vpack.c.bf16 %v2887_v34, %v2886_v43  ;;  %v3119_v52 = vpack.c.bf16 %v3115_v28, %v3114_v38  ;;  %v3347_v26 = vpack.c.bf16 %v3343_v32, %v3342_v2  ;;  %v3344_v14 = vpack.c.bf16 %v3337_v11, %v3336_v61 }
 0x661   :  { %3533 = vmatpush.xpose.msk.msrb.mxu0 %vm75_vm0, %v2373_v15  ;;  %2912 = vmatpush.bf16.msra.mxu2 %v2891_v22  ;;  %v2881_v15 = vmul.f32 %v2879_v48, %v2649_v47  ;;  %v2667_v48 = vpack.c.bf16 %v2662_v42, %v2661_v12 }
 0x662   :  { %3140 = vmatpush.bf16.msra.mxu1 %v3119_v52  ;;  %3368 = vmatpush.bf16.msra.mxu3 %v3347_v26 }
 0x663   :  { %v2888_v25 = vpack.c.bf16 %v2881_v15, %v2880_v31 }
 0x665   :  { %3534 = vmatpush.xpose.msk.msrb.mxu0 %vm75_vm0, %v5260_v51  ;;  %2913 = vmatpush.bf16.msra.mxu2 %v2890_v18  ;;  %v3108_v51 = vmul.f32 %v3107_v10, %v2648_v16 }
 0x666   :  { %3141 = vmatpush.bf16.msra.mxu1 %v3118_v50  ;;  %3369 = vmatpush.bf16.msra.mxu3 %v3346_v37 }
 0x667   :  { %v3116_v7 = vpack.c.bf16 %v3109_v8, %v3108_v51 }
 0x669   :  { %3535 = vmatpush.xpose.msk.msrb.mxu0 %vm75_vm0, %v5256_v53  ;;  %2914 = vmatpush.bf16.msra.mxu2 %v2889_v41  ;;  %v2664_v53 = vmul.f32 %v2656_v24, %v5282_v21  ;;  %v2658_v21 = vmul.f32 %v2656_v24, %v2649_v47 }
 0x66a   :  { %3142 = vmatpush.bf16.msra.mxu1 %v3117_v57  ;;  %3370 = vmatpush.bf16.msra.mxu3 %v3345_v1  ;;  %v5399_v1 = vld [vmem:[%s5744_s1 + $0x8] sm:$0xff] }
 0x66b   :  { %v2668_v62 = vpack.c.bf16 %v2664_v53, %v2663_v49  ;;  %v2665_v33 = vpack.c.bf16 %v2658_v21, %v2657_v35  ;;  %v5425_v21 = vld [vmem:[%s5744_s1 + $0x10] sm:$0xff] }
 0x66d   :  { %3536 = vmatpush.xpose.msk.msrb.mxu0 %vm75_vm0, %v5252_v60  ;;  %2915 = vmatpush.bf16.msra.mxu2 %v2888_v25  ;;  %v2449_v60 = vld [vmem:[%s5754_s14] sm:$0xf] }
 0x66e   :  { %3143 = vmatpush.bf16.msra.mxu1 %v3116_v7  ;;  %3371 = vmatpush.bf16.msra.mxu3 %v3344_v14 }
 0x671   :  { %3537 = vmatpush.xpose.msk.msrb.mxu0 %vm75_vm0, %v5248_v4  ;;  %v2660_v4 = vmul.f32 %v2656_v24, %v5297_v9 }
 0x673   :  { %v2666_v10 = vpack.c.bf16 %v2660_v4, %v2659_v40 }
 0x675   :  { %3538 = vmatpush.xpose.msk.msrb.mxu0 %vm75_vm0, %v5244_v0 }
 0x678   :  { %3539 = vmatmul.msk.f32.vlgmr.msrb.gmra.mxu0 %vm75_vm0, %v2449_v60 }
 0x679   :  { %2689 = vmatpush.bf16.msra.mxu0 %v2668_v62 }
 0x67d   :  { %2690 = vmatpush.bf16.msra.mxu0 %v2667_v48 }
 0x681   :  { %2691 = vmatpush.bf16.msra.mxu0 %v2666_v10 }
 0x685   :  { %2692 = vmatpush.bf16.msra.mxu0 %v2665_v33 }
 0x695   :  { %v2425_v0 = vpop.f32.mrf.mxu3 }
 0x696   :  { %3182 = vperm.xlu2 %3627, %v2425_v0   ;;  %2723 = vperm.xlu1 %3626, %v2425_v0  }
 0x697   :  { %2485 = vperm.xlu0 %3625, %v2425_v0  }
 0x69d   :  { %v2428_v55 = vpop.f32.mrf.mxu3 }
 0x69e   :  { %3628 = vset.pattern.permute.xlu2 %v4061_v58  ;;  %3631 = vset.pattern.permute.xlu1 %v4064_v39 }
 0x69f   :  { %3630 = vset.pattern.permute.xlu0 %v4062_v59  ;;  %2954 = vperm.xlu2 %3628, %v2425_v0  }
 0x6a0   :  { %3186 = vperm.xlu1 %3631, %v2428_v55   ;;  %2727 = vperm.xlu0 %3630, %v2428_v55  }
 0x6a5   :  { %v2431_v29 = vpop.f32.mrf.mxu3 }
 0x6a7   :  { %3629 = vset.pattern.permute.xlu2 %v4063_v63 }
 0x6a8   :  { %3632 = vset.pattern.permute.xlu1 %v4061_v58  ;;  %3635 = vset.pattern.permute.xlu0 %v4064_v39 }
 0x6a9   :  { %2958 = vperm.xlu1 %3632, %v2428_v55   ;;  %2490 = vperm.xlu2 %3629, %v2428_v55  }
 0x6aa   :  { %3190 = vperm.xlu0 %3635, %v2431_v29  }
 0x6ad   :  { %v2434_v43 = vpop.f32.mrf.mxu3 }
 0x6b1   :  { %3633 = vset.pattern.permute.xlu1 %v4063_v63  ;;  %3634 = vset.pattern.permute.xlu2 %v4062_v59 }
 0x6b2   :  { %2731 = vperm.xlu2 %3634, %v2431_v29   ;;  %2495 = vperm.xlu1 %3633, %v2431_v29  }
 0x6b3   :  { %3646 = vset.pattern.permute.xlu0 %v4062_v59 }
 0x6b5   :  { %v2437_v38 = vpop.f32.mrf.mxu3 }
 0x6ba   :  { %3637 = vset.pattern.permute.xlu2 %v4063_v63  ;;  %3636 = vset.pattern.permute.xlu1 %v4061_v58 }
 0x6bb   :  { %2962 = vperm.xlu1 %3636, %v2431_v29   ;;  %2500 = vperm.xlu2 %3637, %v2434_v43  }
 0x6bd   :  { %v2440_v34 = vpop.f32.mrf.mxu3 }
 0x6be   :  { %2743 = vperm.xlu0 %3646, %v2440_v34  }
 0x6c3   :  { %3638 = vset.pattern.permute.xlu1 %v4062_v59  ;;  %3639 = vset.pattern.permute.xlu2 %v4064_v39 }
 0x6c4   :  { %2735 = vperm.xlu1 %3638, %v2434_v43   ;;  %3194 = vperm.xlu2 %3639, %v2434_v43  }
 0x6c6   :  { %3653 = vset.pattern.permute.xlu0 %v4063_v63 }
 0x6cc   :  { %3641 = vset.pattern.permute.xlu1 %v4063_v63  ;;  %3640 = vset.pattern.permute.xlu2 %v4061_v58 }
 0x6cd   :  { %2966 = vperm.xlu2 %3640, %v2434_v43   ;;  %2505 = vperm.xlu1 %3641, %v2437_v38   ;;  %v5435_v43 = vld [vmem:[%s5744_s1 + $0x18] sm:$0xff] }
 0x6d4   :  { %v2443_v28 = vpop.f32.mrf.mxu3 }
 0x6d5   :  { %3643 = vset.pattern.permute.xlu2 %v4064_v39  ;;  %3642 = vset.pattern.permute.xlu1 %v4062_v59 }
 0x6d6   :  { %3198 = vperm.xlu2 %3643, %v2437_v38   ;;  %2739 = vperm.xlu1 %3642, %v2437_v38  }
 0x6dc   :  { %v2446_v2 = vpop.f32.mrf.mxu3 }
 0x6dd   :  { %2520 = vperm.xlu0 %3653, %v2446_v2  }
 0x6de   :  { %3644 = vset.pattern.permute.xlu2 %v4061_v58  ;;  %3647 = vset.pattern.permute.xlu1 %v4064_v39 }
 0x6df   :  { %2970 = vperm.xlu2 %3644, %v2437_v38   ;;  %3202 = vperm.xlu1 %3647, %v2440_v34  }
 0x6e5   :  { %3655 = vset.pattern.permute.xlu0 %v4064_v39 }
 0x6e6   :  { %3210 = vperm.xlu0 %3655, %v2446_v2  }
 0x6e7   :  { %3645 = vset.pattern.permute.xlu2 %v4063_v63  ;;  %3648 = vset.pattern.permute.xlu1 %v4061_v58 }
 0x6e8   :  { %2974 = vperm.xlu1 %3648, %v2440_v34   ;;  %2510 = vperm.xlu2 %3645, %v2440_v34  }
 0x6ee   :  { %3656 = vset.pattern.permute.xlu0 %v4061_v58 }
 0x6ef   :  { %2982 = vperm.xlu0 %3656, %v2446_v2  }
 0x6f0   :  { %3649 = vset.pattern.permute.xlu1 %v4063_v63  ;;  %3651 = vset.pattern.permute.xlu2 %v4064_v39  ;;  %v5357_v32 = vpop.permute.xlu2 %3182 }
 0x6f1   :  { %3206 = vperm.xlu2 %3651, %v2443_v28   ;;  %2515 = vperm.xlu1 %3649, %v2443_v28  }
 0x6f5   :  { %v2470_v22 = vpop.f32.mrf.mxu0 }
 0x6f6   :  { %v5366_v63 = vperm.slane %v2470_v22, 1  ;;  %v5368_v52 = vperm.slane %v2470_v22, 0  ;;  %v5375_v54 = vperm.slane %v2470_v22, 3  ;;  %v5394_v41 = vperm.slane %v2470_v22, 2 }
 0x6f7   :  { %3657 = vset.pattern.permute.xlu0 %v4064_v39 }
 0x6f8   :  { %v3214_v42 = vadd.f32 %v5375_v54, %v5357_v32 }
 0x6f9   :  { %3650 = vset.pattern.permute.xlu1 %v4062_v59  ;;  %v5361_v6 = vpop.permute.xlu2 %2954 }
 0x6fa   :  { %2747 = vperm.xlu1 %3650, %v2443_v28   ;;  %v3230_v0 = vmul.f32 0.2, %v3214_v42  ;;  %vm3222_vm2 = vcmp.ge.f32.partialorder %v3214_v42, 0.0  ;;  %v2986_v34 = vadd.f32 %v5394_v41, %v5361_v6 }
 0x6fc   :  { %vm2994_vm5 = vcmp.ge.f32.partialorder %v2986_v34, 0.0 }
 0x702   :  { %3652 = vset.pattern.permute.xlu1 %v4061_v58 }
 0x703   :  { %v5364_v9 = vpop.permute.xlu2 %2490  ;;  %2978 = vperm.xlu1 %3652, %v2443_v28  }
 0x708   :  { %v2724_v26 = vpop.permute.xlu1 %2723 }
 0x709   :  { %v2755_v17 = vadd.f32 %v5366_v63, %v2724_v26  ;;  %v2486_v56 = vpop.permute.xlu0 %2485 }
 0x70a   :  { %v2524_v39 = vadd.f32 %v5368_v52, %v2486_v56 }
 0x70b   :  { %3654 = vset.pattern.permute.xlu1 %v4062_v59  ;;  %v2771_v5 = vmul.f32 0.2, %v2755_v17  ;;  %vm2763_vm10 = vcmp.ge.f32.partialorder %v2755_v17, 0.0  ;;  %v5382_v59 = vld [vmem:[%s5744_s1] sm:$0xff] }
 0x70c   :  { %v5373_v13 = vpop.permute.xlu2 %2731  ;;  %2751 = vperm.xlu1 %3654, %v2446_v2   ;;  %v2540_v58 = vmul.f32 0.2, %v2524_v39  ;;  %vm2532_vm11 = vcmp.ge.f32.partialorder %v2524_v39, 0.0  ;;  %v3238_v2 = vsel %vm3222_vm2, %v3214_v42, %v3230_v0 }
 0x70d   :  { %v2779_v45 = vsel %vm2763_vm10, %v2755_v17, %v2771_v5  ;;  %v5447_v26 = vadd.f32 %v5382_v59, %v3238_v2  ;;  %v3002_v17 = vmul.f32 0.2, %v2986_v34 }
 0x70e   :  { %v2548_v47 = vsel %vm2532_vm11, %v2524_v39, %v2540_v58  ;;  %v5385_v50 = vadd.f32 %v5382_v59, %v2779_v45  ;;  %v2525_v58 = vadd.f32 %v5368_v52, %v5364_v9 }
 0x70f   :  { %v5388_v23 = vadd.f32 %v5382_v59, %v2548_v47  ;;  %v3254_v6 = vsel %vm323_vm3, %v5447_v26, -inf }
 0x710   :  { %v2795_v36 = vsel %vm323_vm3, %v5385_v50, -inf  ;;  %vm2533_vm8 = vcmp.ge.f32.partialorder %v2525_v58, 0.0 }
 0x711   :  { %v2564_v19 = vsel %vm323_vm3, %v5388_v23, -inf }
 0x712   :  { %v3187_v44 = vpop.permute.xlu1 %3186  ;;  %v2728_v30 = vpop.permute.xlu0 %2727 }
 0x713   :  { %v3215_v18 = vadd.f32 %v5375_v54, %v3187_v44  ;;  %v2756_v27 = vadd.f32 %v5366_v63, %v2728_v30  ;;  %v3010_v30 = vsel %vm2994_vm5, %v2986_v34, %v3002_v17 }
 0x715   :  { %vm3223_vm12 = vcmp.ge.f32.partialorder %v3215_v18, 0.0  ;;  %v3231_v37 = vmul.f32 0.2, %v3215_v18  ;;  %v2501_v20 = vpop.permute.xlu2 %2500  ;;  %v2772_v16 = vmul.f32 0.2, %v2756_v27  ;;  %vm2764_vm13 = vcmp.ge.f32.partialorder %v2756_v27, 0.0 }
 0x716   :  { %v2527_v7 = vadd.f32 %v5368_v52, %v2501_v20  ;;  %v5461_v20 = vadd.f32 %v5382_v59, %v3010_v30  ;;  %v2757_v59 = vadd.f32 %v5366_v63, %v5373_v13  ;;  %v4058_v30 = vld [vmem:[%s5744_s1 + $0x20] sm:$0xff] }
 0x717   :  { %v3239_v3 = vsel %vm3223_vm12, %v3215_v18, %v3231_v37  ;;  %v2780_v15 = vsel %vm2764_vm13, %v2756_v27, %v2772_v16  ;;  %v2541_v16 = vmul.f32 0.2, %v2525_v58 }
 0x718   :  { %v5402_v8 = vadd.f32 %v5399_v1, %v3239_v3  ;;  %v5406_v31 = vadd.f32 %v5399_v1, %v2780_v15  ;;  %v2543_v62 = vmul.f32 0.2, %v2527_v7  ;;  %vm2535_vm15 = vcmp.ge.f32.partialorder %v2527_v7, 0.0 }
 0x719   :  { %2796 = vmax.xlane.f32.xlu0 %v2795_v36  ;;  %v3026_v15 = vsel %vm323_vm3, %v5461_v20, -inf  ;;  %vm2765_vm10 = vcmp.ge.f32.partialorder %v2757_v59, 0.0 }
 0x71a   :  { %2565 = vmax.xlane.f32.xlu2 %v2564_v19  ;;  %v3257_v46 = vsel %vm323_vm3, %v5402_v8, -inf  ;;  %v2798_v25 = vsel %vm323_vm3, %v5406_v31, -inf  ;;  %v2551_v33 = vsel %vm2535_vm15, %v2527_v7, %v2543_v62 }
 0x71b   :  { %v2959_v57 = vpop.permute.xlu1 %2958  ;;  %v5438_v38 = vadd.f32 %v5435_v43, %v2551_v33  ;;  %v5492_v33 = vld [vmem:[%s5744_s1 + $0x28] sm:$0xff] }
 0x71c   :  { %v2987_v11 = vadd.f32 %v5394_v41, %v2959_v57  ;;  %v3191_v60 = vpop.permute.xlu0 %3190 }
 0x71d   :  { %v3216_v10 = vadd.f32 %v5375_v54, %v3191_v60  ;;  %v2573_v22 = vsel %vm323_vm3, %v5438_v38, -inf }
 0x71e   :  { %v3003_v51 = vmul.f32 0.2, %v2987_v11  ;;  %v3195_v61 = vpop.permute.xlu2 %3194  ;;  %vm2995_vm14 = vcmp.ge.f32.partialorder %v2987_v11, 0.0 }
 0x71f   :  { %v3232_v28 = vmul.f32 0.2, %v3216_v10  ;;  %vm3224_vm4 = vcmp.ge.f32.partialorder %v3216_v10, 0.0  ;;  %v3217_v36 = vadd.f32 %v5375_v54, %v3195_v61  ;;  %v2549_v61 = vsel %vm2533_vm8, %v2525_v58, %v2541_v16 }
 0x720   :  { %v3011_v14 = vsel %vm2995_vm14, %v2987_v11, %v3003_v51  ;;  %v5479_v7 = vadd.f32 %v5399_v1, %v2549_v61 }
 0x721   :  { %3258 = vmax.xlane.f32.xlu0 %v3257_v46  ;;  %v5415_v49 = vadd.f32 %v5399_v1, %v3011_v14  ;;  %v3240_v39 = vsel %vm3224_vm4, %v3216_v10, %v3232_v28  ;;  %v3233_v11 = vmul.f32 0.2, %v3217_v36  ;;  %vm3225_vm9 = vcmp.ge.f32.partialorder %v3217_v36, 0.0 }
 0x722   :  { %2799 = vmax.xlane.f32.xlu2 %v2798_v25  ;;  %v5453_v5 = vadd.f32 %v5425_v21, %v3240_v39  ;;  %v2773_v14 = vmul.f32 0.2, %v2757_v59  ;;  %v2567_v60 = vsel %vm323_vm3, %v5479_v7, -inf }
 0x723   :  { %v3029_v4 = vsel %vm323_vm3, %v5415_v49, -inf  ;;  %v3241_v13 = vsel %vm3225_vm9, %v3217_v36, %v3233_v11 }
 0x724   :  { %v2496_v24 = vpop.permute.xlu1 %2495  ;;  %v3260_v37 = vsel %vm323_vm3, %v5453_v5, -inf }
 0x725   :  { %v2526_v53 = vadd.f32 %v5368_v52, %v2496_v24 }
 0x727   :  { %vm2534_vm1 = vcmp.ge.f32.partialorder %v2526_v53, 0.0  ;;  %v2542_v12 = vmul.f32 0.2, %v2526_v53  ;;  %v2967_v48 = vpop.permute.xlu2 %2966 }
 0x728   :  { %v2989_v24 = vadd.f32 %v5394_v41, %v2967_v48 }
 0x729   :  { %v2550_v40 = vsel %vm2534_vm1, %v2526_v53, %v2542_v12  ;;  %v5486_v12 = vadd.f32 %v5435_v43, %v3241_v13 }
 0x72a   :  { %3030 = vmax.xlane.f32.xlu2 %v3029_v4  ;;  %v5428_v35 = vadd.f32 %v5425_v21, %v2550_v40  ;;  %v3005_v4 = vmul.f32 0.2, %v2989_v24  ;;  %v2781_v40 = vsel %vm2765_vm10, %v2757_v59, %v2773_v14  ;;  %vm2997_vm12 = vcmp.ge.f32.partialorder %v2989_v24, 0.0 }
 0x72c   :  { %v2570_v55 = vsel %vm323_vm3, %v5428_v35, -inf }
 0x72d   :  { %v2963_v29 = vpop.permute.xlu1 %2962  ;;  %2571 = vmax.xlane.f32.xlu0 %v2570_v55  ;;  %v3263_v55 = vsel %vm323_vm3, %v5486_v12, -inf }
 0x72e   :  { %v2988_v56 = vadd.f32 %v5394_v41, %v2963_v29  ;;  %v5500_v29 = vadd.f32 %v5425_v21, %v2781_v40 }
 0x730   :  { %v5442_v32 = vpop.permute.xlu2 %3198  ;;  %v3004_v45 = vmul.f32 0.2, %v2988_v56  ;;  %vm2996_vm6 = vcmp.ge.f32.partialorder %v2988_v56, 0.0  ;;  %v2801_v17 = vsel %vm323_vm3, %v5500_v29, -inf  ;;  %v2744_v58 = vpop.permute.xlu0 %2743 }
 0x732   :  { %2574 = vmax.xlane.f32.xlu2 %v2573_v22  ;;  %v3012_v9 = vsel %vm2996_vm6, %v2988_v56, %v3004_v45  ;;  %v3013_v22 = vsel %vm2997_vm12, %v2989_v24, %v3005_v4 }
 0x733   :  { %v5470_v57 = vadd.f32 %v5425_v21, %v3012_v9  ;;  %v5508_v56 = vadd.f32 %v5435_v43, %v3013_v22 }
 0x735   :  { %v3032_v25 = vsel %vm323_vm3, %v5470_v57, -inf }
 0x736   :  { %v2736_v44 = vpop.permute.xlu1 %2735  ;;  %3255 = vmax.xlane.f32.xlu1 %v3254_v6 }
 0x737   :  { %v2758_v47 = vadd.f32 %v5366_v63, %v2736_v44  ;;  %v3035_v44 = vsel %vm323_vm3, %v5508_v56, -inf }
 0x739   :  { %vm2766_vm7 = vcmp.ge.f32.partialorder %v2758_v47, 0.0  ;;  %v2774_v18 = vmul.f32 0.2, %v2758_v47  ;;  %v2971_v27 = vpop.permute.xlu2 %2970 }
 0x73a   :  { %3261 = vmax.xlane.f32.xlu2 %v3260_v37  ;;  %v2990_v34 = vadd.f32 %v5394_v41, %v2971_v27 }
 0x73b   :  { %v2782_v3 = vsel %vm2766_vm7, %v2758_v47, %v2774_v18 }
 0x73c   :  { %v5465_v19 = vadd.f32 %v5435_v43, %v2782_v3  ;;  %v3006_v39 = vmul.f32 0.2, %v2990_v34  ;;  %vm2998_vm14 = vcmp.ge.f32.partialorder %v2990_v34, 0.0  ;;  %v2760_v43 = vadd.f32 %v5366_v63, %v2744_v58 }
 0x73d   :  { %v3218_v3 = vadd.f32 %v5375_v54, %v5442_v32 }
 0x73e   :  { %3027 = vmax.xlane.f32.xlu1 %v3026_v15  ;;  %v2804_v51 = vsel %vm323_vm3, %v5465_v19, -inf  ;;  %v3014_v37 = vsel %vm2998_vm14, %v2990_v34, %v3006_v39  ;;  %v2776_v15 = vmul.f32 0.2, %v2760_v43  ;;  %vm2768_vm2 = vcmp.ge.f32.partialorder %v2760_v43, 0.0 }
 0x73f   :  { %v2506_v46 = vpop.permute.xlu1 %2505  ;;  %2805 = vmax.xlane.f32.xlu0 %v2804_v51  ;;  %v5522_v9 = vadd.f32 %v4058_v30, %v3014_v37  ;;  %v3234_v14 = vmul.f32 0.2, %v3218_v3  ;;  %vm3226_vm4 = vcmp.ge.f32.partialorder %v3218_v3, 0.0 }
 0x740   :  { %v2528_v1 = vadd.f32 %v5368_v52, %v2506_v46  ;;  %v2784_v32 = vsel %vm2768_vm2, %v2760_v43, %v2776_v15 }
 0x741   :  { %v3038_v46 = vsel %vm323_vm3, %v5522_v9, -inf  ;;  %v5538_v13 = vadd.f32 %v5492_v33, %v2784_v32 }
 0x742   :  { %v2511_v53 = vpop.permute.xlu2 %2510  ;;  %3033 = vmax.xlane.f32.xlu2 %v3032_v25  ;;  %v2544_v28 = vmul.f32 0.2, %v2528_v1  ;;  %vm2536_vm13 = vcmp.ge.f32.partialorder %v2528_v1, 0.0 }
 0x743   :  { %v2529_v62 = vadd.f32 %v5368_v52, %v2511_v53  ;;  %v2810_v4 = vsel %vm323_vm3, %v5538_v13, -inf }
 0x744   :  { %v2552_v6 = vsel %vm2536_vm13, %v2528_v1, %v2544_v28 }
 0x745   :  { %vm2537_vm11 = vcmp.ge.f32.partialorder %v2529_v62, 0.0  ;;  %v2545_v42 = vmul.f32 0.2, %v2529_v62  ;;  %v5516_v47 = vadd.f32 %v4058_v30, %v2552_v6 }
 0x746   :  { %2568 = vmax.xlane.f32.xlu1 %v2567_v60 }
 0x747   :  { %v2553_v48 = vsel %vm2537_vm11, %v2529_v62, %v2545_v42  ;;  %v2576_v36 = vsel %vm323_vm3, %v5516_v47, -inf  ;;  %v3242_v42 = vsel %vm3226_vm4, %v3218_v3, %v3234_v14 }
 0x748   :  { %v2740_v10 = vpop.permute.xlu1 %2739  ;;  %v5495_v0 = vadd.f32 %v5492_v33, %v2553_v48  ;;  %v5543_v1 = vadd.f32 %v4058_v30, %v3242_v42 }
 0x749   :  { %v2759_v21 = vadd.f32 %v5366_v63, %v2740_v10 }
 0x74a   :  { %3264 = vmax.xlane.f32.xlu2 %v3263_v55  ;;  %v2579_v2 = vsel %vm323_vm3, %v5495_v0, -inf  ;;  %v3266_v34 = vsel %vm323_vm3, %v5543_v1, -inf }
 0x74b   :  { %2580 = vmax.xlane.f32.xlu0 %v2579_v2  ;;  %v2775_v18 = vmul.f32 0.2, %v2759_v21  ;;  %vm2767_vm15 = vcmp.ge.f32.partialorder %v2759_v21, 0.0  ;;  %v3207_v48 = vpop.permute.xlu2 %3206 }
 0x74c   :  { %v3220_v28 = vadd.f32 %v5375_v54, %v3207_v48 }
 0x74d   :  { %v2783_v11 = vsel %vm2767_vm15, %v2759_v21, %v2775_v18  ;;  %v4059_v21 = vld [vmem:[%s5744_s1 + $0x30] sm:$0xff] }
 0x74e   :  { %2802 = vmax.xlane.f32.xlu1 %v2801_v17  ;;  %v5533_v25 = vadd.f32 %v4058_v30, %v2783_v11  ;;  %vm3228_vm7 = vcmp.ge.f32.partialorder %v3220_v28, 0.0 }
 0x74f   :  { %v2521_v60 = vpop.permute.xlu0 %2520 }
 0x750   :  { %v2807_v53 = vsel %vm323_vm3, %v5533_v25, -inf  ;;  %v2531_v37 = vadd.f32 %v5368_v52, %v2521_v60 }
 0x751   :  { %v3203_v45 = vpop.permute.xlu1 %3202 }
 0x752   :  { %v3219_v27 = vadd.f32 %v5375_v54, %v3203_v45  ;;  %3036 = vmax.xlane.f32.xlu2 %v3035_v44  ;;  %v3236_v45 = vmul.f32 0.2, %v3220_v28  ;;  %vm2539_vm10 = vcmp.ge.f32.partialorder %v2531_v37, 0.0 }
 0x754   :  { %vm3227_vm1 = vcmp.ge.f32.partialorder %v3219_v27, 0.0  ;;  %v3235_v16 = vmul.f32 0.2, %v3219_v27 }
 0x756   :  { %2577 = vmax.xlane.f32.xlu1 %v2576_v36  ;;  %v3243_v59 = vsel %vm3227_vm1, %v3219_v27, %v3235_v16  ;;  %v3244_v16 = vsel %vm3228_vm7, %v3220_v28, %v3236_v45 }
 0x757   :  { %v5527_v51 = vadd.f32 %v5492_v33, %v3243_v59  ;;  %v5564_v15 = vadd.f32 %v4059_v21, %v3244_v16  ;;  %v2547_v59 = vmul.f32 0.2, %v2531_v37 }
 0x758   :  { %v3211_v39 = vpop.permute.xlu0 %3210 }
 0x759   :  { %v3269_v61 = vsel %vm323_vm3, %v5527_v51, -inf  ;;  %v3221_v43 = vadd.f32 %v5375_v54, %v3211_v39  ;;  %v2555_v32 = vsel %vm2539_vm10, %v2531_v37, %v2547_v59 }
 0x75a   :  { %v2975_v24 = vpop.permute.xlu1 %2974  ;;  %3270 = vmax.xlane.f32.xlu0 %v3269_v61  ;;  %3039 = vmax.xlane.f32.xlu2 %v3038_v46 }
 0x75b   :  { %v2991_v62 = vadd.f32 %v5394_v41, %v2975_v24  ;;  %v3237_v36 = vmul.f32 0.2, %v3221_v43  ;;  %vm3229_vm9 = vcmp.ge.f32.partialorder %v3221_v43, 0.0 }
 0x75d   :  { %v3007_v40 = vmul.f32 0.2, %v2991_v62  ;;  %vm2999_vm5 = vcmp.ge.f32.partialorder %v2991_v62, 0.0  ;;  %v3245_v14 = vsel %vm3229_vm9, %v3221_v43, %v3237_v36 }
 0x75e   :  { %2808 = vmax.xlane.f32.xlu1 %v2807_v53  ;;  %v4060_v53 = vld [vmem:[%s5744_s1 + $0x38] sm:$0xff] }
 0x75f   :  { %v3015_v22 = vsel %vm2999_vm5, %v2991_v62, %v3007_v40  ;;  %v5576_v62 = vadd.f32 %v4060_v53, %v3245_v14  ;;  %v5578_v42 = vadd.f32 %v4060_v53, %v2555_v32 }
 0x760   :  { %v5555_v58 = vadd.f32 %v5492_v33, %v3015_v22 }
 0x761   :  { %v2983_v54 = vpop.permute.xlu0 %2982  ;;  %v2585_v40 = vsel %vm323_vm3, %v5578_v42, -inf }
 0x762   :  { %2811 = vmax.xlane.f32.xlu2 %v2810_v4  ;;  %v3041_v27 = vsel %vm323_vm3, %v5555_v58, -inf  ;;  %v2993_v24 = vadd.f32 %v5394_v41, %v2983_v54  ;;  %v3275_v4 = vsel %vm323_vm3, %v5576_v62, -inf }
 0x763   :  { %v2516_v10 = vpop.permute.xlu1 %2515 }
 0x764   :  { %v2530_v55 = vadd.f32 %v5368_v52, %v2516_v10  ;;  %v3272_v52 = vsel %vm323_vm3, %v5564_v15, -inf  ;;  %v3009_v60 = vmul.f32 0.2, %v2993_v24  ;;  %vm3001_vm11 = vcmp.ge.f32.partialorder %v2993_v24, 0.0 }
 0x766   :  { %vm2538_vm6 = vcmp.ge.f32.partialorder %v2530_v55, 0.0  ;;  %v2546_v2 = vmul.f32 0.2, %v2530_v55  ;;  %3267 = vmax.xlane.f32.xlu1 %v3266_v34  ;;  %v3017_v10 = vsel %vm3001_vm11, %v2993_v24, %v3009_v60 }
 0x768   :  { %v2554_v17 = vsel %vm2538_vm6, %v2530_v55, %v2546_v2  ;;  %v5586_v2 = vadd.f32 %v4060_v53, %v3017_v10 }
 0x769   :  { %v5552_v6 = vadd.f32 %v4059_v21, %v2554_v17 }
 0x76a   :  { %v3047_v45 = vsel %vm323_vm3, %v5586_v2, -inf }
 0x76b   :  { %v2582_v44 = vsel %vm323_vm3, %v5552_v6, -inf }
 0x76c   :  { %v2748_v30 = vpop.permute.xlu1 %2747  ;;  %2583 = vmax.xlane.f32.xlu2 %v2582_v44 }
 0x76d   :  { %v2761_v18 = vadd.f32 %v5366_v63, %v2748_v30 }
 0x76e   :  { %3042 = vmax.xlane.f32.xlu1 %v3041_v27 }
 0x76f   :  { %vm2769_vm8 = vcmp.ge.f32.partialorder %v2761_v18, 0.0  ;;  %v2777_v33 = vmul.f32 0.2, %v2761_v18 }
 0x771   :  { %v2785_v3 = vsel %vm2769_vm8, %v2761_v18, %v2777_v33 }
 0x772   :  { %v5566_v11 = vadd.f32 %v4059_v21, %v2785_v3 }
 0x774   :  { %v2813_v61 = vsel %vm323_vm3, %v5566_v11, -inf }
 0x775   :  { %v2979_v46 = vpop.permute.xlu1 %2978  ;;  %2814 = vmax.xlane.f32.xlu0 %v2813_v61 }
 0x776   :  { %3273 = vmax.xlane.f32.xlu1 %v3272_v52  ;;  %v2992_v55 = vadd.f32 %v5394_v41, %v2979_v46 }
 0x778   :  { %v3008_v22 = vmul.f32 0.2, %v2992_v55  ;;  %vm3000_vm13 = vcmp.ge.f32.partialorder %v2992_v55, 0.0 }
 0x77a   :  { %v3016_v41 = vsel %vm3000_vm13, %v2992_v55, %v3008_v22 }
 0x77b   :  { %v5594_v30 = vadd.f32 %v4059_v21, %v3016_v41 }
 0x77d   :  { %3276 = vmax.xlane.f32.xlu0 %v3275_v4  ;;  %v3044_v27 = vsel %vm323_vm3, %v5594_v30, -inf }
 0x77e   :  { %v2752_v48 = vpop.permute.xlu1 %2751  ;;  %2586 = vmax.xlane.f32.xlu1 %v2585_v40 }
 0x77f   :  { %v2762_v34 = vadd.f32 %v5366_v63, %v2752_v48 }
 0x781   :  { %vm2770_vm12 = vcmp.ge.f32.partialorder %v2762_v34, 0.0  ;;  %v2778_v28 = vmul.f32 0.2, %v2762_v34 }
 0x783   :  { %v2786_v17 = vsel %vm2770_vm12, %v2762_v34, %v2778_v28 }
 0x784   :  { %v5588_v39 = vadd.f32 %v4060_v53, %v2786_v17 }
 0x786   :  { %3048 = vmax.xlane.f32.xlu1 %v3047_v45  ;;  %v2816_v44 = vsel %vm323_vm3, %v5588_v39, -inf }
 0x787   :  { %2817 = vmax.xlane.f32.xlu2 %v2816_v44 }
 0x78c   :  { %v2797_v63 = vpop.xlane.xlu0 %2796 }
 0x78d   :  { %v2566_v43 = vpop.xlane.xlu2 %2565  ;;  %v2819_v37 = vsub.f32 %v5385_v50, %v2797_v63 }
 0x78e   :  { %v2588_v18 = vsub.f32 %v5388_v23, %v2566_v43 }
 0x78f   :  { %3045 = vmax.xlane.f32.xlu2 %v3044_v27  ;;  %v2827_v33 = vmul.f32 1.442695, %v2819_v37 }
 0x790   :  { %v2596_v16 = vmul.f32 1.442695, %v2588_v18 }
 0x792   :  { %3917 = vpow2.f32 %v2596_v16 }
 0x793   :  { %3919 = vpow2.f32 %v2827_v33 }
 0x794   :  { %v3259_v24 = vpop.xlane.xlu0 %3258 }
 0x795   :  { %v2800_v36 = vpop.xlane.xlu2 %2799  ;;  %v3279_v32 = vsub.f32 %v5402_v8, %v3259_v24 }
 0x796   :  { %v2820_v3 = vsub.f32 %v5406_v31, %v2800_v36 }
 0x797   :  { %v3288_v4 = vmul.f32 1.442695, %v3279_v32 }
 0x798   :  { %v5601_v59 = vpop.eup %3917  ;;  %v2829_v21 = vmul.f32 1.442695, %v2820_v3 }
 0x799   :  { %v2612_v54 = vsel %vm323_vm3, %v5601_v59, 0.0  ;;  %v3920_v61 = vpop.eup %3919 }
 0x79a   :  { %3921 = vpow2.f32 %v2829_v21  ;;  %2613 = vadd.xlane.f32.xlu0 %v2612_v54  ;;  %v2843_v31 = vsel %vm323_vm3, %v3920_v61, 0.0 }
 0x79d   :  { %v3031_v23 = vpop.xlane.xlu2 %3030 }
 0x79e   :  { %v3051_v46 = vsub.f32 %v5415_v49, %v3031_v23 }
 0x7a0   :  { %v5606_v50 = vpop.eup %3921  ;;  %v3060_v52 = vmul.f32 1.442695, %v3051_v46  ;;  %v2572_v55 = vpop.xlane.xlu0 %2571 }
 0x7a1   :  { %v2892_v14 = vpack.c.bf16 %v5606_v50, %v3920_v61  ;;  %v2590_v3 = vsub.f32 %v5428_v35, %v2572_v55 }
 0x7a2   :  { %3923 = vpow2.f32 %v3060_v52  ;;  %2844 = vadd.xlane.f32.xlu0 %v2843_v31 }
 0x7a3   :  { %3544 = vmatmul.msk.bf16.vlgmr.msra.gmra.mxu2 %vm323_vm3, %v2892_v14  ;;  %3925 = vpow2.f32 %v3288_v4  ;;  %v2600_v14 = vmul.f32 1.442695, %v2590_v3 }
 0x7a5   :  { %v2575_v53 = vpop.xlane.xlu2 %2574 }
 0x7a6   :  { %v2591_v22 = vsub.f32 %v5438_v38, %v2575_v53 }
 0x7a8   :  { %v3924_v60 = vpop.eup %3923  ;;  %v2602_v63 = vmul.f32 1.442695, %v2591_v22 }
 0x7a9   :  { %v3256_v40 = vpop.xlane.xlu1 %3255  ;;  %v3077_v49 = vsel %vm323_vm3, %v3924_v60, 0.0  ;;  %v3926_v44 = vpop.eup %3925 }
 0x7aa   :  { %v3278_v48 = vsub.f32 %v5447_v26, %v3256_v40  ;;  %3078 = vadd.xlane.f32.xlu0 %v3077_v49 }
 0x7ac   :  { %v3286_v10 = vmul.f32 1.442695, %v3278_v48  ;;  %v3305_v48 = vsel %vm323_vm3, %v3926_v44, 0.0 }
 0x7ad   :  { %v3262_v34 = vpop.xlane.xlu2 %3261 }
 0x7ae   :  { %3927 = vpow2.f32 %v3286_v10  ;;  %v3280_v28 = vsub.f32 %v5453_v5, %v3262_v34 }
 0x7b0   :  { %v3290_v17 = vmul.f32 1.442695, %v3280_v28 }
 0x7b1   :  { %v3028_v8 = vpop.xlane.xlu1 %3027 }
 0x7b2   :  { %3929 = vpow2.f32 %v3290_v17  ;;  %v3050_v45 = vsub.f32 %v5461_v20, %v3028_v8  ;;  %v2806_v18 = vpop.xlane.xlu0 %2805 }
 0x7b3   :  { %v2822_v38 = vsub.f32 %v5465_v19, %v2806_v18 }
 0x7b4   :  { %v3928_v41 = vpop.eup %3927  ;;  %v3058_v43 = vmul.f32 1.442695, %v3050_v45 }
 0x7b5   :  { %v3348_v26 = vpack.c.bf16 %v3926_v44, %v3928_v41  ;;  %v3034_v27 = vpop.xlane.xlu2 %3033  ;;  %v3302_v37 = vsel %vm323_vm3, %v3928_v41, 0.0  ;;  %v2833_v21 = vmul.f32 1.442695, %v2822_v38 }
 0x7b6   :  { %3931 = vpow2.f32 %v3058_v43  ;;  %3303 = vadd.xlane.f32.xlu2 %v3302_v37  ;;  %v3052_v31 = vsub.f32 %v5470_v57, %v3034_v27 }
 0x7b7   :  { %3552 = vmatmul.msk.bf16.vlgmr.msra.gmra.mxu3 %vm323_vm3, %v3348_v26  ;;  %3933 = vpow2.f32 %v2602_v63 }
 0x7b8   :  { %v3930_v5 = vpop.eup %3929 }
 0x7b9   :  { %v2569_v16 = vpop.xlane.xlu1 %2568  ;;  %v3308_v20 = vsel %vm323_vm3, %v3930_v5, 0.0 }
 0x7ba   :  { %v2589_v33 = vsub.f32 %v5479_v7, %v2569_v16  ;;  %3309 = vadd.xlane.f32.xlu0 %v3308_v20 }
 0x7bc   :  { %v3932_v36 = vpop.eup %3931  ;;  %v2598_v54 = vmul.f32 1.442695, %v2589_v33 }
 0x7bd   :  { %v3120_v23 = vpack.c.bf16 %v3924_v60, %v3932_v36  ;;  %v3265_v61 = vpop.xlane.xlu2 %3264  ;;  %v3074_v46 = vsel %vm323_vm3, %v3932_v36, 0.0  ;;  %v5624_v52 = vpop.eup %3933 }
 0x7be   :  { %3935 = vpow2.f32 %v2598_v54  ;;  %v3281_v19 = vsub.f32 %v5486_v12, %v3265_v61  ;;  %3075 = vadd.xlane.f32.xlu1 %v3074_v46  ;;  %v2621_v24 = vsel %vm323_vm3, %v5624_v52, 0.0  ;;  %v3062_v12 = vmul.f32 1.442695, %v3052_v31  ;;  %v2581_v17 = vpop.xlane.xlu0 %2580 }
 0x7bf   :  { %3548 = vmatmul.msk.bf16.vlgmr.msra.gmra.mxu1 %vm323_vm3, %v3120_v23  ;;  %3937 = vpow2.f32 %v2833_v21 }
 0x7c0   :  { %v3292_v7 = vmul.f32 1.442695, %v3281_v19 }
 0x7c1   :  { %v2803_v35 = vpop.xlane.xlu1 %2802 }
 0x7c2   :  { %3939 = vpow2.f32 %v3292_v7  ;;  %v2821_v32 = vsub.f32 %v5500_v29, %v2803_v35  ;;  %2622 = vadd.xlane.f32.xlu0 %v2621_v24 }
 0x7c3   :  { %3941 = vpow2.f32 %v2600_v14 }
 0x7c4   :  { %v3936_v53 = vpop.eup %3935  ;;  %v2831_v60 = vmul.f32 1.442695, %v2821_v32 }
 0x7c5   :  { %v2669_v4 = vpack.c.bf16 %v3936_v53, %v5601_v59  ;;  %v3037_v40 = vpop.xlane.xlu2 %3036  ;;  %v2615_v49 = vsel %vm323_vm3, %v3936_v53, 0.0  ;;  %v3938_v57 = vpop.eup %3937 }
 0x7c6   :  { %3943 = vpow2.f32 %v2831_v60  ;;  %v3053_v10 = vsub.f32 %v5508_v56, %v3037_v40  ;;  %2616 = vadd.xlane.f32.xlu2 %v2615_v49  ;;  %3306 = vadd.xlane.f32.xlu1 %v3305_v48  ;;  %v2852_v28 = vsel %vm323_vm3, %v3938_v57, 0.0  ;;  %v2846_v56 = vsel %vm323_vm3, %v5606_v50, 0.0 }
 0x7c7   :  { %3540 = vmatmul.msk.bf16.vlgmr.msra.gmra.mxu0 %vm323_vm3, %v2669_v4  ;;  %3945 = vpow2.f32 %v3062_v12  ;;  %v2593_v50 = vsub.f32 %v5495_v0, %v2581_v17 }
 0x7c8   :  { %v3940_v29 = vpop.eup %3939  ;;  %v3064_v55 = vmul.f32 1.442695, %v3053_v10 }
 0x7c9   :  { %v2578_v34 = vpop.xlane.xlu1 %2577  ;;  %v3349_v59 = vpack.c.bf16 %v3940_v29, %v3930_v5  ;;  %v3942_v22 = vpop.eup %3941  ;;  %v3311_v19 = vsel %vm323_vm3, %v3940_v29, 0.0 }
 0x7ca   :  { %3947 = vpow2.f32 %v3064_v55  ;;  %2853 = vadd.xlane.f32.xlu0 %v2852_v28  ;;  %v2618_v44 = vsel %vm323_vm3, %v3942_v22, 0.0  ;;  %v2592_v16 = vsub.f32 %v5516_v47, %v2578_v34 }
 0x7cb   :  { %3553 = vmatmul.msk.bf16.gmra.mxu3 %vm323_vm3, %v3349_v59 }
 0x7cc   :  { %v3944_v8 = vpop.eup %3943  ;;  %v2604_v23 = vmul.f32 1.442695, %v2592_v16 }
 0x7cd   :  { %v3040_v45 = vpop.xlane.xlu2 %3039  ;;  %v2893_v41 = vpack.c.bf16 %v3938_v57, %v3944_v8  ;;  %v3946_v43 = vpop.eup %3945  ;;  %v2849_v21 = vsel %vm323_vm3, %v3944_v8, 0.0 }
 0x7ce   :  { %v3054_v63 = vsub.f32 %v5522_v9, %v3040_v45  ;;  %2847 = vadd.xlane.f32.xlu2 %v2846_v56  ;;  %2619 = vadd.xlane.f32.xlu1 %v2618_v44  ;;  %v3271_v5 = vpop.xlane.xlu0 %3270  ;;  %v2670_v9 = vpack.c.bf16 %v5624_v52, %v3942_v22  ;;  %v3080_v3 = vsel %vm323_vm3, %v3946_v43, 0.0 }
 0x7cf   :  { %3545 = vmatmul.msk.bf16.gmra.mxu2 %vm323_vm3, %v2893_v41  ;;  %v3283_v20 = vsub.f32 %v5527_v51, %v3271_v5 }
 0x7d0   :  { %v3948_v26 = vpop.eup %3947  ;;  %v3066_v18 = vmul.f32 1.442695, %v3054_v63 }
 0x7d1   :  { %v2809_v27 = vpop.xlane.xlu1 %2808  ;;  %v3121_v37 = vpack.c.bf16 %v3948_v26, %v3946_v43  ;;  %v3296_v61 = vmul.f32 1.442695, %v3283_v20  ;;  %v3083_v14 = vsel %vm323_vm3, %v3948_v26, 0.0 }
 0x7d2   :  { %3949 = vpow2.f32 %v3066_v18  ;;  %v2823_v38 = vsub.f32 %v5533_v25, %v2809_v27  ;;  %v2606_v25 = vmul.f32 1.442695, %v2593_v50 }
 0x7d3   :  { %3549 = vmatmul.msk.bf16.gmra.mxu1 %vm323_vm3, %v3121_v37 }
 0x7d4   :  { %v2835_v33 = vmul.f32 1.442695, %v2823_v38 }
 0x7d5   :  { %v2812_v36 = vpop.xlane.xlu2 %2811 }
 0x7d6   :  { %v2824_v54 = vsub.f32 %v5538_v13, %v2812_v36  ;;  %3081 = vadd.xlane.f32.xlu2 %v3080_v3  ;;  %2850 = vadd.xlane.f32.xlu1 %v2849_v21  ;;  %3951 = vpow2.f32 %v2835_v33 }
 0x7d7   :  { %3541 = vmatmul.msk.bf16.gmra.mxu0 %vm323_vm3, %v2670_v9 }
 0x7d8   :  { %v3950_v0 = vpop.eup %3949  ;;  %v2837_v47 = vmul.f32 1.442695, %v2824_v54 }
 0x7d9   :  { %v3268_v46 = vpop.xlane.xlu1 %3267  ;;  %v3086_v51 = vsel %vm323_vm3, %v3950_v0, 0.0 }
 0x7da   :  { %3953 = vpow2.f32 %v2837_v47  ;;  %v3282_v52 = vsub.f32 %v5543_v1, %v3268_v46  ;;  %3087 = vadd.xlane.f32.xlu0 %v3086_v51 }
 0x7db   :  { %3955 = vpow2.f32 %v2606_v25 }
 0x7dc   :  { %3957 = vpow2.f32 %v2604_v23  ;;  %v3294_v13 = vmul.f32 1.442695, %v3282_v52  ;;  %v3952_v7 = vpop.eup %3951 }
 0x7dd   :  { %3959 = vpow2.f32 %v3296_v61  ;;  %v2855_v45 = vsel %vm323_vm3, %v3952_v7, 0.0 }
 0x7de   :  { %3961 = vpow2.f32 %v3294_v13  ;;  %3312 = vadd.xlane.f32.xlu2 %v3311_v19  ;;  %3084 = vadd.xlane.f32.xlu1 %v3083_v14 }
 0x7df   :  { %v2584_v31 = vpop.xlane.xlu2 %2583 }
 0x7e0   :  { %v3954_v35 = vpop.eup %3953  ;;  %v2594_v24 = vsub.f32 %v5552_v6, %v2584_v31 }
 0x7e1   :  { %v3956_v32 = vpop.eup %3955  ;;  %v3043_v53 = vpop.xlane.xlu1 %3042  ;;  %v2894_v1 = vpack.c.bf16 %v3954_v35, %v3952_v7  ;;  %v2858_v38 = vsel %vm323_vm3, %v3954_v35, 0.0 }
 0x7e2   :  { %v3958_v60 = vpop.eup %3957  ;;  %v2608_v12 = vmul.f32 1.442695, %v2594_v24  ;;  %v3055_v4 = vsub.f32 %v5555_v58, %v3043_v53  ;;  %v2627_v56 = vsel %vm323_vm3, %v3956_v32, 0.0 }
 0x7e3   :  { %v5660_v40 = vpop.eup %3959  ;;  %3546 = vmatmul.msk.bf16.gmra.mxu2 %vm323_vm3, %v2894_v1  ;;  %v2624_v57 = vsel %vm323_vm3, %v3958_v60, 0.0  ;;  %v2671_v29 = vpack.c.bf16 %v3956_v32, %v3958_v60 }
 0x7e4   :  { %v3962_v49 = vpop.eup %3961  ;;  %3963 = vpow2.f32 %v2608_v12  ;;  %v3068_v48 = vmul.f32 1.442695, %v3055_v4  ;;  %v3317_v13 = vsel %vm323_vm3, %v5660_v40, 0.0 }
 0x7e5   :  { %v3314_v10 = vsel %vm323_vm3, %v3962_v49, 0.0  ;;  %v3350_v6 = vpack.c.bf16 %v5660_v40, %v3962_v49 }
 0x7e6   :  { %3965 = vpow2.f32 %v3068_v48  ;;  %2625 = vadd.xlane.f32.xlu2 %v2624_v57  ;;  %3315 = vadd.xlane.f32.xlu1 %v3314_v10 }
 0x7e7   :  { %3542 = vmatmul.msk.bf16.gmra.mxu0 %vm323_vm3, %v2671_v29  ;;  %3554 = vmatmul.msk.bf16.gmra.mxu3 %vm323_vm3, %v3350_v6 }
 0x7e8   :  { %v2815_v58 = vpop.xlane.xlu0 %2814 }
 0x7e9   :  { %v2825_v55 = vsub.f32 %v5566_v11, %v2815_v58  ;;  %v3274_v34 = vpop.xlane.xlu1 %3273 }
 0x7ea   :  { %v3964_v28 = vpop.eup %3963  ;;  %v3284_v8 = vsub.f32 %v5564_v15, %v3274_v34 }
 0x7eb   :  { %v2839_v59 = vmul.f32 1.442695, %v2825_v55  ;;  %v2630_v22 = vsel %vm323_vm3, %v3964_v28, 0.0 }
 0x7ec   :  { %v3966_v17 = vpop.eup %3965  ;;  %2631 = vadd.xlane.f32.xlu0 %v2630_v22  ;;  %v3298_v11 = vmul.f32 1.442695, %v3284_v8 }
 0x7ed   :  { %3967 = vpow2.f32 %v2839_v59  ;;  %v3122_v44 = vpack.c.bf16 %v3966_v17, %v3950_v0  ;;  %v3089_v5 = vsel %vm323_vm3, %v3966_v17, 0.0 }
 0x7ee   :  { %2856 = vadd.xlane.f32.xlu2 %v2855_v45  ;;  %2628 = vadd.xlane.f32.xlu1 %v2627_v56  ;;  %3969 = vpow2.f32 %v3298_v11  ;;  %v5697_v56 = vld [vmem:[%s5755_s16] ss:$0 sm:$0xff] }
 0x7ef   :  { %3550 = vmatmul.msk.bf16.gmra.mxu1 %vm323_vm3, %v3122_v44 }
 0x7f0   :  { %v3277_v41 = vpop.xlane.xlu0 %3276 }
 0x7f1   :  { %v3285_v63 = vsub.f32 %v5576_v62, %v3277_v41  ;;  %v2587_v43 = vpop.xlane.xlu1 %2586 }
 0x7f2   :  { %v2595_v26 = vsub.f32 %v5578_v42, %v2587_v43 }
 0x7f3   :  { %v3968_v18 = vpop.eup %3967  ;;  %v3300_v15 = vmul.f32 1.442695, %v3285_v63 }
 0x7f4   :  { %v2610_v27 = vmul.f32 1.442695, %v2595_v26  ;;  %v2861_v37 = vsel %vm323_vm3, %v3968_v18, 0.0  ;;  %v3970_v62 = vpop.eup %3969 }
 0x7f5   :  { %3971 = vpow2.f32 %v3300_v15  ;;  %2862 = vadd.xlane.f32.xlu0 %v2861_v37 }
 0x7f6   :  { %3973 = vpow2.f32 %v2610_v27  ;;  %3090 = vadd.xlane.f32.xlu2 %v3089_v5  ;;  %2859 = vadd.xlane.f32.xlu1 %v2858_v38 }
 0x7f9   :  { %v3049_v50 = vpop.xlane.xlu1 %3048 }
 0x7fa   :  { %v3057_v16 = vsub.f32 %v5586_v2, %v3049_v50  ;;  %v2818_v42 = vpop.xlane.xlu2 %2817 }
 0x7fb   :  { %v3972_v9 = vpop.eup %3971  ;;  %v2826_v20 = vsub.f32 %v5588_v39, %v2818_v42 }
 0x7fc   :  { %v3974_v33 = vpop.eup %3973  ;;  %v3072_v36 = vmul.f32 1.442695, %v3057_v16  ;;  %v3351_v3 = vpack.c.bf16 %v3972_v9, %v3970_v62  ;;  %v3323_v7 = vsel %vm323_vm3, %v3972_v9, 0.0 }
 0x7fd   :  { %v2841_v21 = vmul.f32 1.442695, %v2826_v20  ;;  %v2633_v54 = vsel %vm323_vm3, %v3974_v33, 0.0  ;;  %v2672_v25 = vpack.c.bf16 %v3974_v33, %v3964_v28 }
 0x7fe   :  { %3975 = vpow2.f32 %v3072_v36  ;;  %2634 = vadd.xlane.f32.xlu2 %v2633_v54  ;;  %3555 = vmatmul.msk.bf16.gmra.mxu3 %vm323_vm3, %v3351_v3 }
 0x7ff   :  { %3977 = vpow2.f32 %v2841_v21  ;;  %3543 = vmatmul.msk.bf16.gmra.mxu0 %vm323_vm3, %v2672_v25 }
 0x802   :  { %v3046_v0 = vpop.xlane.xlu2 %3045 }
 0x803   :  { %v3056_v2 = vsub.f32 %v5594_v30, %v3046_v0  ;;  %v3320_v30 = vsel %vm323_vm3, %v3970_v62, 0.0 }
 0x804   :  { %v3976_v23 = vpop.eup %3975 }
 0x805   :  { %v3978_v47 = vpop.eup %3977  ;;  %v3070_v39 = vmul.f32 1.442695, %v3056_v2  ;;  %v3095_v61 = vsel %vm323_vm3, %v3976_v23, 0.0 }
 0x806   :  { %3096 = vadd.xlane.f32.xlu0 %v3095_v61  ;;  %v2864_v46 = vsel %vm323_vm3, %v3978_v47, 0.0  ;;  %v2895_v51 = vpack.c.bf16 %v3978_v47, %v3968_v18 }
 0x807   :  { %3979 = vpow2.f32 %v3070_v39  ;;  %2865 = vadd.xlane.f32.xlu2 %v2864_v46 }
 0x808   :  { %3547 = vmatmul.msk.bf16.gmra.mxu2 %vm323_vm3, %v2895_v51 }
 0x80d   :  { %v3980_v52 = vpop.eup %3979  ;;  %v2614_v31 = vpop.xlane.xlu0 %2613 }
 0x80e   :  { %3318 = vadd.xlane.f32.xlu0 %v3317_v13  ;;  %v3092_v19 = vsel %vm323_vm3, %v3980_v52, 0.0  ;;  %v3123_v14 = vpack.c.bf16 %v3976_v23, %v3980_v52  ;;  %3981 = vrcp.f32 %v2614_v31 }
 0x80f   :  { %3321 = vadd.xlane.f32.xlu2 %v3320_v30  ;;  %3093 = vadd.xlane.f32.xlu1 %v3092_v19 }
 0x810   :  { %3551 = vmatmul.msk.bf16.gmra.mxu1 %vm323_vm3, %v3123_v14 }
 0x814   :  { %v3982_v57 = vpop.eup %3981 }
 0x815   :  { %v2845_v35 = vpop.xlane.xlu0 %2844 }
 0x816   :  { %3983 = vrcp.f32 %v2845_v35 }
 0x817   :  { %3324 = vadd.xlane.f32.xlu1 %v3323_v7 }
 0x81c   :  { %v3984_v10 = vpop.eup %3983 }
 0x81d   :  { %v3079_v53 = vpop.xlane.xlu0 %3078 }
 0x826   :  { %v2917_v4 = vpop.f32.mrf.mxu2 }
 0x827   :  { %v2937_v58 = vmul.f32 %v3984_v10, %v2917_v4 }
 0x829   :  { %v3304_v24 = vpop.xlane.xlu2 %3303 }
 0x82d   :  { %v3310_v12 = vpop.xlane.xlu0 %3309 }
 0x82e   :  { %v2919_v63 = vpop.f32.mrf.mxu2 }
 0x831   :  { %v3076_v32 = vpop.xlane.xlu1 %3075 }
 0x832   :  { %3985 = vrcp.f32 %v3076_v32 }
 0x833   :  { %3987 = vrcp.f32 %v3304_v24 }
 0x835   :  { %v2623_v28 = vpop.xlane.xlu0 %2622 }
 0x838   :  { %v3986_v34 = vpop.eup %3985 }
 0x839   :  { %v2617_v1 = vpop.xlane.xlu2 %2616  ;;  %v3307_v60 = vpop.xlane.xlu1 %3306 }
 0x83a   :  { %v3373_v29 = vpop.f32.mrf.mxu3  ;;  %v3988_v17 = vpop.eup %3987 }
 0x83b   :  { %v3393_v8 = vmul.f32 %v3988_v17, %v3373_v29 }
 0x83c   :  { %v3145_v40 = vpop.f32.mrf.mxu1 }
 0x83d   :  { %v3165_v59 = vmul.f32 %v3986_v34, %v3145_v40  ;;  %v2854_v9 = vpop.xlane.xlu0 %2853 }
 0x841   :  { %v2848_v49 = vpop.xlane.xlu2 %2847  ;;  %v2620_v48 = vpop.xlane.xlu1 %2619 }
 0x842   :  { %3989 = vrcp.f32 %v2848_v49  ;;  %v3375_v50 = vpop.f32.mrf.mxu3 }
 0x843   :  { %3991 = vrcp.f32 %v2617_v1 }
 0x844   :  { %v2694_v6 = vpop.f32.mrf.mxu0  ;;  %3993 = vrcp.f32 %v3079_v53  ;;  %v3147_v43 = vpop.f32.mrf.mxu1 }
 0x845   :  { %v2714_v55 = vmul.f32 %v3982_v57, %v2694_v6  ;;  %3995 = vrcp.f32 %v3307_v60 }
 0x846   :  { %3997 = vrcp.f32 %v2620_v48 }
 0x847   :  { %v2945_v22 = vadd.f32 %v2937_v58, %v2714_v55 }
 0x848   :  { %v3990_v41 = vpop.eup %3989 }
 0x849   :  { %v3173_v45 = vadd.f32 %v3165_v59, %v2945_v22  ;;  %v3082_v44 = vpop.xlane.xlu2 %3081  ;;  %v2851_v11 = vpop.xlane.xlu1 %2850  ;;  %v2938_v5 = vmul.f32 %v3990_v41, %v2919_v63 }
 0x84a   :  { %v3992_v18 = vpop.eup %3991  ;;  %3999 = vrcp.f32 %v3082_v44 }
 0x84b   :  { %v3401_v26 = vadd.f32 %v3393_v8, %v3173_v45  ;;  %v3994_v38 = vpop.eup %3993  ;;  %4001 = vrcp.f32 %v2851_v11 }
 0x84c   :  { %v2696_v15 = vpop.f32.mrf.mxu0  ;;  %v3166_v62 = vmul.f32 %v3994_v38, %v3147_v43  ;;  %v3996_v42 = vpop.eup %3995  ;;  %4003 = vrcp.f32 %v3310_v12 }
 0x84d   :  { %v3413_v27 = vadd.f32 %v5697_v56, %v3401_v26  ;;  %v2715_v37 = vmul.f32 %v3992_v18, %v2696_v15  ;;  %v3394_v20 = vmul.f32 %v3996_v42, %v3375_v50  ;;  %v3998_v3 = vpop.eup %3997  ;;  %4005 = vrcp.f32 %v2623_v28  ;;  %v3088_v48 = vpop.xlane.xlu0 %3087 }
 0x84e   :  { %4007 = vrcp.f32 %v2854_v9  ;;  %v3378_v51 = vpop.f32.mrf.mxu3 }
 0x84f   :  { %3421 = vst.msk [vmem:[%s5756_s17] sm:$0xff] %vm75_vm0, %v3413_v27  ;;  %v2946_v16 = vadd.f32 %v2938_v5, %v2715_v37 }
 0x850   :  { %v3150_v21 = vpop.f32.mrf.mxu1  ;;  %v4000_v25 = vpop.eup %3999 }
 0x851   :  { %v3174_v33 = vadd.f32 %v3166_v62, %v2946_v16  ;;  %v3313_v36 = vpop.xlane.xlu2 %3312  ;;  %v3085_v2 = vpop.xlane.xlu1 %3084  ;;  %v3167_v52 = vmul.f32 %v4000_v25, %v3150_v21 }
 0x852   :  { %v2922_v54 = vpop.f32.mrf.mxu2  ;;  %v4002_v23 = vpop.eup %4001  ;;  %4009 = vrcp.f32 %v3085_v2 }
 0x853   :  { %v3402_v0 = vadd.f32 %v3394_v20, %v3174_v33  ;;  %v2939_v61 = vmul.f32 %v4002_v23, %v2922_v54  ;;  %v4004_v30 = vpop.eup %4003  ;;  %4011 = vrcp.f32 %v3313_v36 }
 0x854   :  { %v2699_v47 = vpop.f32.mrf.mxu0  ;;  %v3395_v19 = vmul.f32 %v4004_v30, %v3378_v51  ;;  %v4006_v31 = vpop.eup %4005 }
 0x855   :  { %v3414_v39 = vadd.f32 %v5697_v56, %v3402_v0  ;;  %v2716_v46 = vmul.f32 %v3998_v3, %v2699_v47  ;;  %v4008_v24 = vpop.eup %4007 }
 0x856   :  { %v3380_v29 = vpop.f32.mrf.mxu3 }
 0x857   :  { %3422 = vst.msk [vmem:[%s5756_s17 + $0x8] sm:$0xff] %vm75_vm0, %v3414_v39  ;;  %v2947_v13 = vadd.f32 %v2939_v61, %v2716_v46 }
 0x858   :  { %v4010_v53 = vpop.eup %4009  ;;  %v3152_v1 = vpop.f32.mrf.mxu1 }
 0x859   :  { %v3175_v14 = vadd.f32 %v3167_v52, %v2947_v13  ;;  %v2626_v7 = vpop.xlane.xlu2 %2625  ;;  %v4012_v49 = vpop.eup %4011  ;;  %v3168_v57 = vmul.f32 %v4010_v53, %v3152_v1 }
 0x85a   :  { %v2924_v35 = vpop.f32.mrf.mxu2  ;;  %v3396_v6 = vmul.f32 %v4012_v49, %v3380_v29  ;;  %v3316_v34 = vpop.xlane.xlu1 %3315 }
 0x85b   :  { %v3403_v32 = vadd.f32 %v3395_v19, %v3175_v14  ;;  %v2940_v4 = vmul.f32 %v4008_v24, %v2924_v35 }
 0x85c   :  { %v2701_v60 = vpop.f32.mrf.mxu0 }
 0x85d   :  { %v3415_v12 = vadd.f32 %v5697_v56, %v3403_v32  ;;  %v2717_v40 = vmul.f32 %v4006_v31, %v2701_v60 }
 0x85f   :  { %3423 = vst.msk [vmem:[%s5756_s17 + $0x10] sm:$0xff] %vm75_vm0, %v3415_v12  ;;  %v2948_v10 = vadd.f32 %v2940_v4, %v2717_v40  ;;  %v2632_v22 = vpop.xlane.xlu0 %2631 }
 0x861   :  { %v3176_v58 = vadd.f32 %v3168_v57, %v2948_v10  ;;  %v2857_v55 = vpop.xlane.xlu2 %2856 }
 0x862   :  { %4013 = vrcp.f32 %v2857_v55  ;;  %v2629_v15 = vpop.xlane.xlu1 %2628 }
 0x863   :  { %v3404_v28 = vadd.f32 %v3396_v6, %v3176_v58  ;;  %4015 = vrcp.f32 %v2626_v7 }
 0x864   :  { %4017 = vrcp.f32 %v3088_v48  ;;  %v2704_v8 = vpop.f32.mrf.mxu0 }
 0x865   :  { %v3416_v59 = vadd.f32 %v5697_v56, %v3404_v28  ;;  %4019 = vrcp.f32 %v3316_v34 }
 0x866   :  { %v2927_v45 = vpop.f32.mrf.mxu2 }
 0x867   :  { %3424 = vst.msk [vmem:[%s5756_s17 + $0x18] sm:$0xff] %vm75_vm0, %v3416_v59 }
 0x868   :  { %v4014_v17 = vpop.eup %4013  ;;  %v2863_v62 = vpop.xlane.xlu0 %2862 }
 0x869   :  { %v2941_v44 = vmul.f32 %v4014_v17, %v2927_v45  ;;  %v3091_v11 = vpop.xlane.xlu2 %3090  ;;  %v4016_v41 = vpop.eup %4015 }
 0x86a   :  { %v2718_v63 = vmul.f32 %v4016_v41, %v2704_v8  ;;  %v4018_v43 = vpop.eup %4017  ;;  %v3383_v26 = vpop.f32.mrf.mxu3 }
 0x86b   :  { %v4020_v5 = vpop.eup %4019  ;;  %v2860_v20 = vpop.xlane.xlu1 %2859 }
 0x86c   :  { %v3155_v18 = vpop.f32.mrf.mxu1  ;;  %v2949_v27 = vadd.f32 %v2941_v44, %v2718_v63  ;;  %v3397_v38 = vmul.f32 %v4020_v5, %v3383_v26  ;;  %4021 = vrcp.f32 %v2860_v20  ;;  %v2706_v3 = vpop.f32.mrf.mxu0 }
 0x86d   :  { %v3169_v37 = vmul.f32 %v4018_v43, %v3155_v18  ;;  %4023 = vrcp.f32 %v2629_v15 }
 0x86e   :  { %4025 = vrcp.f32 %v3091_v11  ;;  %v2929_v54 = vpop.f32.mrf.mxu2 }
 0x86f   :  { %v3177_v50 = vadd.f32 %v3169_v37, %v2949_v27 }
 0x871   :  { %v3405_v16 = vadd.f32 %v3397_v38, %v3177_v50  ;;  %v2635_v42 = vpop.xlane.xlu2 %2634 }
 0x872   :  { %v4022_v21 = vpop.eup %4021  ;;  %v3385_v51 = vpop.f32.mrf.mxu3 }
 0x873   :  { %v3417_v9 = vadd.f32 %v5697_v56, %v3405_v16  ;;  %v4024_v23 = vpop.eup %4023  ;;  %v2942_v47 = vmul.f32 %v4022_v21, %v2929_v54 }
 0x874   :  { %v3157_v0 = vpop.f32.mrf.mxu1  ;;  %v4026_v61 = vpop.eup %4025  ;;  %v2719_v46 = vmul.f32 %v4024_v23, %v2706_v3 }
 0x875   :  { %3425 = vst.msk [vmem:[%s5756_s17 + $0x20] sm:$0xff] %vm75_vm0, %v3417_v9  ;;  %v3170_v52 = vmul.f32 %v4026_v61, %v3157_v0 }
 0x876   :  { %v2950_v13 = vadd.f32 %v2942_v47, %v2719_v46 }
 0x878   :  { %v3178_v14 = vadd.f32 %v3170_v52, %v2950_v13 }
 0x879   :  { %v3097_v33 = vpop.xlane.xlu0 %3096 }
 0x87a   :  { %v2866_v36 = vpop.xlane.xlu2 %2865 }
 0x87c   :  { %v2709_v30 = vpop.f32.mrf.mxu0 }
 0x881   :  { %v3319_v25 = vpop.xlane.xlu0 %3318  ;;  %v3388_v40 = vpop.f32.mrf.mxu3 }
 0x882   :  { %4027 = vrcp.f32 %v3319_v25  ;;  %v3094_v2 = vpop.xlane.xlu1 %3093  ;;  %v3322_v39 = vpop.xlane.xlu2 %3321 }
 0x883   :  { %4029 = vrcp.f32 %v2632_v22 }
 0x884   :  { %4031 = vrcp.f32 %v2863_v62  ;;  %v2711_v58 = vpop.f32.mrf.mxu0 }
 0x885   :  { %4033 = vrcp.f32 %v3322_v39 }
 0x886   :  { %4035 = vrcp.f32 %v3094_v2 }
 0x887   :  { %4037 = vrcp.f32 %v2635_v42 }
 0x888   :  { %v4028_v19 = vpop.eup %4027  ;;  %4039 = vrcp.f32 %v2866_v36 }
 0x889   :  { %v3398_v7 = vmul.f32 %v4028_v19, %v3385_v51  ;;  %v4030_v31 = vpop.eup %4029  ;;  %4041 = vrcp.f32 %v3097_v33  ;;  %v3390_v43 = vpop.f32.mrf.mxu3 }
 0x88a   :  { %v4032_v35 = vpop.eup %4031  ;;  %v2720_v1 = vmul.f32 %v4030_v31, %v2709_v30  ;;  %v3325_v60 = vpop.xlane.xlu1 %3324 }
 0x88b   :  { %v3406_v24 = vadd.f32 %v3398_v7, %v3178_v14  ;;  %v2932_v32 = vpop.f32.mrf.mxu2  ;;  %v4034_v53 = vpop.eup %4033  ;;  %4043 = vrcp.f32 %v3325_v60 }
 0x88c   :  { %v2943_v12 = vmul.f32 %v4032_v35, %v2932_v32  ;;  %v4036_v4 = vpop.eup %4035  ;;  %v3399_v6 = vmul.f32 %v4034_v53, %v3388_v40 }
 0x88d   :  { %v3418_v49 = vadd.f32 %v5697_v56, %v3406_v24  ;;  %v3160_v48 = vpop.f32.mrf.mxu1  ;;  %v4038_v55 = vpop.eup %4037 }
 0x88e   :  { %v2951_v57 = vadd.f32 %v2943_v12, %v2720_v1  ;;  %v3171_v10 = vmul.f32 %v4036_v4, %v3160_v48  ;;  %v4040_v28 = vpop.eup %4039  ;;  %v2721_v17 = vmul.f32 %v4038_v55, %v2711_v58 }
 0x88f   :  { %3426 = vst.msk [vmem:[%s5756_s17 + $0x28] sm:$0xff] %vm75_vm0, %v3418_v49  ;;  %v4042_v22 = vpop.eup %4041 }
 0x890   :  { %v3179_v29 = vadd.f32 %v3171_v10, %v2951_v57 }
 0x891   :  { %v4044_v44 = vpop.eup %4043 }
 0x892   :  { %v3407_v34 = vadd.f32 %v3399_v6, %v3179_v29  ;;  %v3400_v18 = vmul.f32 %v4044_v44, %v3390_v43 }
 0x893   :  { %v2934_v59 = vpop.f32.mrf.mxu2 }
 0x894   :  { %v3419_v8 = vadd.f32 %v5697_v56, %v3407_v34  ;;  %v2944_v45 = vmul.f32 %v4040_v28, %v2934_v59 }
 0x895   :  { %v3162_v11 = vpop.f32.mrf.mxu1 }
 0x896   :  { %3427 = vst.msk [vmem:[%s5756_s17 + $0x30] sm:$0xff] %vm75_vm0, %v3419_v8  ;;  %v2952_v41 = vadd.f32 %v2944_v45, %v2721_v17  ;;  %v3172_v63 = vmul.f32 %v4042_v22, %v3162_v11 }
 0x898   :  { %v3180_v26 = vadd.f32 %v3172_v63, %v2952_v41 }
 0x89a   :  { %v3408_v15 = vadd.f32 %v3400_v18, %v3180_v26 }
 0x89c   :  { %v3420_v27 = vadd.f32 %v5697_v56, %v3408_v15 }
 0x89e   :  { %3428 = vst.msk [vmem:[%s5756_s17 + $0x38] sm:$0xff] %vm75_vm0, %v3420_v27 }

</bundles_post_ra>
